<compile_context>
chip_gen: v5e
topology: v5e:2x2
jax: 0.10.0
libtpu: 0.0.40
codegen_flags: <defaults>
</compile_context>

<pallas_src>
import functools
import math

import jax
import jax.numpy as jnp
from jax import lax
from jax.experimental import pallas as pl
from jax.experimental.pallas import tpu as pltpu

LN_EPS = 1e-6

# ----------------------------------------------------------------------------
# Generation-aware tiling configuration
# ----------------------------------------------------------------------------


def _device_kind():
    try:
        return jax.devices()[0].device_kind.lower()
    except Exception:
        return ""


_KIND = _device_kind()
if "v5" in _KIND:
    _TM, _TN, _TK = 256, 256, 256          # 128-multiples for the 4x128^2 MXU
    _VMEM_LIMIT = 64 * 1024 * 1024
elif "v7" in _KIND:
    _TM, _TN, _TK = 256, 256, 512          # smaller working set: 64 MiB physical VMEM
    _VMEM_LIMIT = 32 * 1024 * 1024
else:                                      # v6e / default
    _TM, _TN, _TK = 512, 256, 512
    _VMEM_LIMIT = 64 * 1024 * 1024


def _cparams(sem):
    return pltpu.CompilerParams(dimension_semantics=sem,
                                vmem_limit_bytes=_VMEM_LIMIT)


def _round_up(x, m):
    return (x + m - 1) // m * m


def _pick_tile(dim, target, align):
    """Return (tile, padded_dim). Tile is either the full dim (no padding) or an
    aligned target tile with dim padded up to a multiple of it."""
    if dim <= target:
        return dim, dim
    tile = max(align, (target // align) * align)
    return tile, _round_up(dim, tile)


def _divisor_tile(dim, candidates):
    for c in candidates:
        if dim % c == 0:
            return c
    return dim


def _pad2(a, rows, cols):
    pr, pc = rows - a.shape[0], cols - a.shape[1]
    if pr == 0 and pc == 0:
        return a
    return jnp.pad(a, ((0, pr), (0, pc)))


# ----------------------------------------------------------------------------
# Pallas kernels
# ----------------------------------------------------------------------------


def _matmul_kernel(*refs, has_bias, relu, has_res):
    """Tiled x @ w (+bias) (+relu) (+residual). Grid (Mt, Nt, Kt), K last."""
    x_ref, w_ref = refs[0], refs[1]
    i = 2
    b_ref = None
    r_ref = None
    if has_bias:
        b_ref = refs[i]
        i += 1
    if has_res:
        r_ref = refs[i]
        i += 1
    o_ref, acc_ref = refs[i], refs[i + 1]

    k = pl.program_id(2)

    @pl.when(k == 0)
    def _():
        acc_ref[...] = jnp.zeros_like(acc_ref)

    acc_ref[...] += jnp.dot(x_ref[...], w_ref[...],
                            preferred_element_type=jnp.float32)

    @pl.when(k == pl.num_programs(2) - 1)
    def _():
        y = acc_ref[...]
        if has_bias:
            y = y + b_ref[...]
        if relu:
            y = jnp.maximum(y, 0.0)
        if has_res:
            y = y + r_ref[...].astype(jnp.float32)
        o_ref[...] = y.astype(o_ref.dtype)


def _matmul_ln_kernel(x_ref, w_ref, g_ref, bln_ref, o_ref, acc_ref):
    """x @ w followed by LayerNorm over the (whole) output feature dim.
    Grid (Mt, Kt), K last; the N dim stays untiled so LN statistics are exact."""
    k = pl.program_id(1)

    @pl.when(k == 0)
    def _():
        acc_ref[...] = jnp.zeros_like(acc_ref)

    acc_ref[...] += jnp.dot(x_ref[...], w_ref[...],
                            preferred_element_type=jnp.float32)

    @pl.when(k == pl.num_programs(1) - 1)
    def _():
        y = acc_ref[...]
        d = y.shape[-1]
        mean = jnp.mean(y, axis=-1, keepdims=True)
        var = jnp.sum((y - mean) ** 2, axis=-1, keepdims=True) * (1.0 / (d - 1))
        inv = pl.reciprocal(jnp.sqrt(var) + LN_EPS, approx=True)
        o_ref[...] = (g_ref[...] * (y - mean) * inv + bln_ref[...]).astype(o_ref.dtype)


def _ln_matmul_kernel(x_ref, g_ref, bln_ref, w_ref, b_ref, o_ref, *, relu):
    """Fused LayerNorm(x) @ w + b (+relu). Grid (Mt, Nt); K (=D) untiled."""
    x = x_ref[...].astype(jnp.float32)
    d = x.shape[-1]
    mean = jnp.mean(x, axis=-1, keepdims=True)
    var = jnp.sum((x - mean) ** 2, axis=-1, keepdims=True) * (1.0 / (d - 1))
    inv = pl.reciprocal(jnp.sqrt(var) + LN_EPS, approx=True)
    xn = g_ref[...] * (x - mean) * inv + bln_ref[...]
    y = jnp.dot(xn, w_ref[...], preferred_element_type=jnp.float32) + b_ref[...]
    if relu:
        y = jnp.maximum(y, 0.0)
    o_ref[...] = y.astype(o_ref.dtype)


def _layernorm_kernel(x_ref, g_ref, b_ref, o_ref):
    x = x_ref[...].astype(jnp.float32)
    d = x.shape[-1]
    mean = jnp.mean(x, axis=-1, keepdims=True)
    var = jnp.sum((x - mean) ** 2, axis=-1, keepdims=True) * (1.0 / (d - 1))
    inv = pl.reciprocal(jnp.sqrt(var) + LN_EPS, approx=True)
    o_ref[...] = (g_ref[...] * (x - mean) * inv + b_ref[...]).astype(o_ref.dtype)


def _mha_core(q, k, v, mask, heads):
    """q (Lq,D), k/v (Lk,D), mask (1,Lk) with 1.0 == padded. Returns (Lq,D)."""
    lq, d = q.shape
    dk = d // heads
    q = q * jnp.float32(1.0 / math.sqrt(dk))   # scale once on q
    cols = []
    for h in range(heads):                      # static head split, lane-dense D layout
        qh = q[:, h * dk:(h + 1) * dk]
        kh = k[:, h * dk:(h + 1) * dk]
        vh = v[:, h * dk:(h + 1) * dk]
        s = lax.dot_general(qh, kh, (((1,), (1,)), ((), ())),
                            preferred_element_type=jnp.float32)      # (Lq, Lk)
        s = jnp.where(mask > 0.5, jnp.float32(-1e9), s)
        m_ = jnp.max(s, axis=-1, keepdims=True)
        e = jnp.exp(s - m_)
        p = e * pl.reciprocal(jnp.sum(e, axis=-1, keepdims=True), approx=True)
        cols.append(jnp.dot(p, vh, preferred_element_type=jnp.float32))
    return jnp.concatenate(cols, axis=-1)       # (Lq, D)


def _self_attn_kernel(qkv_ref, m_ref, wo_ref, bo_ref, res_ref, o_ref, *, heads, d):
    """MHA(q,k,v from one (L,3D) slab) -> @Wo + bo + residual, fused."""
    qkv = qkv_ref[0].astype(jnp.float32)        # (L, 3D)
    attn = _mha_core(qkv[:, :d], qkv[:, d:2 * d], qkv[:, 2 * d:], m_ref[0], heads)
    y = jnp.dot(attn, wo_ref[...], preferred_element_type=jnp.float32) + bo_ref[...]
    o_ref[0] = (y + res_ref[0].astype(jnp.float32)).astype(o_ref.dtype)


def _cross_attn_kernel(q_ref, kv_ref, m_ref, wo_ref, bo_ref, res_ref, o_ref, *, heads, d):
    """Cross-MHA(q, k/v from (Lk,2D) slab) -> @Wo + bo + residual, fused."""
    q = q_ref[0].astype(jnp.float32)            # (Lq, D)
    kv = kv_ref[0].astype(jnp.float32)          # (Lk, 2D)
    attn = _mha_core(q, kv[:, :d], kv[:, d:], m_ref[0], heads)
    y = jnp.dot(attn, wo_ref[...], preferred_element_type=jnp.float32) + bo_ref[...]
    o_ref[0] = (y + res_ref[0].astype(jnp.float32)).astype(o_ref.dtype)


def _ln_maxpool_linear_kernel(x_ref, g_ref, bln_ref, w_ref, b_ref, o_ref, pool_ref):
    """LayerNorm (per position) -> max over L -> Linear. Grid over L tiles."""
    l = pl.program_id(0)

    @pl.when(l == 0)
    def _():
        pool_ref[...] = jnp.full(pool_ref.shape, -jnp.inf, dtype=pool_ref.dtype)

    x = x_ref[...].astype(jnp.float32)          # (B, tl, D)
    d = x.shape[-1]
    mean = jnp.mean(x, axis=-1, keepdims=True)
    var = jnp.sum((x - mean) ** 2, axis=-1, keepdims=True) * (1.0 / (d - 1))
    inv = pl.reciprocal(jnp.sqrt(var) + LN_EPS, approx=True)
    xn = g_ref[...] * (x - mean) * inv + bln_ref[...]
    pool_ref[...] = jnp.maximum(pool_ref[...], jnp.max(xn, axis=1))

    @pl.when(l == pl.num_programs(0) - 1)
    def _():
        y = jnp.dot(pool_ref[...], w_ref[...], preferred_element_type=jnp.float32)
        o_ref[...] = (y + b_ref[...]).astype(o_ref.dtype)


# ----------------------------------------------------------------------------
# Pallas wrappers
# ----------------------------------------------------------------------------


def pallas_linear(x, w, b=None, relu=False, residual=None):
    """Tiled (M,N,K) matmul with f32 accumulator; optional bias/relu/residual."""
    lead = x.shape[:-1]
    M = math.prod(lead)
    K = x.shape[-1]
    N = w.shape[-1]

    tm, Mp = _pick_tile(M, _TM, 8)
    tn, Np = _pick_tile(N, _TN, 128)
    tk, Kp = _pick_tile(K, _TK, 128)

    x2 = _pad2(x.reshape(M, K), Mp, Kp)
    wp = _pad2(w, Kp, Np)

    args = [x2, wp]
    in_specs = [pl.BlockSpec((tm, tk), lambda i, j, k: (i, k)),
                pl.BlockSpec((tk, tn), lambda i, j, k: (k, j))]
    if b is not None:
        args.append(_pad2(b.reshape(1, N), 1, Np))
        in_specs.append(pl.BlockSpec((1, tn), lambda i, j, k: (0, j)))
    if residual is not None:
        args.append(_pad2(residual.reshape(M, N), Mp, Np))
        in_specs.append(pl.BlockSpec((tm, tn), lambda i, j, k: (i, j)))

    kern = functools.partial(_matmul_kernel, has_bias=b is not None,
                             relu=relu, has_res=residual is not None)
    out = pl.pallas_call(
        kern,
        out_shape=jax.ShapeDtypeStruct((Mp, Np), jnp.float32),
        grid=(Mp // tm, Np // tn, Kp // tk),
        in_specs=in_specs,
        out_specs=pl.BlockSpec((tm, tn), lambda i, j, k: (i, j)),
        scratch_shapes=[pltpu.VMEM((tm, tn), jnp.float32)],
        compiler_params=_cparams(("parallel", "parallel", "arbitrary")),
        cost_estimate=pl.CostEstimate(
            flops=2 * M * N * K, transcendentals=0,
            bytes_accessed=4 * (M * K + K * N + 2 * M * N)),
    )(*args)
    return out[:M, :N].reshape(*lead, N)


def pallas_linear_ln(x, w, g, bln):
    """Fused Linear (no bias) -> LayerNorm over the output features.
    Output feature dim is kept whole (untiled) so LN stats are exact."""
    lead = x.shape[:-1]
    M = math.prod(lead)
    K = x.shape[-1]
    N = w.shape[-1]

    tm, Mp = _pick_tile(M, _TM, 8)
    tk, Kp = _pick_tile(K, _TK, 128)

    x2 = _pad2(x.reshape(M, K), Mp, Kp)
    wp = _pad2(w, Kp, N)

    out = pl.pallas_call(
        _matmul_ln_kernel,
        out_shape=jax.ShapeDtypeStruct((Mp, N), jnp.float32),
        grid=(Mp // tm, Kp // tk),
        in_specs=[pl.BlockSpec((tm, tk), lambda i, k: (i, k)),
                  pl.BlockSpec((tk, N), lambda i, k: (k, 0)),
                  pl.BlockSpec((1, N), lambda i, k: (0, 0)),
                  pl.BlockSpec((1, N), lambda i, k: (0, 0))],
        out_specs=pl.BlockSpec((tm, N), lambda i, k: (i, 0)),
        scratch_shapes=[pltpu.VMEM((tm, N), jnp.float32)],
        compiler_params=_cparams(("parallel", "arbitrary")),
        cost_estimate=pl.CostEstimate(
            flops=2 * M * N * K, transcendentals=2 * M,
            bytes_accessed=4 * (M * K + K * N + M * N)),
    )(x2, wp, g.reshape(1, N), bln.reshape(1, N))
    return out[:M].reshape(*lead, N)


def pallas_ln_linear(x, g, bln, w, b, relu=False):
    """Fused LayerNorm -> Linear (+relu). Grid (Mt, Nt); the feature dim stays whole."""
    lead = x.shape[:-1]
    M = math.prod(lead)
    D = x.shape[-1]
    N = w.shape[-1]

    tm, Mp = _pick_tile(M, _TM, 8)
    tn, Np = _pick_tile(N, _TN, 128)

    x2 = _pad2(x.reshape(M, D), Mp, D)
    wp = _pad2(w, D, Np)
    bp = _pad2(b.reshape(1, N), 1, Np)

    kern = functools.partial(_ln_matmul_kernel, relu=relu)
    out = pl.pallas_call(
        kern,
        out_shape=jax.ShapeDtypeStruct((Mp, Np), jnp.float32),
        grid=(Mp // tm, Np // tn),
        in_specs=[
            pl.BlockSpec((tm, D), lambda i, j: (i, 0)),
            pl.BlockSpec((1, D), lambda i, j: (0, 0)),
            pl.BlockSpec((1, D), lambda i, j: (0, 0)),
            pl.BlockSpec((D, tn), lambda i, j: (0, j)),
            pl.BlockSpec((1, tn), lambda i, j: (0, j)),
        ],
        out_specs=pl.BlockSpec((tm, tn), lambda i, j: (i, j)),
        compiler_params=_cparams(("parallel", "parallel")),
        cost_estimate=pl.CostEstimate(
            flops=2 * M * N * D, transcendentals=2 * M,
            bytes_accessed=4 * (M * D + D * N + M * N)),
    )(x2, g.reshape(1, D), bln.reshape(1, D), wp, bp)
    return out[:M, :N].reshape(*lead, N)


def pallas_layernorm(x, g, b):
    lead = x.shape[:-1]
    D = x.shape[-1]
    M = math.prod(lead)
    tm, Mp = _pick_tile(M, _TM, 8)
    x2 = _pad2(x.reshape(M, D), Mp, D)
    out = pl.pallas_call(
        _layernorm_kernel,
        out_shape=jax.ShapeDtypeStruct((Mp, D), jnp.float32),
        grid=(Mp // tm,),
        in_specs=[pl.BlockSpec((tm, D), lambda i: (i, 0)),
                  pl.BlockSpec((1, D), lambda i: (0, 0)),
                  pl.BlockSpec((1, D), lambda i: (0, 0))],
        out_specs=pl.BlockSpec((tm, D), lambda i: (i, 0)),
        compiler_params=_cparams(("parallel",)),
    )(x2, g.reshape(1, D), b.reshape(1, D))
    return out[:M].reshape(*lead, D)


def pallas_self_attention(qkv, mask, heads, wo, bo, residual):
    """qkv (B, L, 3D) lane-dense, mask (B, 1, L) float (1.0 == padded).
    Out-projection (wo, bo) and the residual add are fused into the kernel."""
    B, L, threeD = qkv.shape
    D = threeD // 3
    kern = functools.partial(_self_attn_kernel, heads=heads, d=D)
    return pl.pallas_call(
        kern,
        out_shape=jax.ShapeDtypeStruct((B, L, D), jnp.float32),
        grid=(B,),
        in_specs=[pl.BlockSpec((1, L, threeD), lambda b: (b, 0, 0)),
                  pl.BlockSpec((1, 1, L), lambda b: (b, 0, 0)),
                  pl.BlockSpec((D, D), lambda b: (0, 0)),
                  pl.BlockSpec((1, D), lambda b: (0, 0)),
                  pl.BlockSpec((1, L, D), lambda b: (b, 0, 0))],
        out_specs=pl.BlockSpec((1, L, D), lambda b: (b, 0, 0)),
        compiler_params=_cparams(("parallel",)),
    )(qkv, mask, wo, bo.reshape(1, D), residual)


def pallas_cross_attention(q, kv, mask, heads, wo, bo, residual):
    """q (B, Lq, D), kv (B, Lk, 2D), mask (B, 1, Lk) float (1.0 == padded).
    Out-projection and residual add fused."""
    B, Lq, D = q.shape
    Lk = kv.shape[1]
    kern = functools.partial(_cross_attn_kernel, heads=heads, d=D)
    return pl.pallas_call(
        kern,
        out_shape=jax.ShapeDtypeStruct((B, Lq, D), jnp.float32),
        grid=(B,),
        in_specs=[pl.BlockSpec((1, Lq, D), lambda b: (b, 0, 0)),
                  pl.BlockSpec((1, Lk, 2 * D), lambda b: (b, 0, 0)),
                  pl.BlockSpec((1, 1, Lk), lambda b: (b, 0, 0)),
                  pl.BlockSpec((D, D), lambda b: (0, 0)),
                  pl.BlockSpec((1, D), lambda b: (0, 0)),
                  pl.BlockSpec((1, Lq, D), lambda b: (b, 0, 0))],
        out_specs=pl.BlockSpec((1, Lq, D), lambda b: (b, 0, 0)),
        compiler_params=_cparams(("parallel",)),
    )(q, kv, mask, wo, bo.reshape(1, D), residual)


def pallas_ln_maxpool_linear(x, g, bln, w, b):
    """LayerNorm (per position) -> max over L -> Linear; output padded to a
    128-lane slab (lane-dense store) and sliced outside."""
    B, L, D = x.shape
    N = w.shape[-1]
    Np = _round_up(N, 128)
    wp = _pad2(w, D, Np)
    bp = _pad2(b.reshape(1, N), 1, Np)
    tl = _divisor_tile(L, (512, 256, 128, 64, 32, 16, 8))
    out = pl.pallas_call(
        _ln_maxpool_linear_kernel,
        out_shape=jax.ShapeDtypeStruct((B, Np), jnp.float32),
        grid=(L // tl,),
        in_specs=[pl.BlockSpec((B, tl, D), lambda l: (0, l, 0)),
                  pl.BlockSpec((1, D), lambda l: (0, 0)),
                  pl.BlockSpec((1, D), lambda l: (0, 0)),
                  pl.BlockSpec((D, Np), lambda l: (0, 0)),
                  pl.BlockSpec((1, Np), lambda l: (0, 0))],
        out_specs=pl.BlockSpec((B, Np), lambda l: (0, 0)),
        scratch_shapes=[pltpu.VMEM((B, D), jnp.float32)],
        compiler_params=_cparams(("arbitrary",)),
    )(x, g.reshape(1, D), bln.reshape(1, D), wp, bp)
    return out[:, :N]


# ----------------------------------------------------------------------------
# Transformer forward (thin glue around the fused kernels)
# ----------------------------------------------------------------------------


def self_attn_block(p, ln_p, heads, x, mask):
    # x + Wo(MHA(LN(x))) : LN fused into QKV projection; Wo + residual fused into attention
    qkv = pallas_ln_linear(x, ln_p["g"], ln_p["b"], p["wqkv"], p["bqkv"])
    return pallas_self_attention(qkv, mask, heads, p["wo"], p["bo"], x)


def cross_attn_block(p, ln_p, heads, x, memory, mask):
    # x + Wo(MHA(LN(x), memory, memory)) : K/V projections as one (D,2D) matmul;
    # Wo + residual fused into the attention kernel.
    q = pallas_ln_linear(x, ln_p["g"], ln_p["b"], p["wq"], p["bq"])
    kv = pallas_linear(memory, p["wkv"], p["bkv"])
    return pallas_cross_attention(q, kv, mask, heads, p["wo"], p["bo"], x)


def ff_block(p, ln_p, x):
    # x + W2(relu(W1(LN(x)))) : LN fused into FF1, residual fused into FF2
    h = pallas_ln_linear(x, ln_p["g"], ln_p["b"], p["w1"], p["b1"], relu=True)
    return pallas_linear(h, p["w2"], p["b2"], residual=x)


def encoder_fwd(p, heads, x, mask):
    for lp in p["layers"]:
        x = self_attn_block(lp["self_attn"], lp["ln1"], heads, x, mask)
        x = ff_block(lp["ff"], lp["ln2"], x)
    return pallas_layernorm(x, p["ln"]["g"], p["ln"]["b"])


def decoder_fwd(p, heads, x, memory, src_mask, tgt_mask):
    for lp in p["layers"]:
        x = self_attn_block(lp["self_attn"], lp["ln1"], heads, x, tgt_mask)
        x = cross_attn_block(lp["src_attn"], lp["ln2"], heads, x, memory, src_mask)
        x = ff_block(lp["ff"], lp["ln3"], x)
    return x  # final LN fused into the pooling/classifier head


def tenc_forward(params, x, x_prot, heads):
    # prot_mapper: Linear(protdim, embdim, bias=False) -> LayerNorm(embdim), fused.
    xp = pallas_linear_ln(x_prot, params["prot_w"],
                          params["prot_ln"]["g"], params["prot_ln"]["b"])

    # masks: True (1.0) == padded position; prot_mask from the *mapped* x_prot,
    # exactly as in the PyTorch reference.
    x_mask = (x[:, :, 0] == 0)[:, None, :].astype(jnp.float32)       # (B, 1, Lx)
    prot_mask = (xp[:, :, 0] == 0)[:, None, :].astype(jnp.float32)   # (B, 1, Lp)

    enc_out = encoder_fwd(params["encoder"], heads, xp, prot_mask)
    dec_out = decoder_fwd(params["decoder"], heads, x, enc_out, prot_mask, x_mask)

    # LayerNorm (decoder final) -> max over L -> ff, all in one kernel.
    return pallas_ln_maxpool_linear(dec_out,
                                    params["decoder"]["ln"]["g"],
                                    params["decoder"]["ln"]["b"],
                                    params["ff_w"], params["ff_b"])


# ----------------------------------------------------------------------------
# Deterministic parameter initialization (shapes dictated by TEnc.__init__)
# ----------------------------------------------------------------------------


def _uniform(key, shape, fan_in):
    bound = 1.0 / math.sqrt(fan_in)
    return jax.random.uniform(key, shape, jnp.float32, -bound, bound)


def init_linear(key, din, dout, bias=True):
    kw, kb = jax.random.split(key)
    w = _uniform(kw, (din, dout), din)
    b = _uniform(kb, (dout,), din) if bias else None
    return w, b


def init_self_attn(key, d):
    ks = jax.random.split(key, 4)
    wq, bq = init_linear(ks[0], d, d)
    wk, bk = init_linear(ks[1], d, d)
    wv, bv = init_linear(ks[2], d, d)
    wo, bo = init_linear(ks[3], d, d)
    return {"wqkv": jnp.concatenate([wq, wk, wv], axis=1),
            "bqkv": jnp.concatenate([bq, bk, bv]),
            "wo": wo, "bo": bo}


def init_cross_attn(key, d):
    ks = jax.random.split(key, 4)
    wq, bq = init_linear(ks[0], d, d)
    wk, bk = init_linear(ks[1], d, d)
    wv, bv = init_linear(ks[2], d, d)
    wo, bo = init_linear(ks[3], d, d)
    return {"wq": wq, "bq": bq,
            "wkv": jnp.concatenate([wk, wv], axis=1),
            "bkv": jnp.concatenate([bk, bv]),
            "wo": wo, "bo": bo}


def init_ffn(key, d, dff):
    k1, k2 = jax.random.split(key)
    w1, b1 = init_linear(k1, d, dff)
    w2, b2 = init_linear(k2, dff, d)
    return {"w1": w1, "b1": b1, "w2": w2, "b2": b2}


def init_ln(d):
    return {"g": jnp.ones((d,), jnp.float32), "b": jnp.zeros((d,), jnp.float32)}


def init_encoder(key, n_layers, d, dff):
    layers = []
    for _ in range(n_layers):
        k1, k2, key = jax.random.split(key, 3)
        layers.append({"self_attn": init_self_attn(k1, d), "ff": init_ffn(k2, d, dff),
                       "ln1": init_ln(d), "ln2": init_ln(d)})
    return {"layers": layers, "ln": init_ln(d)}


def init_decoder(key, n_layers, d, dff):
    layers = []
    for _ in range(n_layers):
        k1, k2, k3, key = jax.random.split(key, 4)
        layers.append({"self_attn": init_self_attn(k1, d),
                       "src_attn": init_cross_attn(k2, d),
                       "ff": init_ffn(k3, d, dff),
                       "ln1": init_ln(d), "ln2": init_ln(d), "ln3": init_ln(d)})
    return {"layers": layers, "ln": init_ln(d)}


def init_tenc(key, embdim, protdim, n_targets, n_layers, n_prot_layers):
    k1, k2, k3, k4 = jax.random.split(key, 4)
    prot_w, _ = init_linear(k1, protdim, embdim, bias=False)
    enc = init_encoder(k2, n_prot_layers, embdim, embdim * 4)
    dec = init_decoder(k3, n_layers, embdim, embdim * 4)
    ff_w, ff_b = init_linear(k4, embdim, n_targets)
    return {"prot_w": prot_w, "prot_ln": init_ln(embdim),
            "encoder": enc, "decoder": dec, "ff_w": ff_w, "ff_b": ff_b}


# ----------------------------------------------------------------------------
# Demo
# ----------------------------------------------------------------------------

if __name__ == "__main__":
    B, Lx, Lp = 2, 8, 8
    embdim, protdim, n_targets = 32, 48, 5
    n_layers, n_prot_layers, heads = 1, 1, 8

    key = jax.random.PRNGKey(0)
    kp, kx, kprot = jax.random.split(key, 3)

    params = init_tenc(kp, embdim, protdim, n_targets, n_layers, n_prot_layers)

    x = jax.random.normal(kx, (B, Lx, embdim), jnp.float32)
    x = x.at[:, -1, 0].set(0.0)  # mark one position "padded" so the mask path is exercised
    x_prot = jax.random.normal(kprot, (B, Lp, protdim), jnp.float32)

    fwd = jax.jit(tenc_forward, static_argnums=3)
    out = jax.block_until_ready(fwd(params, x, x_prot, heads))

    assert out.shape == (B, n_targets), out.shape
    assert bool(jnp.all(jnp.isfinite(out)))
    print("KERNEL_OK")
</pallas_src>

<mosaic_0001>
module attributes {stable_mosaic.version = 11 : i64} {
  func.func @_ln_matmul_kernel(%arg0: i32, %arg1: i32, %arg2: memref<16x32xf32, #tpu.memory_space<vmem>>, %arg3: memref<1x32xf32, #tpu.memory_space<vmem>>, %arg4: memref<1x32xf32, #tpu.memory_space<vmem>>, %arg5: memref<32x96xf32, #tpu.memory_space<vmem>>, %arg6: memref<1x96xf32, #tpu.memory_space<vmem>>, %arg7: memref<16x96xf32, #tpu.memory_space<vmem>>) attributes {dimension_semantics = [#tpu.dimension_semantics<parallel>, #tpu.dimension_semantics<parallel>], iteration_bounds = array<i64: 1, 1>, scalar_prefetch = 0 : i64, scratch_operands = 0 : i64, tpu.core_type = #tpu.core_type<tc>, window_params = [{transform_indices = @transform_0, window_bounds = array<i64: 16, 32>}, {pipeline_mode = #tpu.pipeline_mode<synchronous>, transform_indices = @transform_1, window_bounds = array<i64: 1, 32>}, {pipeline_mode = #tpu.pipeline_mode<synchronous>, transform_indices = @transform_2, window_bounds = array<i64: 1, 32>}, {transform_indices = @transform_3, window_bounds = array<i64: 32, 96>}, {transform_indices = @transform_4, window_bounds = array<i64: 1, 96>}, {transform_indices = @transform_5, window_bounds = array<i64: 16, 96>}]} {
    %c0 = arith.constant 0 : index
    %c0_0 = arith.constant 0 : index
    %0 = vector.load %arg2[%c0, %c0_0] : memref<16x32xf32, #tpu.memory_space<vmem>>, vector<16x32xf32>
    %cst = arith.constant dense<0.000000e+00> : vector<16xf32>
    %1 = vector.multi_reduction <add>, %0, %cst [1] : vector<16x32xf32> to vector<16xf32>
    %2 = vector.shape_cast %1 : vector<16xf32> to vector<16x1xf32>
    %cst_1 = arith.constant 3.200000e+01 : f32
    %3 = vector.broadcast %cst_1 : f32 to vector<16x1xf32>
    %4 = arith.divf %2, %3 : vector<16x1xf32>
    %5 = vector.broadcast %4 : vector<16x1xf32> to vector<16x32xf32>
    %6 = arith.subf %0, %5 : vector<16x32xf32>
    %7 = arith.mulf %6, %6 : vector<16x32xf32>
    %cst_2 = arith.constant dense<0.000000e+00> : vector<16xf32>
    %8 = vector.multi_reduction <add>, %7, %cst_2 [1] : vector<16x32xf32> to vector<16xf32>
    %9 = vector.shape_cast %8 : vector<16xf32> to vector<16x1xf32>
    %cst_3 = arith.constant 0.0322580636 : f32
    %10 = vector.broadcast %cst_3 : f32 to vector<16x1xf32>
    %11 = arith.mulf %9, %10 : vector<16x1xf32>
    %12 = math.sqrt %11 : vector<16x1xf32>
    %cst_4 = arith.constant 9.99999997E-7 : f32
    %13 = vector.broadcast %cst_4 : f32 to vector<16x1xf32>
    %14 = arith.addf %12, %13 : vector<16x1xf32>
    %15 = tpu.reciprocal %14 {approx = true} : vector<16x1xf32> -> vector<16x1xf32>
    %c0_5 = arith.constant 0 : index
    %c0_6 = arith.constant 0 : index
    %16 = vector.load %arg3[%c0_5, %c0_6] : memref<1x32xf32, #tpu.memory_space<vmem>>, vector<1x32xf32>
    %17 = vector.broadcast %4 : vector<16x1xf32> to vector<16x32xf32>
    %18 = arith.subf %0, %17 : vector<16x32xf32>
    %19 = vector.broadcast %16 : vector<1x32xf32> to vector<16x32xf32>
    %20 = arith.mulf %19, %18 : vector<16x32xf32>
    %21 = vector.broadcast %15 : vector<16x1xf32> to vector<16x32xf32>
    %22 = arith.mulf %20, %21 : vector<16x32xf32>
    %c0_7 = arith.constant 0 : index
    %c0_8 = arith.constant 0 : index
    %23 = vector.load %arg4[%c0_7, %c0_8] : memref<1x32xf32, #tpu.memory_space<vmem>>, vector<1x32xf32>
    %24 = vector.broadcast %23 : vector<1x32xf32> to vector<16x32xf32>
    %25 = arith.addf %22, %24 : vector<16x32xf32>
    %c0_9 = arith.constant 0 : index
    %c0_10 = arith.constant 0 : index
    %26 = vector.load %arg5[%c0_9, %c0_10] : memref<32x96xf32, #tpu.memory_space<vmem>>, vector<32x96xf32>
    %cst_11 = arith.constant dense<0.000000e+00> : vector<16x96xf32>
    %27 = tpu.matmul %25, %26, %cst_11 {dimension_numbers = #tpu.dot_dimension_numbers<[1], [0], [0], [1], [0, 0, 1, 1], [], []>} : vector<16x32xf32>, vector<32x96xf32>, vector<16x96xf32> -> vector<16x96xf32>
    %c0_12 = arith.constant 0 : index
    %c0_13 = arith.constant 0 : index
    %28 = vector.load %arg6[%c0_12, %c0_13] : memref<1x96xf32, #tpu.memory_space<vmem>>, vector<1x96xf32>
    %29 = vector.broadcast %28 : vector<1x96xf32> to vector<16x96xf32>
    %30 = arith.addf %27, %29 : vector<16x96xf32>
    %c0_14 = arith.constant 0 : index
    %c0_15 = arith.constant 0 : index
    %31 = vector.load %arg7[%c0_14, %c0_15] : memref<16x96xf32, #tpu.memory_space<vmem>>, vector<16x96xf32>
    tpu.vector_store %arg7[%c0_14, %c0_15], %30 {strides = array<i32>} : memref<16x96xf32, #tpu.memory_space<vmem>>, vector<16x96xf32>,
    return
  }
  func.func @transform_0(%arg0: i32, %arg1: i32) -> (i32, i32) {
    %c0_i32 = arith.constant 0 : i32
    %c0_i32_0 = arith.constant 0 : i32
    return %arg0, %c0_i32 : i32, i32
  }
  func.func @transform_1(%arg0: i32, %arg1: i32) -> (i32, i32) {
    %c0_i32 = arith.constant 0 : i32
    %c0_i32_0 = arith.constant 0 : i32
    %c0_i32_1 = arith.constant 0 : i32
    return %c0_i32, %c0_i32_0 : i32, i32
  }
  func.func @transform_2(%arg0: i32, %arg1: i32) -> (i32, i32) {
    %c0_i32 = arith.constant 0 : i32
    %c0_i32_0 = arith.constant 0 : i32
    %c0_i32_1 = arith.constant 0 : i32
    return %c0_i32, %c0_i32_0 : i32, i32
  }
  func.func @transform_3(%arg0: i32, %arg1: i32) -> (i32, i32) {
    %c0_i32 = arith.constant 0 : i32
    %c0_i32_0 = arith.constant 0 : i32
    return %c0_i32, %arg1 : i32, i32
  }
  func.func @transform_4(%arg0: i32, %arg1: i32) -> (i32, i32) {
    %c0_i32 = arith.constant 0 : i32
    %c0_i32_0 = arith.constant 0 : i32
    return %c0_i32, %arg1 : i32, i32
  }
  func.func @transform_5(%arg0: i32, %arg1: i32) -> (i32, i32) {
    %c0_i32 = arith.constant 0 : i32
    return %arg0, %arg1 : i32, i32
  }
}

module attributes {stable_mosaic.version = 11 : i64} {
  func.func @_matmul_ln_kernel(%arg0: i32, %arg1: i32, %arg2: memref<16x48xf32, #tpu.memory_space<vmem>>, %arg3: memref<48x32xf32, #tpu.memory_space<vmem>>, %arg4: memref<1x32xf32, #tpu.memory_space<vmem>>, %arg5: memref<1x32xf32, #tpu.memory_space<vmem>>, %arg6: memref<16x32xf32, #tpu.memory_space<vmem>>, %arg7: memref<16x32xf32, #tpu.memory_space<vmem>>) attributes {dimension_semantics = [#tpu.dimension_semantics<parallel>, #tpu.dimension_semantics<arbitrary>], iteration_bounds = array<i64: 1, 1>, scalar_prefetch = 0 : i64, scratch_operands = 1 : i64, tpu.core_type = #tpu.core_type<tc>, window_params = [{transform_indices = @transform_0, window_bounds = array<i64: 16, 48>}, {transform_indices = @transform_1, window_bounds = array<i64: 48, 32>}, {pipeline_mode = #tpu.pipeline_mode<synchronous>, transform_indices = @transform_2, window_bounds = array<i64: 1, 32>}, {pipeline_mode = #tpu.pipeline_mode<synchronous>, transform_indices = @transform_3, window_bounds = array<i64: 1, 32>}, {transform_indices = @transform_4, window_bounds = array<i64: 16, 32>}]} {
    %c0_i32 = arith.constant 0 : i32
    %0 = arith.cmpi eq, %arg1, %c0_i32 : i32
    %1 = arith.extui %0 : i1 to i32
    %c0_i32_0 = arith.constant 0 : i32
    %2 = arith.cmpi ne, %1, %c0_i32_0 : i32
    scf.if %2 {
      %cst_10 = arith.constant 0.000000e+00 : f32
      %12 = vector.broadcast %cst_10 : f32 to vector<16x32xf32>
      %c0_11 = arith.constant 0 : index
      %c0_12 = arith.constant 0 : index
      %13 = vector.load %arg7[%c0_11, %c0_12] : memref<16x32xf32, #tpu.memory_space<vmem>>, vector<16x32xf32>
      tpu.vector_store %arg7[%c0_11, %c0_12], %12 {strides = array<i32>} : memref<16x32xf32, #tpu.memory_space<vmem>>, vector<16x32xf32>,
    } else {
    }
    %c0 = arith.constant 0 : index
    %c0_1 = arith.constant 0 : index
    %3 = vector.load %arg7[%c0, %c0_1] : memref<16x32xf32, #tpu.memory_space<vmem>>, vector<16x32xf32>
    %c0_2 = arith.constant 0 : index
    %c0_3 = arith.constant 0 : index
    %4 = vector.load %arg2[%c0_2, %c0_3] : memref<16x48xf32, #tpu.memory_space<vmem>>, vector<16x48xf32>
    %c0_4 = arith.constant 0 : index
    %c0_5 = arith.constant 0 : index
    %5 = vector.load %arg3[%c0_4, %c0_5] : memref<48x32xf32, #tpu.memory_space<vmem>>, vector<48x32xf32>
    %cst = arith.constant dense<0.000000e+00> : vector<16x32xf32>
    %6 = tpu.matmul %4, %5, %cst {dimension_numbers = #tpu.dot_dimension_numbers<[1], [0], [0], [1], [0, 0, 1, 1], [], []>} : vector<16x48xf32>, vector<48x32xf32>, vector<16x32xf32> -> vector<16x32xf32>
    %7 = arith.addf %3, %6 : vector<16x32xf32>
    %c0_6 = arith.constant 0 : index
    %c0_7 = arith.constant 0 : index
    %8 = vector.load %arg7[%c0_6, %c0_7] : memref<16x32xf32, #tpu.memory_space<vmem>>, vector<16x32xf32>
    tpu.vector_store %arg7[%c0_6, %c0_7], %7 {strides = array<i32>} : memref<16x32xf32, #tpu.memory_space<vmem>>, vector<16x32xf32>,
    %c0_i32_8 = arith.constant 0 : i32
    %9 = arith.cmpi eq, %arg1, %c0_i32_8 : i32
    %10 = arith.extui %9 : i1 to i32
    %c0_i32_9 = arith.constant 0 : i32
    %11 = arith.cmpi ne, %10, %c0_i32_9 : i32
    scf.if %11 {
      %c0_10 = arith.constant 0 : index
      %c0_11 = arith.constant 0 : index
      %12 = vector.load %arg7[%c0_10, %c0_11] : memref<16x32xf32, #tpu.memory_space<vmem>>, vector<16x32xf32>
      %cst_12 = arith.constant dense<0.000000e+00> : vector<16xf32>
      %13 = vector.multi_reduction <add>, %12, %cst_12 [1] : vector<16x32xf32> to vector<16xf32>
      %14 = vector.shape_cast %13 : vector<16xf32> to vector<16x1xf32>
      %cst_13 = arith.constant 3.200000e+01 : f32
      %15 = vector.broadcast %cst_13 : f32 to vector<16x1xf32>
      %16 = arith.divf %14, %15 : vector<16x1xf32>
      %17 = vector.broadcast %16 : vector<16x1xf32> to vector<16x32xf32>
      %18 = arith.subf %12, %17 : vector<16x32xf32>
      %19 = arith.mulf %18, %18 : vector<16x32xf32>
      %cst_14 = arith.constant dense<0.000000e+00> : vector<16xf32>
      %20 = vector.multi_reduction <add>, %19, %cst_14 [1] : vector<16x32xf32> to vector<16xf32>
      %21 = vector.shape_cast %20 : vector<16xf32> to vector<16x1xf32>
      %cst_15 = arith.constant 0.0322580636 : f32
      %22 = vector.broadcast %cst_15 : f32 to vector<16x1xf32>
      %23 = arith.mulf %21, %22 : vector<16x1xf32>
      %24 = math.sqrt %23 : vector<16x1xf32>
      %cst_16 = arith.constant 9.99999997E-7 : f32
      %25 = vector.broadcast %cst_16 : f32 to vector<16x1xf32>
      %26 = arith.addf %24, %25 : vector<16x1xf32>
      %27 = tpu.reciprocal %26 {approx = true} : vector<16x1xf32> -> vector<16x1xf32>
      %c0_17 = arith.constant 0 : index
      %c0_18 = arith.constant 0 : index
      %28 = vector.load %arg4[%c0_17, %c0_18] : memref<1x32xf32, #tpu.memory_space<vmem>>, vector<1x32xf32>
      %29 = vector.broadcast %16 : vector<16x1xf32> to vector<16x32xf32>
      %30 = arith.subf %12, %29 : vector<16x32xf32>
      %31 = vector.broadcast %28 : vector<1x32xf32> to vector<16x32xf32>
      %32 = arith.mulf %31, %30 : vector<16x32xf32>
      %33 = vector.broadcast %27 : vector<16x1xf32> to vector<16x32xf32>
      %34 = arith.mulf %32, %33 : vector<16x32xf32>
      %c0_19 = arith.constant 0 : index
      %c0_20 = arith.constant 0 : index
      %35 = vector.load %arg5[%c0_19, %c0_20] : memref<1x32xf32, #tpu.memory_space<vmem>>, vector<1x32xf32>
      %36 = vector.broadcast %35 : vector<1x32xf32> to vector<16x32xf32>
      %37 = arith.addf %34, %36 : vector<16x32xf32>
      %c0_21 = arith.constant 0 : index
      %c0_22 = arith.constant 0 : index
      %38 = vector.load %arg6[%c0_21, %c0_22] : memref<16x32xf32, #tpu.memory_space<vmem>>, vector<16x32xf32>
      tpu.vector_store %arg6[%c0_21, %c0_22], %37 {strides = array<i32>} : memref<16x32xf32, #tpu.memory_space<vmem>>, vector<16x32xf32>,
    } else {
    }
    return
  }
  func.func @transform_0(%arg0: i32, %arg1: i32) -> (i32, i32) {
    %c0_i32 = arith.constant 0 : i32
    return %arg0, %arg1 : i32, i32
  }
  func.func @transform_1(%arg0: i32, %arg1: i32) -> (i32, i32) {
    %c0_i32 = arith.constant 0 : i32
    %c0_i32_0 = arith.constant 0 : i32
    return %arg1, %c0_i32 : i32, i32
  }
  func.func @transform_2(%arg0: i32, %arg1: i32) -> (i32, i32) {
    %c0_i32 = arith.constant 0 : i32
    %c0_i32_0 = arith.constant 0 : i32
    %c0_i32_1 = arith.constant 0 : i32
    return %c0_i32, %c0_i32_0 : i32, i32
  }
  func.func @transform_3(%arg0: i32, %arg1: i32) -> (i32, i32) {
    %c0_i32 = arith.constant 0 : i32
    %c0_i32_0 = arith.constant 0 : i32
    %c0_i32_1 = arith.constant 0 : i32
    return %c0_i32, %c0_i32_0 : i32, i32
  }
  func.func @transform_4(%arg0: i32, %arg1: i32) -> (i32, i32) {
    %c0_i32 = arith.constant 0 : i32
    %c0_i32_0 = arith.constant 0 : i32
    return %arg0, %c0_i32 : i32, i32
  }
}

module attributes {stable_mosaic.version = 11 : i64} {
  func.func @_ln_matmul_kernel(%arg0: i32, %arg1: i32, %arg2: memref<16x32xf32, #tpu.memory_space<vmem>>, %arg3: memref<1x32xf32, #tpu.memory_space<vmem>>, %arg4: memref<1x32xf32, #tpu.memory_space<vmem>>, %arg5: memref<32x128xf32, #tpu.memory_space<vmem>>, %arg6: memref<1x128xf32, #tpu.memory_space<vmem>>, %arg7: memref<16x128xf32, #tpu.memory_space<vmem>>) attributes {dimension_semantics = [#tpu.dimension_semantics<parallel>, #tpu.dimension_semantics<parallel>], iteration_bounds = array<i64: 1, 1>, scalar_prefetch = 0 : i64, scratch_operands = 0 : i64, tpu.core_type = #tpu.core_type<tc>, window_params = [{transform_indices = @transform_0, window_bounds = array<i64: 16, 32>}, {pipeline_mode = #tpu.pipeline_mode<synchronous>, transform_indices = @transform_1, window_bounds = array<i64: 1, 32>}, {pipeline_mode = #tpu.pipeline_mode<synchronous>, transform_indices = @transform_2, window_bounds = array<i64: 1, 32>}, {transform_indices = @transform_3, window_bounds = array<i64: 32, 128>}, {transform_indices = @transform_4, window_bounds = array<i64: 1, 128>}, {transform_indices = @transform_5, window_bounds = array<i64: 16, 128>}]} {
    %c0 = arith.constant 0 : index
    %c0_0 = arith.constant 0 : index
    %0 = vector.load %arg2[%c0, %c0_0] : memref<16x32xf32, #tpu.memory_space<vmem>>, vector<16x32xf32>
    %cst = arith.constant dense<0.000000e+00> : vector<16xf32>
    %1 = vector.multi_reduction <add>, %0, %cst [1] : vector<16x32xf32> to vector<16xf32>
    %2 = vector.shape_cast %1 : vector<16xf32> to vector<16x1xf32>
    %cst_1 = arith.constant 3.200000e+01 : f32
    %3 = vector.broadcast %cst_1 : f32 to vector<16x1xf32>
    %4 = arith.divf %2, %3 : vector<16x1xf32>
    %5 = vector.broadcast %4 : vector<16x1xf32> to vector<16x32xf32>
    %6 = arith.subf %0, %5 : vector<16x32xf32>
    %7 = arith.mulf %6, %6 : vector<16x32xf32>
    %cst_2 = arith.constant dense<0.000000e+00> : vector<16xf32>
    %8 = vector.multi_reduction <add>, %7, %cst_2 [1] : vector<16x32xf32> to vector<16xf32>
    %9 = vector.shape_cast %8 : vector<16xf32> to vector<16x1xf32>
    %cst_3 = arith.constant 0.0322580636 : f32
    %10 = vector.broadcast %cst_3 : f32 to vector<16x1xf32>
    %11 = arith.mulf %9, %10 : vector<16x1xf32>
    %12 = math.sqrt %11 : vector<16x1xf32>
    %cst_4 = arith.constant 9.99999997E-7 : f32
    %13 = vector.broadcast %cst_4 : f32 to vector<16x1xf32>
    %14 = arith.addf %12, %13 : vector<16x1xf32>
    %15 = tpu.reciprocal %14 {approx = true} : vector<16x1xf32> -> vector<16x1xf32>
    %c0_5 = arith.constant 0 : index
    %c0_6 = arith.constant 0 : index
    %16 = vector.load %arg3[%c0_5, %c0_6] : memref<1x32xf32, #tpu.memory_space<vmem>>, vector<1x32xf32>
    %17 = vector.broadcast %4 : vector<16x1xf32> to vector<16x32xf32>
    %18 = arith.subf %0, %17 : vector<16x32xf32>
    %19 = vector.broadcast %16 : vector<1x32xf32> to vector<16x32xf32>
    %20 = arith.mulf %19, %18 : vector<16x32xf32>
    %21 = vector.broadcast %15 : vector<16x1xf32> to vector<16x32xf32>
    %22 = arith.mulf %20, %21 : vector<16x32xf32>
    %c0_7 = arith.constant 0 : index
    %c0_8 = arith.constant 0 : index
    %23 = vector.load %arg4[%c0_7, %c0_8] : memref<1x32xf32, #tpu.memory_space<vmem>>, vector<1x32xf32>
    %24 = vector.broadcast %23 : vector<1x32xf32> to vector<16x32xf32>
    %25 = arith.addf %22, %24 : vector<16x32xf32>
    %c0_9 = arith.constant 0 : index
    %c0_10 = arith.constant 0 : index
    %26 = vector.load %arg5[%c0_9, %c0_10] : memref<32x128xf32, #tpu.memory_space<vmem>>, vector<32x128xf32>
    %cst_11 = arith.constant dense<0.000000e+00> : vector<16x128xf32>
    %27 = tpu.matmul %25, %26, %cst_11 {dimension_numbers = #tpu.dot_dimension_numbers<[1], [0], [0], [1], [0, 0, 1, 1], [], []>} : vector<16x32xf32>, vector<32x128xf32>, vector<16x128xf32> -> vector<16x128xf32>
    %c0_12 = arith.constant 0 : index
    %c0_13 = arith.constant 0 : index
    %28 = vector.load %arg6[%c0_12, %c0_13] : memref<1x128xf32, #tpu.memory_space<vmem>>, vector<1x128xf32>
    %29 = vector.broadcast %28 : vector<1x128xf32> to vector<16x128xf32>
    %30 = arith.addf %27, %29 : vector<16x128xf32>
    %cst_14 = arith.constant 0.000000e+00 : f32
    %31 = vector.broadcast %cst_14 : f32 to vector<16x128xf32>
    %32 = arith.maximumf %30, %31 : vector<16x128xf32>
    %c0_15 = arith.constant 0 : index
    %c0_16 = arith.constant 0 : index
    %33 = vector.load %arg7[%c0_15, %c0_16] : memref<16x128xf32, #tpu.memory_space<vmem>>, vector<16x128xf32>
    tpu.vector_store %arg7[%c0_15, %c0_16], %32 {strides = array<i32>} : memref<16x128xf32, #tpu.memory_space<vmem>>, vector<16x128xf32>,
    return
  }
  func.func @transform_0(%arg0: i32, %arg1: i32) -> (i32, i32) {
    %c0_i32 = arith.constant 0 : i32
    %c0_i32_0 = arith.constant 0 : i32
    return %arg0, %c0_i32 : i32, i32
  }
  func.func @transform_1(%arg0: i32, %arg1: i32) -> (i32, i32) {
    %c0_i32 = arith.constant 0 : i32
    %c0_i32_0 = arith.constant 0 : i32
    %c0_i32_1 = arith.constant 0 : i32
    return %c0_i32, %c0_i32_0 : i32, i32
  }
  func.func @transform_2(%arg0: i32, %arg1: i32) -> (i32, i32) {
    %c0_i32 = arith.constant 0 : i32
    %c0_i32_0 = arith.constant 0 : i32
    %c0_i32_1 = arith.constant 0 : i32
    return %c0_i32, %c0_i32_0 : i32, i32
  }
  func.func @transform_3(%arg0: i32, %arg1: i32) -> (i32, i32) {
    %c0_i32 = arith.constant 0 : i32
    %c0_i32_0 = arith.constant 0 : i32
    return %c0_i32, %arg1 : i32, i32
  }
  func.func @transform_4(%arg0: i32, %arg1: i32) -> (i32, i32) {
    %c0_i32 = arith.constant 0 : i32
    %c0_i32_0 = arith.constant 0 : i32
    return %c0_i32, %arg1 : i32, i32
  }
  func.func @transform_5(%arg0: i32, %arg1: i32) -> (i32, i32) {
    %c0_i32 = arith.constant 0 : i32
    return %arg0, %arg1 : i32, i32
  }
}

module attributes {stable_mosaic.version = 11 : i64} {
  func.func @_self_attn_kernel(%arg0: i32, %arg1: memref<1x8x96xf32, #tpu.memory_space<vmem>>, %arg2: memref<1x1x8xf32, #tpu.memory_space<vmem>>, %arg3: memref<32x32xf32, #tpu.memory_space<vmem>>, %arg4: memref<1x32xf32, #tpu.memory_space<vmem>>, %arg5: memref<1x8x32xf32, #tpu.memory_space<vmem>>, %arg6: memref<1x8x32xf32, #tpu.memory_space<vmem>>) attributes {dimension_semantics = [#tpu.dimension_semantics<parallel>], iteration_bounds = array<i64: 2>, scalar_prefetch = 0 : i64, scratch_operands = 0 : i64, tpu.core_type = #tpu.core_type<tc>, window_params = [{transform_indices = @transform_0, window_bounds = array<i64: 1, 8, 96>}, {transform_indices = @transform_1, window_bounds = array<i64: 1, 1, 8>}, {pipeline_mode = #tpu.pipeline_mode<synchronous>, transform_indices = @transform_2, window_bounds = array<i64: 32, 32>}, {pipeline_mode = #tpu.pipeline_mode<synchronous>, transform_indices = @transform_3, window_bounds = array<i64: 1, 32>}, {transform_indices = @transform_4, window_bounds = array<i64: 1, 8, 32>}, {transform_indices = @transform_5, window_bounds = array<i64: 1, 8, 32>}]} {
    %c0 = arith.constant 0 : index
    %c0_0 = arith.constant 0 : index
    %c0_1 = arith.constant 0 : index
    %0 = vector.load %arg1[%c0, %c0_0, %c0_1] : memref<1x8x96xf32, #tpu.memory_space<vmem>>, vector<1x8x96xf32>
    %1 = vector.shape_cast %0 : vector<1x8x96xf32> to vector<8x96xf32>
    %2 = vector.extract_strided_slice %1 {offsets = [0, 0], sizes = [8, 32], strides = [1, 1]} : vector<8x96xf32> to vector<8x32xf32>
    %3 = vector.extract_strided_slice %1 {offsets = [0, 32], sizes = [8, 32], strides = [1, 1]} : vector<8x96xf32> to vector<8x32xf32>
    %4 = vector.extract_strided_slice %1 {offsets = [0, 64], sizes = [8, 32], strides = [1, 1]} : vector<8x96xf32> to vector<8x32xf32>
    %c0_2 = arith.constant 0 : index
    %c0_3 = arith.constant 0 : index
    %c0_4 = arith.constant 0 : index
    %5 = vector.load %arg2[%c0_2, %c0_3, %c0_4] : memref<1x1x8xf32, #tpu.memory_space<vmem>>, vector<1x1x8xf32>
    %6 = vector.shape_cast %5 : vector<1x1x8xf32> to vector<1x8xf32>
    %cst = arith.constant 5.000000e-01 : f32
    %7 = vector.broadcast %cst : f32 to vector<8x32xf32>
    %8 = arith.mulf %2, %7 : vector<8x32xf32>
    %9 = vector.extract_strided_slice %8 {offsets = [0, 0], sizes = [8, 4], strides = [1, 1]} : vector<8x32xf32> to vector<8x4xf32>
    %10 = vector.extract_strided_slice %3 {offsets = [0, 0], sizes = [8, 4], strides = [1, 1]} : vector<8x32xf32> to vector<8x4xf32>
    %11 = vector.extract_strided_slice %4 {offsets = [0, 0], sizes = [8, 4], strides = [1, 1]} : vector<8x32xf32> to vector<8x4xf32>
    %cst_5 = arith.constant dense<0.000000e+00> : vector<8x8xf32>
    %12 = tpu.matmul %9, %10, %cst_5 {dimension_numbers = #tpu.dot_dimension_numbers<[1], [1], [0], [0], [0, 0, 1, 0], [], []>} : vector<8x4xf32>, vector<8x4xf32>, vector<8x8xf32> -> vector<8x8xf32>
    %cst_6 = arith.constant 5.000000e-01 : f32
    %13 = vector.broadcast %cst_6 : f32 to vector<1x8xf32>
    %14 = arith.cmpf ogt, %6, %13 : vector<1x8xf32>
    %cst_7 = arith.constant -1.000000e+09 : f32
    %15 = vector.shape_cast %14 : vector<1x8xi1> to vector<1x8xi1>
    %16 = vector.broadcast %15 : vector<1x8xi1> to vector<8x8xi1>
    %17 = vector.broadcast %cst_7 : f32 to vector<8x8xf32>
    %18 = arith.select %16, %17, %12 : vector<8x8xi1>, vector<8x8xf32>
    %cst_8 = arith.constant dense<0xFF800000> : vector<8xf32>
    %19 = vector.multi_reduction <maximumf>, %18, %cst_8 [1] : vector<8x8xf32> to vector<8xf32>
    %20 = vector.shape_cast %19 : vector<8xf32> to vector<8x1xf32>
    %21 = vector.broadcast %20 : vector<8x1xf32> to vector<8x8xf32>
    %22 = arith.subf %18, %21 : vector<8x8xf32>
    %23 = math.exp %22 : vector<8x8xf32>
    %cst_9 = arith.constant dense<0.000000e+00> : vector<8xf32>
    %24 = vector.multi_reduction <add>, %23, %cst_9 [1] : vector<8x8xf32> to vector<8xf32>
    %25 = vector.shape_cast %24 : vector<8xf32> to vector<8x1xf32>
    %26 = tpu.reciprocal %25 {approx = true} : vector<8x1xf32> -> vector<8x1xf32>
    %27 = vector.broadcast %26 : vector<8x1xf32> to vector<8x8xf32>
    %28 = arith.mulf %23, %27 : vector<8x8xf32>
    %cst_10 = arith.constant dense<0.000000e+00> : vector<8x4xf32>
    %29 = tpu.matmul %28, %11, %cst_10 {dimension_numbers = #tpu.dot_dimension_numbers<[1], [0], [0], [1], [0, 0, 1, 1], [], []>} : vector<8x8xf32>, vector<8x4xf32>, vector<8x4xf32> -> vector<8x4xf32>
    %30 = vector.extract_strided_slice %8 {offsets = [0, 4], sizes = [8, 4], strides = [1, 1]} : vector<8x32xf32> to vector<8x4xf32>
    %31 = vector.extract_strided_slice %3 {offsets = [0, 4], sizes = [8, 4], strides = [1, 1]} : vector<8x32xf32> to vector<8x4xf32>
    %32 = vector.extract_strided_slice %4 {offsets = [0, 4], sizes = [8, 4], strides = [1, 1]} : vector<8x32xf32> to vector<8x4xf32>
    %cst_11 = arith.constant dense<0.000000e+00> : vector<8x8xf32>
    %33 = tpu.matmul %30, %31, %cst_11 {dimension_numbers = #tpu.dot_dimension_numbers<[1], [1], [0], [0], [0, 0, 1, 0], [], []>} : vector<8x4xf32>, vector<8x4xf32>, vector<8x8xf32> -> vector<8x8xf32>
    %cst_12 = arith.constant 5.000000e-01 : f32
    %34 = vector.broadcast %cst_12 : f32 to vector<1x8xf32>
    %35 = arith.cmpf ogt, %6, %34 : vector<1x8xf32>
    %cst_13 = arith.constant -1.000000e+09 : f32
    %36 = vector.shape_cast %35 : vector<1x8xi1> to vector<1x8xi1>
    %37 = vector.broadcast %36 : vector<1x8xi1> to vector<8x8xi1>
    %38 = vector.broadcast %cst_13 : f32 to vector<8x8xf32>
    %39 = arith.select %37, %38, %33 : vector<8x8xi1>, vector<8x8xf32>
    %cst_14 = arith.constant dense<0xFF800000> : vector<8xf32>
    %40 = vector.multi_reduction <maximumf>, %39, %cst_14 [1] : vector<8x8xf32> to vector<8xf32>
    %41 = vector.shape_cast %40 : vector<8xf32> to vector<8x1xf32>
    %42 = vector.broadcast %41 : vector<8x1xf32> to vector<8x8xf32>
    %43 = arith.subf %39, %42 : vector<8x8xf32>
    %44 = math.exp %43 : vector<8x8xf32>
    %cst_15 = arith.constant dense<0.000000e+00> : vector<8xf32>
    %45 = vector.multi_reduction <add>, %44, %cst_15 [1] : vector<8x8xf32> to vector<8xf32>
    %46 = vector.shape_cast %45 : vector<8xf32> to vector<8x1xf32>
    %47 = tpu.reciprocal %46 {approx = true} : vector<8x1xf32> -> vector<8x1xf32>
    %48 = vector.broadcast %47 : vector<8x1xf32> to vector<8x8xf32>
    %49 = arith.mulf %44, %48 : vector<8x8xf32>
    %cst_16 = arith.constant dense<0.000000e+00> : vector<8x4xf32>
    %50 = tpu.matmul %49, %32, %cst_16 {dimension_numbers = #tpu.dot_dimension_numbers<[1], [0], [0], [1], [0, 0, 1, 1], [], []>} : vector<8x8xf32>, vector<8x4xf32>, vector<8x4xf32> -> vector<8x4xf32>
    %51 = vector.extract_strided_slice %8 {offsets = [0, 8], sizes = [8, 4], strides = [1, 1]} : vector<8x32xf32> to vector<8x4xf32>
    %52 = vector.extract_strided_slice %3 {offsets = [0, 8], sizes = [8, 4], strides = [1, 1]} : vector<8x32xf32> to vector<8x4xf32>
    %53 = vector.extract_strided_slice %4 {offsets = [0, 8], sizes = [8, 4], strides = [1, 1]} : vector<8x32xf32> to vector<8x4xf32>
    %cst_17 = arith.constant dense<0.000000e+00> : vector<8x8xf32>
    %54 = tpu.matmul %51, %52, %cst_17 {dimension_numbers = #tpu.dot_dimension_numbers<[1], [1], [0], [0], [0, 0, 1, 0], [], []>} : vector<8x4xf32>, vector<8x4xf32>, vector<8x8xf32> -> vector<8x8xf32>
    %cst_18 = arith.constant 5.000000e-01 : f32
    %55 = vector.broadcast %cst_18 : f32 to vector<1x8xf32>
    %56 = arith.cmpf ogt, %6, %55 : vector<1x8xf32>
    %cst_19 = arith.constant -1.000000e+09 : f32
    %57 = vector.shape_cast %56 : vector<1x8xi1> to vector<1x8xi1>
    %58 = vector.broadcast %57 : vector<1x8xi1> to vector<8x8xi1>
    %59 = vector.broadcast %cst_19 : f32 to vector<8x8xf32>
    %60 = arith.select %58, %59, %54 : vector<8x8xi1>, vector<8x8xf32>
    %cst_20 = arith.constant dense<0xFF800000> : vector<8xf32>
    %61 = vector.multi_reduction <maximumf>, %60, %cst_20 [1] : vector<8x8xf32> to vector<8xf32>
    %62 = vector.shape_cast %61 : vector<8xf32> to vector<8x1xf32>
    %63 = vector.broadcast %62 : vector<8x1xf32> to vector<8x8xf32>
    %64 = arith.subf %60, %63 : vector<8x8xf32>
    %65 = math.exp %64 : vector<8x8xf32>
    %cst_21 = arith.constant dense<0.000000e+00> : vector<8xf32>
    %66 = vector.multi_reduction <add>, %65, %cst_21 [1] : vector<8x8xf32> to vector<8xf32>
    %67 = vector.shape_cast %66 : vector<8xf32> to vector<8x1xf32>
    %68 = tpu.reciprocal %67 {approx = true} : vector<8x1xf32> -> vector<8x1xf32>
    %69 = vector.broadcast %68 : vector<8x1xf32> to vector<8x8xf32>
    %70 = arith.mulf %65, %69 : vector<8x8xf32>
    %cst_22 = arith.constant dense<0.000000e+00> : vector<8x4xf32>
    %71 = tpu.matmul %70, %53, %cst_22 {dimension_numbers = #tpu.dot_dimension_numbers<[1], [0], [0], [1], [0, 0, 1, 1], [], []>} : vector<8x8xf32>, vector<8x4xf32>, vector<8x4xf32> -> vector<8x4xf32>
    %72 = vector.extract_strided_slice %8 {offsets = [0, 12], sizes = [8, 4], strides = [1, 1]} : vector<8x32xf32> to vector<8x4xf32>
    %73 = vector.extract_strided_slice %3 {offsets = [0, 12], sizes = [8, 4], strides = [1, 1]} : vector<8x32xf32> to vector<8x4xf32>
    %74 = vector.extract_strided_slice %4 {offsets = [0, 12], sizes = [8, 4], strides = [1, 1]} : vector<8x32xf32> to vector<8x4xf32>
    %cst_23 = arith.constant dense<0.000000e+00> : vector<8x8xf32>
    %75 = tpu.matmul %72, %73, %cst_23 {dimension_numbers = #tpu.dot_dimension_numbers<[1], [1], [0], [0], [0, 0, 1, 0], [], []>} : vector<8x4xf32>, vector<8x4xf32>, vector<8x8xf32> -> vector<8x8xf32>
    %cst_24 = arith.constant 5.000000e-01 : f32
    %76 = vector.broadcast %cst_24 : f32 to vector<1x8xf32>
    %77 = arith.cmpf ogt, %6, %76 : vector<1x8xf32>
    %cst_25 = arith.constant -1.000000e+09 : f32
    %78 = vector.shape_cast %77 : vector<1x8xi1> to vector<1x8xi1>
    %79 = vector.broadcast %78 : vector<1x8xi1> to vector<8x8xi1>
    %80 = vector.broadcast %cst_25 : f32 to vector<8x8xf32>
    %81 = arith.select %79, %80, %75 : vector<8x8xi1>, vector<8x8xf32>
    %cst_26 = arith.constant dense<0xFF800000> : vector<8xf32>
    %82 = vector.multi_reduction <maximumf>, %81, %cst_26 [1] : vector<8x8xf32> to vector<8xf32>
    %83 = vector.shape_cast %82 : vector<8xf32> to vector<8x1xf32>
    %84 = vector.broadcast %83 : vector<8x1xf32> to vector<8x8xf32>
    %85 = arith.subf %81, %84 : vector<8x8xf32>
    %86 = math.exp %85 : vector<8x8xf32>
    %cst_27 = arith.constant dense<0.000000e+00> : vector<8xf32>
    %87 = vector.multi_reduction <add>, %86, %cst_27 [1] : vector<8x8xf32> to vector<8xf32>
    %88 = vector.shape_cast %87 : vector<8xf32> to vector<8x1xf32>
    %89 = tpu.reciprocal %88 {approx = true} : vector<8x1xf32> -> vector<8x1xf32>
    %90 = vector.broadcast %89 : vector<8x1xf32> to vector<8x8xf32>
    %91 = arith.mulf %86, %90 : vector<8x8xf32>
    %cst_28 = arith.constant dense<0.000000e+00> : vector<8x4xf32>
    %92 = tpu.matmul %91, %74, %cst_28 {dimension_numbers = #tpu.dot_dimension_numbers<[1], [0], [0], [1], [0, 0, 1, 1], [], []>} : vector<8x8xf32>, vector<8x4xf32>, vector<8x4xf32> -> vector<8x4xf32>
    %93 = vector.extract_strided_slice %8 {offsets = [0, 16], sizes = [8, 4], strides = [1, 1]} : vector<8x32xf32> to vector<8x4xf32>
    %94 = vector.extract_strided_slice %3 {offsets = [0, 16], sizes = [8, 4], strides = [1, 1]} : vector<8x32xf32> to vector<8x4xf32>
    %95 = vector.extract_strided_slice %4 {offsets = [0, 16], sizes = [8, 4], strides = [1, 1]} : vector<8x32xf32> to vector<8x4xf32>
    %cst_29 = arith.constant dense<0.000000e+00> : vector<8x8xf32>
    %96 = tpu.matmul %93, %94, %cst_29 {dimension_numbers = #tpu.dot_dimension_numbers<[1], [1], [0], [0], [0, 0, 1, 0], [], []>} : vector<8x4xf32>, vector<8x4xf32>, vector<8x8xf32> -> vector<8x8xf32>
    %cst_30 = arith.constant 5.000000e-01 : f32
    %97 = vector.broadcast %cst_30 : f32 to vector<1x8xf32>
    %98 = arith.cmpf ogt, %6, %97 : vector<1x8xf32>
    %cst_31 = arith.constant -1.000000e+09 : f32
    %99 = vector.shape_cast %98 : vector<1x8xi1> to vector<1x8xi1>
    %100 = vector.broadcast %99 : vector<1x8xi1> to vector<8x8xi1>
    %101 = vector.broadcast %cst_31 : f32 to vector<8x8xf32>
    %102 = arith.select %100, %101, %96 : vector<8x8xi1>, vector<8x8xf32>
    %cst_32 = arith.constant dense<0xFF800000> : vector<8xf32>
    %103 = vector.multi_reduction <maximumf>, %102, %cst_32 [1] : vector<8x8xf32> to vector<8xf32>
    %104 = vector.shape_cast %103 : vector<8xf32> to vector<8x1xf32>
    %105 = vector.broadcast %104 : vector<8x1xf32> to vector<8x8xf32>
    %106 = arith.subf %102, %105 : vector<8x8xf32>
    %107 = math.exp %106 : vector<8x8xf32>
    %cst_33 = arith.constant dense<0.000000e+00> : vector<8xf32>
    %108 = vector.multi_reduction <add>, %107, %cst_33 [1] : vector<8x8xf32> to vector<8xf32>
    %109 = vector.shape_cast %108 : vector<8xf32> to vector<8x1xf32>
    %110 = tpu.reciprocal %109 {approx = true} : vector<8x1xf32> -> vector<8x1xf32>
    %111 = vector.broadcast %110 : vector<8x1xf32> to vector<8x8xf32>
    %112 = arith.mulf %107, %111 : vector<8x8xf32>
    %cst_34 = arith.constant dense<0.000000e+00> : vector<8x4xf32>
    %113 = tpu.matmul %112, %95, %cst_34 {dimension_numbers = #tpu.dot_dimension_numbers<[1], [0], [0], [1], [0, 0, 1, 1], [], []>} : vector<8x8xf32>, vector<8x4xf32>, vector<8x4xf32> -> vector<8x4xf32>
    %114 = vector.extract_strided_slice %8 {offsets = [0, 20], sizes = [8, 4], strides = [1, 1]} : vector<8x32xf32> to vector<8x4xf32>
    %115 = vector.extract_strided_slice %3 {offsets = [0, 20], sizes = [8, 4], strides = [1, 1]} : vector<8x32xf32> to vector<8x4xf32>
    %116 = vector.extract_strided_slice %4 {offsets = [0, 20], sizes = [8, 4], strides = [1, 1]} : vector<8x32xf32> to vector<8x4xf32>
    %cst_35 = arith.constant dense<0.000000e+00> : vector<8x8xf32>
    %117 = tpu.matmul %114, %115, %cst_35 {dimension_numbers = #tpu.dot_dimension_numbers<[1], [1], [0], [0], [0, 0, 1, 0], [], []>} : vector<8x4xf32>, vector<8x4xf32>, vector<8x8xf32> -> vector<8x8xf32>
    %cst_36 = arith.constant 5.000000e-01 : f32
    %118 = vector.broadcast %cst_36 : f32 to vector<1x8xf32>
    %119 = arith.cmpf ogt, %6, %118 : vector<1x8xf32>
    %cst_37 = arith.constant -1.000000e+09 : f32
    %120 = vector.shape_cast %119 : vector<1x8xi1> to vector<1x8xi1>
    %121 = vector.broadcast %120 : vector<1x8xi1> to vector<8x8xi1>
    %122 = vector.broadcast %cst_37 : f32 to vector<8x8xf32>
    %123 = arith.select %121, %122, %117 : vector<8x8xi1>, vector<8x8xf32>
    %cst_38 = arith.constant dense<0xFF800000> : vector<8xf32>
    %124 = vector.multi_reduction <maximumf>, %123, %cst_38 [1] : vector<8x8xf32> to vector<8xf32>
    %125 = vector.shape_cast %124 : vector<8xf32> to vector<8x1xf32>
    %126 = vector.broadcast %125 : vector<8x1xf32> to vector<8x8xf32>
    %127 = arith.subf %123, %126 : vector<8x8xf32>
    %128 = math.exp %127 : vector<8x8xf32>
    %cst_39 = arith.constant dense<0.000000e+00> : vector<8xf32>
    %129 = vector.multi_reduction <add>, %128, %cst_39 [1] : vector<8x8xf32> to vector<8xf32>
    %130 = vector.shape_cast %129 : vector<8xf32> to vector<8x1xf32>
    %131 = tpu.reciprocal %130 {approx = true} : vector<8x1xf32> -> vector<8x1xf32>
    %132 = vector.broadcast %131 : vector<8x1xf32> to vector<8x8xf32>
    %133 = arith.mulf %128, %132 : vector<8x8xf32>
    %cst_40 = arith.constant dense<0.000000e+00> : vector<8x4xf32>
    %134 = tpu.matmul %133, %116, %cst_40 {dimension_numbers = #tpu.dot_dimension_numbers<[1], [0], [0], [1], [0, 0, 1, 1], [], []>} : vector<8x8xf32>, vector<8x4xf32>, vector<8x4xf32> -> vector<8x4xf32>
    %135 = vector.extract_strided_slice %8 {offsets = [0, 24], sizes = [8, 4], strides = [1, 1]} : vector<8x32xf32> to vector<8x4xf32>
    %136 = vector.extract_strided_slice %3 {offsets = [0, 24], sizes = [8, 4], strides = [1, 1]} : vector<8x32xf32> to vector<8x4xf32>
    %137 = vector.extract_strided_slice %4 {offsets = [0, 24], sizes = [8, 4], strides = [1, 1]} : vector<8x32xf32> to vector<8x4xf32>
    %cst_41 = arith.constant dense<0.000000e+00> : vector<8x8xf32>
    %138 = tpu.matmul %135, %136, %cst_41 {dimension_numbers = #tpu.dot_dimension_numbers<[1], [1], [0], [0], [0, 0, 1, 0], [], []>} : vector<8x4xf32>, vector<8x4xf32>, vector<8x8xf32> -> vector<8x8xf32>
    %cst_42 = arith.constant 5.000000e-01 : f32
    %139 = vector.broadcast %cst_42 : f32 to vector<1x8xf32>
    %140 = arith.cmpf ogt, %6, %139 : vector<1x8xf32>
    %cst_43 = arith.constant -1.000000e+09 : f32
    %141 = vector.shape_cast %140 : vector<1x8xi1> to vector<1x8xi1>
    %142 = vector.broadcast %141 : vector<1x8xi1> to vector<8x8xi1>
    %143 = vector.broadcast %cst_43 : f32 to vector<8x8xf32>
    %144 = arith.select %142, %143, %138 : vector<8x8xi1>, vector<8x8xf32>
    %cst_44 = arith.constant dense<0xFF800000> : vector<8xf32>
    %145 = vector.multi_reduction <maximumf>, %144, %cst_44 [1] : vector<8x8xf32> to vector<8xf32>
    %146 = vector.shape_cast %145 : vector<8xf32> to vector<8x1xf32>
    %147 = vector.broadcast %146 : vector<8x1xf32> to vector<8x8xf32>
    %148 = arith.subf %144, %147 : vector<8x8xf32>
    %149 = math.exp %148 : vector<8x8xf32>
    %cst_45 = arith.constant dense<0.000000e+00> : vector<8xf32>
    %150 = vector.multi_reduction <add>, %149, %cst_45 [1] : vector<8x8xf32> to vector<8xf32>
    %151 = vector.shape_cast %150 : vector<8xf32> to vector<8x1xf32>
    %152 = tpu.reciprocal %151 {approx = true} : vector<8x1xf32> -> vector<8x1xf32>
    %153 = vector.broadcast %152 : vector<8x1xf32> to vector<8x8xf32>
    %154 = arith.mulf %149, %153 : vector<8x8xf32>
    %cst_46 = arith.constant dense<0.000000e+00> : vector<8x4xf32>
    %155 = tpu.matmul %154, %137, %cst_46 {dimension_numbers = #tpu.dot_dimension_numbers<[1], [0], [0], [1], [0, 0, 1, 1], [], []>} : vector<8x8xf32>, vector<8x4xf32>, vector<8x4xf32> -> vector<8x4xf32>
    %156 = vector.extract_strided_slice %8 {offsets = [0, 28], sizes = [8, 4], strides = [1, 1]} : vector<8x32xf32> to vector<8x4xf32>
    %157 = vector.extract_strided_slice %3 {offsets = [0, 28], sizes = [8, 4], strides = [1, 1]} : vector<8x32xf32> to vector<8x4xf32>
    %158 = vector.extract_strided_slice %4 {offsets = [0, 28], sizes = [8, 4], strides = [1, 1]} : vector<8x32xf32> to vector<8x4xf32>
    %cst_47 = arith.constant dense<0.000000e+00> : vector<8x8xf32>
    %159 = tpu.matmul %156, %157, %cst_47 {dimension_numbers = #tpu.dot_dimension_numbers<[1], [1], [0], [0], [0, 0, 1, 0], [], []>} : vector<8x4xf32>, vector<8x4xf32>, vector<8x8xf32> -> vector<8x8xf32>
    %cst_48 = arith.constant 5.000000e-01 : f32
    %160 = vector.broadcast %cst_48 : f32 to vector<1x8xf32>
    %161 = arith.cmpf ogt, %6, %160 : vector<1x8xf32>
    %cst_49 = arith.constant -1.000000e+09 : f32
    %162 = vector.shape_cast %161 : vector<1x8xi1> to vector<1x8xi1>
    %163 = vector.broadcast %162 : vector<1x8xi1> to vector<8x8xi1>
    %164 = vector.broadcast %cst_49 : f32 to vector<8x8xf32>
    %165 = arith.select %163, %164, %159 : vector<8x8xi1>, vector<8x8xf32>
    %cst_50 = arith.constant dense<0xFF800000> : vector<8xf32>
    %166 = vector.multi_reduction <maximumf>, %165, %cst_50 [1] : vector<8x8xf32> to vector<8xf32>
    %167 = vector.shape_cast %166 : vector<8xf32> to vector<8x1xf32>
    %168 = vector.broadcast %167 : vector<8x1xf32> to vector<8x8xf32>
    %169 = arith.subf %165, %168 : vector<8x8xf32>
    %170 = math.exp %169 : vector<8x8xf32>
    %cst_51 = arith.constant dense<0.000000e+00> : vector<8xf32>
    %171 = vector.multi_reduction <add>, %170, %cst_51 [1] : vector<8x8xf32> to vector<8xf32>
    %172 = vector.shape_cast %171 : vector<8xf32> to vector<8x1xf32>
    %173 = tpu.reciprocal %172 {approx = true} : vector<8x1xf32> -> vector<8x1xf32>
    %174 = vector.broadcast %173 : vector<8x1xf32> to vector<8x8xf32>
    %175 = arith.mulf %170, %174 : vector<8x8xf32>
    %cst_52 = arith.constant dense<0.000000e+00> : vector<8x4xf32>
    %176 = tpu.matmul %175, %158, %cst_52 {dimension_numbers = #tpu.dot_dimension_numbers<[1], [0], [0], [1], [0, 0, 1, 1], [], []>} : vector<8x8xf32>, vector<8x4xf32>, vector<8x4xf32> -> vector<8x4xf32>
    %177 = tpu.concatenate %29, %50, %71, %92, %113, %134, %155, %176 in 1 : vector<8x4xf32>, vector<8x4xf32>, vector<8x4xf32>, vector<8x4xf32>, vector<8x4xf32>, vector<8x4xf32>, vector<8x4xf32>, vector<8x4xf32> -> vector<8x32xf32>
    %c0_53 = arith.constant 0 : index
    %c0_54 = arith.constant 0 : index
    %178 = vector.load %arg3[%c0_53, %c0_54] : memref<32x32xf32, #tpu.memory_space<vmem>>, vector<32x32xf32>
    %cst_55 = arith.constant dense<0.000000e+00> : vector<8x32xf32>
    %179 = tpu.matmul %177, %178, %cst_55 {dimension_numbers = #tpu.dot_dimension_numbers<[1], [0], [0], [1], [0, 0, 1, 1], [], []>} : vector<8x32xf32>, vector<32x32xf32>, vector<8x32xf32> -> vector<8x32xf32>
    %c0_56 = arith.constant 0 : index
    %c0_57 = arith.constant 0 : index
    %180 = vector.load %arg4[%c0_56, %c0_57] : memref<1x32xf32, #tpu.memory_space<vmem>>, vector<1x32xf32>
    %181 = vector.broadcast %180 : vector<1x32xf32> to vector<8x32xf32>
    %182 = arith.addf %179, %181 : vector<8x32xf32>
    %c0_58 = arith.constant 0 : index
    %c0_59 = arith.constant 0 : index
    %c0_60 = arith.constant 0 : index
    %183 = vector.load %arg5[%c0_58, %c0_59, %c0_60] : memref<1x8x32xf32, #tpu.memory_space<vmem>>, vector<1x8x32xf32>
    %184 = vector.shape_cast %183 : vector<1x8x32xf32> to vector<8x32xf32>
    %185 = arith.addf %182, %184 : vector<8x32xf32>
    %c0_61 = arith.constant 0 : index
    %c0_62 = arith.constant 0 : index
    %c0_63 = arith.constant 0 : index
    %186 = vector.load %arg6[%c0_61, %c0_62, %c0_63] : memref<1x8x32xf32, #tpu.memory_space<vmem>>, vector<1x8x32xf32>
    %187 = vector.shape_cast %186 : vector<1x8x32xf32> to vector<8x32xf32>
    %188 = vector.shape_cast %185 : vector<8x32xf32> to vector<1x8x32xf32>
    tpu.vector_store %arg6[%c0_61, %c0_62, %c0_63], %188 {strides = array<i32>} : memref<1x8x32xf32, #tpu.memory_space<vmem>>, vector<1x8x32xf32>,
    return
  }
  func.func @transform_0(%arg0: i32) -> (i32, i32, i32) {
    %c0_i32 = arith.constant 0 : i32
    %c0_i32_0 = arith.constant 0 : i32
    %c0_i32_1 = arith.constant 0 : i32
    return %arg0, %c0_i32, %c0_i32_0 : i32, i32, i32
  }
  func.func @transform_1(%arg0: i32) -> (i32, i32, i32) {
    %c0_i32 = arith.constant 0 : i32
    %c0_i32_0 = arith.constant 0 : i32
    %c0_i32_1 = arith.constant 0 : i32
    return %arg0, %c0_i32, %c0_i32_0 : i32, i32, i32
  }
  func.func @transform_2(%arg0: i32) -> (i32, i32) {
    %c0_i32 = arith.constant 0 : i32
    %c0_i32_0 = arith.constant 0 : i32
    %c0_i32_1 = arith.constant 0 : i32
    return %c0_i32, %c0_i32_0 : i32, i32
  }
  func.func @transform_3(%arg0: i32) -> (i32, i32) {
    %c0_i32 = arith.constant 0 : i32
    %c0_i32_0 = arith.constant 0 : i32
    %c0_i32_1 = arith.constant 0 : i32
    return %c0_i32, %c0_i32_0 : i32, i32
  }
  func.func @transform_4(%arg0: i32) -> (i32, i32, i32) {
    %c0_i32 = arith.constant 0 : i32
    %c0_i32_0 = arith.constant 0 : i32
    %c0_i32_1 = arith.constant 0 : i32
    return %arg0, %c0_i32, %c0_i32_0 : i32, i32, i32
  }
  func.func @transform_5(%arg0: i32) -> (i32, i32, i32) {
    %c0_i32 = arith.constant 0 : i32
    %c0_i32_0 = arith.constant 0 : i32
    %c0_i32_1 = arith.constant 0 : i32
    return %arg0, %c0_i32, %c0_i32_0 : i32, i32, i32
  }
}

module attributes {stable_mosaic.version = 11 : i64} {
  func.func @_layernorm_kernel(%arg0: i32, %arg1: memref<16x32xf32, #tpu.memory_space<vmem>>, %arg2: memref<1x32xf32, #tpu.memory_space<vmem>>, %arg3: memref<1x32xf32, #tpu.memory_space<vmem>>, %arg4: memref<16x32xf32, #tpu.memory_space<vmem>>) attributes {dimension_semantics = [#tpu.dimension_semantics<parallel>], iteration_bounds = array<i64: 1>, scalar_prefetch = 0 : i64, scratch_operands = 0 : i64, tpu.core_type = #tpu.core_type<tc>, window_params = [{transform_indices = @transform_0, window_bounds = array<i64: 16, 32>}, {pipeline_mode = #tpu.pipeline_mode<synchronous>, transform_indices = @transform_1, window_bounds = array<i64: 1, 32>}, {pipeline_mode = #tpu.pipeline_mode<synchronous>, transform_indices = @transform_2, window_bounds = array<i64: 1, 32>}, {transform_indices = @transform_3, window_bounds = array<i64: 16, 32>}]} {
    %c0 = arith.constant 0 : index
    %c0_0 = arith.constant 0 : index
    %0 = vector.load %arg1[%c0, %c0_0] : memref<16x32xf32, #tpu.memory_space<vmem>>, vector<16x32xf32>
    %cst = arith.constant dense<0.000000e+00> : vector<16xf32>
    %1 = vector.multi_reduction <add>, %0, %cst [1] : vector<16x32xf32> to vector<16xf32>
    %2 = vector.shape_cast %1 : vector<16xf32> to vector<16x1xf32>
    %cst_1 = arith.constant 3.200000e+01 : f32
    %3 = vector.broadcast %cst_1 : f32 to vector<16x1xf32>
    %4 = arith.divf %2, %3 : vector<16x1xf32>
    %5 = vector.broadcast %4 : vector<16x1xf32> to vector<16x32xf32>
    %6 = arith.subf %0, %5 : vector<16x32xf32>
    %7 = arith.mulf %6, %6 : vector<16x32xf32>
    %cst_2 = arith.constant dense<0.000000e+00> : vector<16xf32>
    %8 = vector.multi_reduction <add>, %7, %cst_2 [1] : vector<16x32xf32> to vector<16xf32>
    %9 = vector.shape_cast %8 : vector<16xf32> to vector<16x1xf32>
    %cst_3 = arith.constant 0.0322580636 : f32
    %10 = vector.broadcast %cst_3 : f32 to vector<16x1xf32>
    %11 = arith.mulf %9, %10 : vector<16x1xf32>
    %12 = math.sqrt %11 : vector<16x1xf32>
    %cst_4 = arith.constant 9.99999997E-7 : f32
    %13 = vector.broadcast %cst_4 : f32 to vector<16x1xf32>
    %14 = arith.addf %12, %13 : vector<16x1xf32>
    %15 = tpu.reciprocal %14 {approx = true} : vector<16x1xf32> -> vector<16x1xf32>
    %c0_5 = arith.constant 0 : index
    %c0_6 = arith.constant 0 : index
    %16 = vector.load %arg2[%c0_5, %c0_6] : memref<1x32xf32, #tpu.memory_space<vmem>>, vector<1x32xf32>
    %17 = vector.broadcast %4 : vector<16x1xf32> to vector<16x32xf32>
    %18 = arith.subf %0, %17 : vector<16x32xf32>
    %19 = vector.broadcast %16 : vector<1x32xf32> to vector<16x32xf32>
    %20 = arith.mulf %19, %18 : vector<16x32xf32>
    %21 = vector.broadcast %15 : vector<16x1xf32> to vector<16x32xf32>
    %22 = arith.mulf %20, %21 : vector<16x32xf32>
    %c0_7 = arith.constant 0 : index
    %c0_8 = arith.constant 0 : index
    %23 = vector.load %arg3[%c0_7, %c0_8] : memref<1x32xf32, #tpu.memory_space<vmem>>, vector<1x32xf32>
    %24 = vector.broadcast %23 : vector<1x32xf32> to vector<16x32xf32>
    %25 = arith.addf %22, %24 : vector<16x32xf32>
    %c0_9 = arith.constant 0 : index
    %c0_10 = arith.constant 0 : index
    %26 = vector.load %arg4[%c0_9, %c0_10] : memref<16x32xf32, #tpu.memory_space<vmem>>, vector<16x32xf32>
    tpu.vector_store %arg4[%c0_9, %c0_10], %25 {strides = array<i32>} : memref<16x32xf32, #tpu.memory_space<vmem>>, vector<16x32xf32>,
    return
  }
  func.func @transform_0(%arg0: i32) -> (i32, i32) {
    %c0_i32 = arith.constant 0 : i32
    %c0_i32_0 = arith.constant 0 : i32
    return %arg0, %c0_i32 : i32, i32
  }
  func.func @transform_1(%arg0: i32) -> (i32, i32) {
    %c0_i32 = arith.constant 0 : i32
    %c0_i32_0 = arith.constant 0 : i32
    %c0_i32_1 = arith.constant 0 : i32
    return %c0_i32, %c0_i32_0 : i32, i32
  }
  func.func @transform_2(%arg0: i32) -> (i32, i32) {
    %c0_i32 = arith.constant 0 : i32
    %c0_i32_0 = arith.constant 0 : i32
    %c0_i32_1 = arith.constant 0 : i32
    return %c0_i32, %c0_i32_0 : i32, i32
  }
  func.func @transform_3(%arg0: i32) -> (i32, i32) {
    %c0_i32 = arith.constant 0 : i32
    %c0_i32_0 = arith.constant 0 : i32
    return %arg0, %c0_i32 : i32, i32
  }
}

module attributes {stable_mosaic.version = 11 : i64} {
  func.func @_matmul_kernel(%arg0: i32, %arg1: i32, %arg2: i32, %arg3: memref<16x32xf32, #tpu.memory_space<vmem>>, %arg4: memref<32x64xf32, #tpu.memory_space<vmem>>, %arg5: memref<1x64xf32, #tpu.memory_space<vmem>>, %arg6: memref<16x64xf32, #tpu.memory_space<vmem>>, %arg7: memref<16x64xf32, #tpu.memory_space<vmem>>) attributes {dimension_semantics = [#tpu.dimension_semantics<parallel>, #tpu.dimension_semantics<parallel>, #tpu.dimension_semantics<arbitrary>], iteration_bounds = array<i64: 1, 1, 1>, scalar_prefetch = 0 : i64, scratch_operands = 1 : i64, tpu.core_type = #tpu.core_type<tc>, window_params = [{transform_indices = @transform_0, window_bounds = array<i64: 16, 32>}, {transform_indices = @transform_1, window_bounds = array<i64: 32, 64>}, {transform_indices = @transform_2, window_bounds = array<i64: 1, 64>}, {transform_indices = @transform_3, window_bounds = array<i64: 16, 64>}]} {
    %c0_i32 = arith.constant 0 : i32
    %0 = arith.cmpi eq, %arg2, %c0_i32 : i32
    %1 = arith.extui %0 : i1 to i32
    %c0_i32_0 = arith.constant 0 : i32
    %2 = arith.cmpi ne, %1, %c0_i32_0 : i32
    scf.if %2 {
      %cst_10 = arith.constant 0.000000e+00 : f32
      %12 = vector.broadcast %cst_10 : f32 to vector<16x64xf32>
      %c0_11 = arith.constant 0 : index
      %c0_12 = arith.constant 0 : index
      %13 = vector.load %arg7[%c0_11, %c0_12] : memref<16x64xf32, #tpu.memory_space<vmem>>, vector<16x64xf32>
      tpu.vector_store %arg7[%c0_11, %c0_12], %12 {strides = array<i32>} : memref<16x64xf32, #tpu.memory_space<vmem>>, vector<16x64xf32>,
    } else {
    }
    %c0 = arith.constant 0 : index
    %c0_1 = arith.constant 0 : index
    %3 = vector.load %arg7[%c0, %c0_1] : memref<16x64xf32, #tpu.memory_space<vmem>>, vector<16x64xf32>
    %c0_2 = arith.constant 0 : index
    %c0_3 = arith.constant 0 : index
    %4 = vector.load %arg3[%c0_2, %c0_3] : memref<16x32xf32, #tpu.memory_space<vmem>>, vector<16x32xf32>
    %c0_4 = arith.constant 0 : index
    %c0_5 = arith.constant 0 : index
    %5 = vector.load %arg4[%c0_4, %c0_5] : memref<32x64xf32, #tpu.memory_space<vmem>>, vector<32x64xf32>
    %cst = arith.constant dense<0.000000e+00> : vector<16x64xf32>
    %6 = tpu.matmul %4, %5, %cst {dimension_numbers = #tpu.dot_dimension_numbers<[1], [0], [0], [1], [0, 0, 1, 1], [], []>} : vector<16x32xf32>, vector<32x64xf32>, vector<16x64xf32> -> vector<16x64xf32>
    %7 = arith.addf %3, %6 : vector<16x64xf32>
    %c0_6 = arith.constant 0 : index
    %c0_7 = arith.constant 0 : index
    %8 = vector.load %arg7[%c0_6, %c0_7] : memref<16x64xf32, #tpu.memory_space<vmem>>, vector<16x64xf32>
    tpu.vector_store %arg7[%c0_6, %c0_7], %7 {strides = array<i32>} : memref<16x64xf32, #tpu.memory_space<vmem>>, vector<16x64xf32>,
    %c0_i32_8 = arith.constant 0 : i32
    %9 = arith.cmpi eq, %arg2, %c0_i32_8 : i32
    %10 = arith.extui %9 : i1 to i32
    %c0_i32_9 = arith.constant 0 : i32
    %11 = arith.cmpi ne, %10, %c0_i32_9 : i32
    scf.if %11 {
      %c0_10 = arith.constant 0 : index
      %c0_11 = arith.constant 0 : index
      %12 = vector.load %arg7[%c0_10, %c0_11] : memref<16x64xf32, #tpu.memory_space<vmem>>, vector<16x64xf32>
      %c0_12 = arith.constant 0 : index
      %c0_13 = arith.constant 0 : index
      %13 = vector.load %arg5[%c0_12, %c0_13] : memref<1x64xf32, #tpu.memory_space<vmem>>, vector<1x64xf32>
      %14 = vector.broadcast %13 : vector<1x64xf32> to vector<16x64xf32>
      %15 = arith.addf %12, %14 : vector<16x64xf32>
      %c0_14 = arith.constant 0 : index
      %c0_15 = arith.constant 0 : index
      %16 = vector.load %arg6[%c0_14, %c0_15] : memref<16x64xf32, #tpu.memory_space<vmem>>, vector<16x64xf32>
      tpu.vector_store %arg6[%c0_14, %c0_15], %15 {strides = array<i32>} : memref<16x64xf32, #tpu.memory_space<vmem>>, vector<16x64xf32>,
    } else {
    }
    return
  }
  func.func @transform_0(%arg0: i32, %arg1: i32, %arg2: i32) -> (i32, i32) {
    %c0_i32 = arith.constant 0 : i32
    return %arg0, %arg2 : i32, i32
  }
  func.func @transform_1(%arg0: i32, %arg1: i32, %arg2: i32) -> (i32, i32) {
    %c0_i32 = arith.constant 0 : i32
    return %arg2, %arg1 : i32, i32
  }
  func.func @transform_2(%arg0: i32, %arg1: i32, %arg2: i32) -> (i32, i32) {
    %c0_i32 = arith.constant 0 : i32
    %c0_i32_0 = arith.constant 0 : i32
    return %c0_i32, %arg1 : i32, i32
  }
  func.func @transform_3(%arg0: i32, %arg1: i32, %arg2: i32) -> (i32, i32) {
    %c0_i32 = arith.constant 0 : i32
    return %arg0, %arg1 : i32, i32
  }
}

module attributes {stable_mosaic.version = 11 : i64} {
  func.func @_matmul_kernel(%arg0: i32, %arg1: i32, %arg2: i32, %arg3: memref<16x128xf32, #tpu.memory_space<vmem>>, %arg4: memref<128x32xf32, #tpu.memory_space<vmem>>, %arg5: memref<1x32xf32, #tpu.memory_space<vmem>>, %arg6: memref<16x32xf32, #tpu.memory_space<vmem>>, %arg7: memref<16x32xf32, #tpu.memory_space<vmem>>, %arg8: memref<16x32xf32, #tpu.memory_space<vmem>>) attributes {dimension_semantics = [#tpu.dimension_semantics<parallel>, #tpu.dimension_semantics<parallel>, #tpu.dimension_semantics<arbitrary>], iteration_bounds = array<i64: 1, 1, 1>, scalar_prefetch = 0 : i64, scratch_operands = 1 : i64, tpu.core_type = #tpu.core_type<tc>, window_params = [{transform_indices = @transform_0, window_bounds = array<i64: 16, 128>}, {transform_indices = @transform_1, window_bounds = array<i64: 128, 32>}, {transform_indices = @transform_2, window_bounds = array<i64: 1, 32>}, {transform_indices = @transform_3, window_bounds = array<i64: 16, 32>}, {transform_indices = @transform_4, window_bounds = array<i64: 16, 32>}]} {
    %c0_i32 = arith.constant 0 : i32
    %0 = arith.cmpi eq, %arg2, %c0_i32 : i32
    %1 = arith.extui %0 : i1 to i32
    %c0_i32_0 = arith.constant 0 : i32
    %2 = arith.cmpi ne, %1, %c0_i32_0 : i32
    scf.if %2 {
      %cst_10 = arith.constant 0.000000e+00 : f32
      %12 = vector.broadcast %cst_10 : f32 to vector<16x32xf32>
      %c0_11 = arith.constant 0 : index
      %c0_12 = arith.constant 0 : index
      %13 = vector.load %arg8[%c0_11, %c0_12] : memref<16x32xf32, #tpu.memory_space<vmem>>, vector<16x32xf32>
      tpu.vector_store %arg8[%c0_11, %c0_12], %12 {strides = array<i32>} : memref<16x32xf32, #tpu.memory_space<vmem>>, vector<16x32xf32>,
    } else {
    }
    %c0 = arith.constant 0 : index
    %c0_1 = arith.constant 0 : index
    %3 = vector.load %arg8[%c0, %c0_1] : memref<16x32xf32, #tpu.memory_space<vmem>>, vector<16x32xf32>
    %c0_2 = arith.constant 0 : index
    %c0_3 = arith.constant 0 : index
    %4 = vector.load %arg3[%c0_2, %c0_3] : memref<16x128xf32, #tpu.memory_space<vmem>>, vector<16x128xf32>
    %c0_4 = arith.constant 0 : index
    %c0_5 = arith.constant 0 : index
    %5 = vector.load %arg4[%c0_4, %c0_5] : memref<128x32xf32, #tpu.memory_space<vmem>>, vector<128x32xf32>
    %cst = arith.constant dense<0.000000e+00> : vector<16x32xf32>
    %6 = tpu.matmul %4, %5, %cst {dimension_numbers = #tpu.dot_dimension_numbers<[1], [0], [0], [1], [0, 0, 1, 1], [], []>} : vector<16x128xf32>, vector<128x32xf32>, vector<16x32xf32> -> vector<16x32xf32>
    %7 = arith.addf %3, %6 : vector<16x32xf32>
    %c0_6 = arith.constant 0 : index
    %c0_7 = arith.constant 0 : index
    %8 = vector.load %arg8[%c0_6, %c0_7] : memref<16x32xf32, #tpu.memory_space<vmem>>, vector<16x32xf32>
    tpu.vector_store %arg8[%c0_6, %c0_7], %7 {strides = array<i32>} : memref<16x32xf32, #tpu.memory_space<vmem>>, vector<16x32xf32>,
    %c0_i32_8 = arith.constant 0 : i32
    %9 = arith.cmpi eq, %arg2, %c0_i32_8 : i32
    %10 = arith.extui %9 : i1 to i32
    %c0_i32_9 = arith.constant 0 : i32
    %11 = arith.cmpi ne, %10, %c0_i32_9 : i32
    scf.if %11 {
      %c0_10 = arith.constant 0 : index
      %c0_11 = arith.constant 0 : index
      %12 = vector.load %arg8[%c0_10, %c0_11] : memref<16x32xf32, #tpu.memory_space<vmem>>, vector<16x32xf32>
      %c0_12 = arith.constant 0 : index
      %c0_13 = arith.constant 0 : index
      %13 = vector.load %arg5[%c0_12, %c0_13] : memref<1x32xf32, #tpu.memory_space<vmem>>, vector<1x32xf32>
      %14 = vector.broadcast %13 : vector<1x32xf32> to vector<16x32xf32>
      %15 = arith.addf %12, %14 : vector<16x32xf32>
      %c0_14 = arith.constant 0 : index
      %c0_15 = arith.constant 0 : index
      %16 = vector.load %arg6[%c0_14, %c0_15] : memref<16x32xf32, #tpu.memory_space<vmem>>, vector<16x32xf32>
      %17 = arith.addf %15, %16 : vector<16x32xf32>
      %c0_16 = arith.constant 0 : index
      %c0_17 = arith.constant 0 : index
      %18 = vector.load %arg7[%c0_16, %c0_17] : memref<16x32xf32, #tpu.memory_space<vmem>>, vector<16x32xf32>
      tpu.vector_store %arg7[%c0_16, %c0_17], %17 {strides = array<i32>} : memref<16x32xf32, #tpu.memory_space<vmem>>, vector<16x32xf32>,
    } else {
    }
    return
  }
  func.func @transform_0(%arg0: i32, %arg1: i32, %arg2: i32) -> (i32, i32) {
    %c0_i32 = arith.constant 0 : i32
    return %arg0, %arg2 : i32, i32
  }
  func.func @transform_1(%arg0: i32, %arg1: i32, %arg2: i32) -> (i32, i32) {
    %c0_i32 = arith.constant 0 : i32
    return %arg2, %arg1 : i32, i32
  }
  func.func @transform_2(%arg0: i32, %arg1: i32, %arg2: i32) -> (i32, i32) {
    %c0_i32 = arith.constant 0 : i32
    %c0_i32_0 = arith.constant 0 : i32
    return %c0_i32, %arg1 : i32, i32
  }
  func.func @transform_3(%arg0: i32, %arg1: i32, %arg2: i32) -> (i32, i32) {
    %c0_i32 = arith.constant 0 : i32
    return %arg0, %arg1 : i32, i32
  }
  func.func @transform_4(%arg0: i32, %arg1: i32, %arg2: i32) -> (i32, i32) {
    %c0_i32 = arith.constant 0 : i32
    return %arg0, %arg1 : i32, i32
  }
}

module attributes {stable_mosaic.version = 11 : i64} {
  func.func @_ln_matmul_kernel(%arg0: i32, %arg1: i32, %arg2: memref<16x32xf32, #tpu.memory_space<vmem>>, %arg3: memref<1x32xf32, #tpu.memory_space<vmem>>, %arg4: memref<1x32xf32, #tpu.memory_space<vmem>>, %arg5: memref<32x32xf32, #tpu.memory_space<vmem>>, %arg6: memref<1x32xf32, #tpu.memory_space<vmem>>, %arg7: memref<16x32xf32, #tpu.memory_space<vmem>>) attributes {dimension_semantics = [#tpu.dimension_semantics<parallel>, #tpu.dimension_semantics<parallel>], iteration_bounds = array<i64: 1, 1>, scalar_prefetch = 0 : i64, scratch_operands = 0 : i64, tpu.core_type = #tpu.core_type<tc>, window_params = [{transform_indices = @transform_0, window_bounds = array<i64: 16, 32>}, {pipeline_mode = #tpu.pipeline_mode<synchronous>, transform_indices = @transform_1, window_bounds = array<i64: 1, 32>}, {pipeline_mode = #tpu.pipeline_mode<synchronous>, transform_indices = @transform_2, window_bounds = array<i64: 1, 32>}, {transform_indices = @transform_3, window_bounds = array<i64: 32, 32>}, {transform_indices = @transform_4, window_bounds = array<i64: 1, 32>}, {transform_indices = @transform_5, window_bounds = array<i64: 16, 32>}]} {
    %c0 = arith.constant 0 : index
    %c0_0 = arith.constant 0 : index
    %0 = vector.load %arg2[%c0, %c0_0] : memref<16x32xf32, #tpu.memory_space<vmem>>, vector<16x32xf32>
    %cst = arith.constant dense<0.000000e+00> : vector<16xf32>
    %1 = vector.multi_reduction <add>, %0, %cst [1] : vector<16x32xf32> to vector<16xf32>
    %2 = vector.shape_cast %1 : vector<16xf32> to vector<16x1xf32>
    %cst_1 = arith.constant 3.200000e+01 : f32
    %3 = vector.broadcast %cst_1 : f32 to vector<16x1xf32>
    %4 = arith.divf %2, %3 : vector<16x1xf32>
    %5 = vector.broadcast %4 : vector<16x1xf32> to vector<16x32xf32>
    %6 = arith.subf %0, %5 : vector<16x32xf32>
    %7 = arith.mulf %6, %6 : vector<16x32xf32>
    %cst_2 = arith.constant dense<0.000000e+00> : vector<16xf32>
    %8 = vector.multi_reduction <add>, %7, %cst_2 [1] : vector<16x32xf32> to vector<16xf32>
    %9 = vector.shape_cast %8 : vector<16xf32> to vector<16x1xf32>
    %cst_3 = arith.constant 0.0322580636 : f32
    %10 = vector.broadcast %cst_3 : f32 to vector<16x1xf32>
    %11 = arith.mulf %9, %10 : vector<16x1xf32>
    %12 = math.sqrt %11 : vector<16x1xf32>
    %cst_4 = arith.constant 9.99999997E-7 : f32
    %13 = vector.broadcast %cst_4 : f32 to vector<16x1xf32>
    %14 = arith.addf %12, %13 : vector<16x1xf32>
    %15 = tpu.reciprocal %14 {approx = true} : vector<16x1xf32> -> vector<16x1xf32>
    %c0_5 = arith.constant 0 : index
    %c0_6 = arith.constant 0 : index
    %16 = vector.load %arg3[%c0_5, %c0_6] : memref<1x32xf32, #tpu.memory_space<vmem>>, vector<1x32xf32>
    %17 = vector.broadcast %4 : vector<16x1xf32> to vector<16x32xf32>
    %18 = arith.subf %0, %17 : vector<16x32xf32>
    %19 = vector.broadcast %16 : vector<1x32xf32> to vector<16x32xf32>
    %20 = arith.mulf %19, %18 : vector<16x32xf32>
    %21 = vector.broadcast %15 : vector<16x1xf32> to vector<16x32xf32>
    %22 = arith.mulf %20, %21 : vector<16x32xf32>
    %c0_7 = arith.constant 0 : index
    %c0_8 = arith.constant 0 : index
    %23 = vector.load %arg4[%c0_7, %c0_8] : memref<1x32xf32, #tpu.memory_space<vmem>>, vector<1x32xf32>
    %24 = vector.broadcast %23 : vector<1x32xf32> to vector<16x32xf32>
    %25 = arith.addf %22, %24 : vector<16x32xf32>
    %c0_9 = arith.constant 0 : index
    %c0_10 = arith.constant 0 : index
    %26 = vector.load %arg5[%c0_9, %c0_10] : memref<32x32xf32, #tpu.memory_space<vmem>>, vector<32x32xf32>
    %cst_11 = arith.constant dense<0.000000e+00> : vector<16x32xf32>
    %27 = tpu.matmul %25, %26, %cst_11 {dimension_numbers = #tpu.dot_dimension_numbers<[1], [0], [0], [1], [0, 0, 1, 1], [], []>} : vector<16x32xf32>, vector<32x32xf32>, vector<16x32xf32> -> vector<16x32xf32>
    %c0_12 = arith.constant 0 : index
    %c0_13 = arith.constant 0 : index
    %28 = vector.load %arg6[%c0_12, %c0_13] : memref<1x32xf32, #tpu.memory_space<vmem>>, vector<1x32xf32>
    %29 = vector.broadcast %28 : vector<1x32xf32> to vector<16x32xf32>
    %30 = arith.addf %27, %29 : vector<16x32xf32>
    %c0_14 = arith.constant 0 : index
    %c0_15 = arith.constant 0 : index
    %31 = vector.load %arg7[%c0_14, %c0_15] : memref<16x32xf32, #tpu.memory_space<vmem>>, vector<16x32xf32>
    tpu.vector_store %arg7[%c0_14, %c0_15], %30 {strides = array<i32>} : memref<16x32xf32, #tpu.memory_space<vmem>>, vector<16x32xf32>,
    return
  }
  func.func @transform_0(%arg0: i32, %arg1: i32) -> (i32, i32) {
    %c0_i32 = arith.constant 0 : i32
    %c0_i32_0 = arith.constant 0 : i32
    return %arg0, %c0_i32 : i32, i32
  }
  func.func @transform_1(%arg0: i32, %arg1: i32) -> (i32, i32) {
    %c0_i32 = arith.constant 0 : i32
    %c0_i32_0 = arith.constant 0 : i32
    %c0_i32_1 = arith.constant 0 : i32
    return %c0_i32, %c0_i32_0 : i32, i32
  }
  func.func @transform_2(%arg0: i32, %arg1: i32) -> (i32, i32) {
    %c0_i32 = arith.constant 0 : i32
    %c0_i32_0 = arith.constant 0 : i32
    %c0_i32_1 = arith.constant 0 : i32
    return %c0_i32, %c0_i32_0 : i32, i32
  }
  func.func @transform_3(%arg0: i32, %arg1: i32) -> (i32, i32) {
    %c0_i32 = arith.constant 0 : i32
    %c0_i32_0 = arith.constant 0 : i32
    return %c0_i32, %arg1 : i32, i32
  }
  func.func @transform_4(%arg0: i32, %arg1: i32) -> (i32, i32) {
    %c0_i32 = arith.constant 0 : i32
    %c0_i32_0 = arith.constant 0 : i32
    return %c0_i32, %arg1 : i32, i32
  }
  func.func @transform_5(%arg0: i32, %arg1: i32) -> (i32, i32) {
    %c0_i32 = arith.constant 0 : i32
    return %arg0, %arg1 : i32, i32
  }
}

module attributes {stable_mosaic.version = 11 : i64} {
  func.func @_cross_attn_kernel(%arg0: i32, %arg1: memref<1x8x32xf32, #tpu.memory_space<vmem>>, %arg2: memref<1x8x64xf32, #tpu.memory_space<vmem>>, %arg3: memref<1x1x8xf32, #tpu.memory_space<vmem>>, %arg4: memref<32x32xf32, #tpu.memory_space<vmem>>, %arg5: memref<1x32xf32, #tpu.memory_space<vmem>>, %arg6: memref<1x8x32xf32, #tpu.memory_space<vmem>>, %arg7: memref<1x8x32xf32, #tpu.memory_space<vmem>>) attributes {dimension_semantics = [#tpu.dimension_semantics<parallel>], iteration_bounds = array<i64: 2>, scalar_prefetch = 0 : i64, scratch_operands = 0 : i64, tpu.core_type = #tpu.core_type<tc>, window_params = [{transform_indices = @transform_0, window_bounds = array<i64: 1, 8, 32>}, {transform_indices = @transform_1, window_bounds = array<i64: 1, 8, 64>}, {transform_indices = @transform_2, window_bounds = array<i64: 1, 1, 8>}, {pipeline_mode = #tpu.pipeline_mode<synchronous>, transform_indices = @transform_3, window_bounds = array<i64: 32, 32>}, {pipeline_mode = #tpu.pipeline_mode<synchronous>, transform_indices = @transform_4, window_bounds = array<i64: 1, 32>}, {transform_indices = @transform_5, window_bounds = array<i64: 1, 8, 32>}, {transform_indices = @transform_6, window_bounds = array<i64: 1, 8, 32>}]} {
    %c0 = arith.constant 0 : index
    %c0_0 = arith.constant 0 : index
    %c0_1 = arith.constant 0 : index
    %0 = vector.load %arg1[%c0, %c0_0, %c0_1] : memref<1x8x32xf32, #tpu.memory_space<vmem>>, vector<1x8x32xf32>
    %1 = vector.shape_cast %0 : vector<1x8x32xf32> to vector<8x32xf32>
    %c0_2 = arith.constant 0 : index
    %c0_3 = arith.constant 0 : index
    %c0_4 = arith.constant 0 : index
    %2 = vector.load %arg2[%c0_2, %c0_3, %c0_4] : memref<1x8x64xf32, #tpu.memory_space<vmem>>, vector<1x8x64xf32>
    %3 = vector.shape_cast %2 : vector<1x8x64xf32> to vector<8x64xf32>
    %4 = vector.extract_strided_slice %3 {offsets = [0, 0], sizes = [8, 32], strides = [1, 1]} : vector<8x64xf32> to vector<8x32xf32>
    %5 = vector.extract_strided_slice %3 {offsets = [0, 32], sizes = [8, 32], strides = [1, 1]} : vector<8x64xf32> to vector<8x32xf32>
    %c0_5 = arith.constant 0 : index
    %c0_6 = arith.constant 0 : index
    %c0_7 = arith.constant 0 : index
    %6 = vector.load %arg3[%c0_5, %c0_6, %c0_7] : memref<1x1x8xf32, #tpu.memory_space<vmem>>, vector<1x1x8xf32>
    %7 = vector.shape_cast %6 : vector<1x1x8xf32> to vector<1x8xf32>
    %cst = arith.constant 5.000000e-01 : f32
    %8 = vector.broadcast %cst : f32 to vector<8x32xf32>
    %9 = arith.mulf %1, %8 : vector<8x32xf32>
    %10 = vector.extract_strided_slice %9 {offsets = [0, 0], sizes = [8, 4], strides = [1, 1]} : vector<8x32xf32> to vector<8x4xf32>
    %11 = vector.extract_strided_slice %4 {offsets = [0, 0], sizes = [8, 4], strides = [1, 1]} : vector<8x32xf32> to vector<8x4xf32>
    %12 = vector.extract_strided_slice %5 {offsets = [0, 0], sizes = [8, 4], strides = [1, 1]} : vector<8x32xf32> to vector<8x4xf32>
    %cst_8 = arith.constant dense<0.000000e+00> : vector<8x8xf32>
    %13 = tpu.matmul %10, %11, %cst_8 {dimension_numbers = #tpu.dot_dimension_numbers<[1], [1], [0], [0], [0, 0, 1, 0], [], []>} : vector<8x4xf32>, vector<8x4xf32>, vector<8x8xf32> -> vector<8x8xf32>
    %cst_9 = arith.constant 5.000000e-01 : f32
    %14 = vector.broadcast %cst_9 : f32 to vector<1x8xf32>
    %15 = arith.cmpf ogt, %7, %14 : vector<1x8xf32>
    %cst_10 = arith.constant -1.000000e+09 : f32
    %16 = vector.shape_cast %15 : vector<1x8xi1> to vector<1x8xi1>
    %17 = vector.broadcast %16 : vector<1x8xi1> to vector<8x8xi1>
    %18 = vector.broadcast %cst_10 : f32 to vector<8x8xf32>
    %19 = arith.select %17, %18, %13 : vector<8x8xi1>, vector<8x8xf32>
    %cst_11 = arith.constant dense<0xFF800000> : vector<8xf32>
    %20 = vector.multi_reduction <maximumf>, %19, %cst_11 [1] : vector<8x8xf32> to vector<8xf32>
    %21 = vector.shape_cast %20 : vector<8xf32> to vector<8x1xf32>
    %22 = vector.broadcast %21 : vector<8x1xf32> to vector<8x8xf32>
    %23 = arith.subf %19, %22 : vector<8x8xf32>
    %24 = math.exp %23 : vector<8x8xf32>
    %cst_12 = arith.constant dense<0.000000e+00> : vector<8xf32>
    %25 = vector.multi_reduction <add>, %24, %cst_12 [1] : vector<8x8xf32> to vector<8xf32>
    %26 = vector.shape_cast %25 : vector<8xf32> to vector<8x1xf32>
    %27 = tpu.reciprocal %26 {approx = true} : vector<8x1xf32> -> vector<8x1xf32>
    %28 = vector.broadcast %27 : vector<8x1xf32> to vector<8x8xf32>
    %29 = arith.mulf %24, %28 : vector<8x8xf32>
    %cst_13 = arith.constant dense<0.000000e+00> : vector<8x4xf32>
    %30 = tpu.matmul %29, %12, %cst_13 {dimension_numbers = #tpu.dot_dimension_numbers<[1], [0], [0], [1], [0, 0, 1, 1], [], []>} : vector<8x8xf32>, vector<8x4xf32>, vector<8x4xf32> -> vector<8x4xf32>
    %31 = vector.extract_strided_slice %9 {offsets = [0, 4], sizes = [8, 4], strides = [1, 1]} : vector<8x32xf32> to vector<8x4xf32>
    %32 = vector.extract_strided_slice %4 {offsets = [0, 4], sizes = [8, 4], strides = [1, 1]} : vector<8x32xf32> to vector<8x4xf32>
    %33 = vector.extract_strided_slice %5 {offsets = [0, 4], sizes = [8, 4], strides = [1, 1]} : vector<8x32xf32> to vector<8x4xf32>
    %cst_14 = arith.constant dense<0.000000e+00> : vector<8x8xf32>
    %34 = tpu.matmul %31, %32, %cst_14 {dimension_numbers = #tpu.dot_dimension_numbers<[1], [1], [0], [0], [0, 0, 1, 0], [], []>} : vector<8x4xf32>, vector<8x4xf32>, vector<8x8xf32> -> vector<8x8xf32>
    %cst_15 = arith.constant 5.000000e-01 : f32
    %35 = vector.broadcast %cst_15 : f32 to vector<1x8xf32>
    %36 = arith.cmpf ogt, %7, %35 : vector<1x8xf32>
    %cst_16 = arith.constant -1.000000e+09 : f32
    %37 = vector.shape_cast %36 : vector<1x8xi1> to vector<1x8xi1>
    %38 = vector.broadcast %37 : vector<1x8xi1> to vector<8x8xi1>
    %39 = vector.broadcast %cst_16 : f32 to vector<8x8xf32>
    %40 = arith.select %38, %39, %34 : vector<8x8xi1>, vector<8x8xf32>
    %cst_17 = arith.constant dense<0xFF800000> : vector<8xf32>
    %41 = vector.multi_reduction <maximumf>, %40, %cst_17 [1] : vector<8x8xf32> to vector<8xf32>
    %42 = vector.shape_cast %41 : vector<8xf32> to vector<8x1xf32>
    %43 = vector.broadcast %42 : vector<8x1xf32> to vector<8x8xf32>
    %44 = arith.subf %40, %43 : vector<8x8xf32>
    %45 = math.exp %44 : vector<8x8xf32>
    %cst_18 = arith.constant dense<0.000000e+00> : vector<8xf32>
    %46 = vector.multi_reduction <add>, %45, %cst_18 [1] : vector<8x8xf32> to vector<8xf32>
    %47 = vector.shape_cast %46 : vector<8xf32> to vector<8x1xf32>
    %48 = tpu.reciprocal %47 {approx = true} : vector<8x1xf32> -> vector<8x1xf32>
    %49 = vector.broadcast %48 : vector<8x1xf32> to vector<8x8xf32>
    %50 = arith.mulf %45, %49 : vector<8x8xf32>
    %cst_19 = arith.constant dense<0.000000e+00> : vector<8x4xf32>
    %51 = tpu.matmul %50, %33, %cst_19 {dimension_numbers = #tpu.dot_dimension_numbers<[1], [0], [0], [1], [0, 0, 1, 1], [], []>} : vector<8x8xf32>, vector<8x4xf32>, vector<8x4xf32> -> vector<8x4xf32>
    %52 = vector.extract_strided_slice %9 {offsets = [0, 8], sizes = [8, 4], strides = [1, 1]} : vector<8x32xf32> to vector<8x4xf32>
    %53 = vector.extract_strided_slice %4 {offsets = [0, 8], sizes = [8, 4], strides = [1, 1]} : vector<8x32xf32> to vector<8x4xf32>
    %54 = vector.extract_strided_slice %5 {offsets = [0, 8], sizes = [8, 4], strides = [1, 1]} : vector<8x32xf32> to vector<8x4xf32>
    %cst_20 = arith.constant dense<0.000000e+00> : vector<8x8xf32>
    %55 = tpu.matmul %52, %53, %cst_20 {dimension_numbers = #tpu.dot_dimension_numbers<[1], [1], [0], [0], [0, 0, 1, 0], [], []>} : vector<8x4xf32>, vector<8x4xf32>, vector<8x8xf32> -> vector<8x8xf32>
    %cst_21 = arith.constant 5.000000e-01 : f32
    %56 = vector.broadcast %cst_21 : f32 to vector<1x8xf32>
    %57 = arith.cmpf ogt, %7, %56 : vector<1x8xf32>
    %cst_22 = arith.constant -1.000000e+09 : f32
    %58 = vector.shape_cast %57 : vector<1x8xi1> to vector<1x8xi1>
    %59 = vector.broadcast %58 : vector<1x8xi1> to vector<8x8xi1>
    %60 = vector.broadcast %cst_22 : f32 to vector<8x8xf32>
    %61 = arith.select %59, %60, %55 : vector<8x8xi1>, vector<8x8xf32>
    %cst_23 = arith.constant dense<0xFF800000> : vector<8xf32>
    %62 = vector.multi_reduction <maximumf>, %61, %cst_23 [1] : vector<8x8xf32> to vector<8xf32>
    %63 = vector.shape_cast %62 : vector<8xf32> to vector<8x1xf32>
    %64 = vector.broadcast %63 : vector<8x1xf32> to vector<8x8xf32>
    %65 = arith.subf %61, %64 : vector<8x8xf32>
    %66 = math.exp %65 : vector<8x8xf32>
    %cst_24 = arith.constant dense<0.000000e+00> : vector<8xf32>
    %67 = vector.multi_reduction <add>, %66, %cst_24 [1] : vector<8x8xf32> to vector<8xf32>
    %68 = vector.shape_cast %67 : vector<8xf32> to vector<8x1xf32>
    %69 = tpu.reciprocal %68 {approx = true} : vector<8x1xf32> -> vector<8x1xf32>
    %70 = vector.broadcast %69 : vector<8x1xf32> to vector<8x8xf32>
    %71 = arith.mulf %66, %70 : vector<8x8xf32>
    %cst_25 = arith.constant dense<0.000000e+00> : vector<8x4xf32>
    %72 = tpu.matmul %71, %54, %cst_25 {dimension_numbers = #tpu.dot_dimension_numbers<[1], [0], [0], [1], [0, 0, 1, 1], [], []>} : vector<8x8xf32>, vector<8x4xf32>, vector<8x4xf32> -> vector<8x4xf32>
    %73 = vector.extract_strided_slice %9 {offsets = [0, 12], sizes = [8, 4], strides = [1, 1]} : vector<8x32xf32> to vector<8x4xf32>
    %74 = vector.extract_strided_slice %4 {offsets = [0, 12], sizes = [8, 4], strides = [1, 1]} : vector<8x32xf32> to vector<8x4xf32>
    %75 = vector.extract_strided_slice %5 {offsets = [0, 12], sizes = [8, 4], strides = [1, 1]} : vector<8x32xf32> to vector<8x4xf32>
    %cst_26 = arith.constant dense<0.000000e+00> : vector<8x8xf32>
    %76 = tpu.matmul %73, %74, %cst_26 {dimension_numbers = #tpu.dot_dimension_numbers<[1], [1], [0], [0], [0, 0, 1, 0], [], []>} : vector<8x4xf32>, vector<8x4xf32>, vector<8x8xf32> -> vector<8x8xf32>
    %cst_27 = arith.constant 5.000000e-01 : f32
    %77 = vector.broadcast %cst_27 : f32 to vector<1x8xf32>
    %78 = arith.cmpf ogt, %7, %77 : vector<1x8xf32>
    %cst_28 = arith.constant -1.000000e+09 : f32
    %79 = vector.shape_cast %78 : vector<1x8xi1> to vector<1x8xi1>
    %80 = vector.broadcast %79 : vector<1x8xi1> to vector<8x8xi1>
    %81 = vector.broadcast %cst_28 : f32 to vector<8x8xf32>
    %82 = arith.select %80, %81, %76 : vector<8x8xi1>, vector<8x8xf32>
    %cst_29 = arith.constant dense<0xFF800000> : vector<8xf32>
    %83 = vector.multi_reduction <maximumf>, %82, %cst_29 [1] : vector<8x8xf32> to vector<8xf32>
    %84 = vector.shape_cast %83 : vector<8xf32> to vector<8x1xf32>
    %85 = vector.broadcast %84 : vector<8x1xf32> to vector<8x8xf32>
    %86 = arith.subf %82, %85 : vector<8x8xf32>
    %87 = math.exp %86 : vector<8x8xf32>
    %cst_30 = arith.constant dense<0.000000e+00> : vector<8xf32>
    %88 = vector.multi_reduction <add>, %87, %cst_30 [1] : vector<8x8xf32> to vector<8xf32>
    %89 = vector.shape_cast %88 : vector<8xf32> to vector<8x1xf32>
    %90 = tpu.reciprocal %89 {approx = true} : vector<8x1xf32> -> vector<8x1xf32>
    %91 = vector.broadcast %90 : vector<8x1xf32> to vector<8x8xf32>
    %92 = arith.mulf %87, %91 : vector<8x8xf32>
    %cst_31 = arith.constant dense<0.000000e+00> : vector<8x4xf32>
    %93 = tpu.matmul %92, %75, %cst_31 {dimension_numbers = #tpu.dot_dimension_numbers<[1], [0], [0], [1], [0, 0, 1, 1], [], []>} : vector<8x8xf32>, vector<8x4xf32>, vector<8x4xf32> -> vector<8x4xf32>
    %94 = vector.extract_strided_slice %9 {offsets = [0, 16], sizes = [8, 4], strides = [1, 1]} : vector<8x32xf32> to vector<8x4xf32>
    %95 = vector.extract_strided_slice %4 {offsets = [0, 16], sizes = [8, 4], strides = [1, 1]} : vector<8x32xf32> to vector<8x4xf32>
    %96 = vector.extract_strided_slice %5 {offsets = [0, 16], sizes = [8, 4], strides = [1, 1]} : vector<8x32xf32> to vector<8x4xf32>
    %cst_32 = arith.constant dense<0.000000e+00> : vector<8x8xf32>
    %97 = tpu.matmul %94, %95, %cst_32 {dimension_numbers = #tpu.dot_dimension_numbers<[1], [1], [0], [0], [0, 0, 1, 0], [], []>} : vector<8x4xf32>, vector<8x4xf32>, vector<8x8xf32> -> vector<8x8xf32>
    %cst_33 = arith.constant 5.000000e-01 : f32
    %98 = vector.broadcast %cst_33 : f32 to vector<1x8xf32>
    %99 = arith.cmpf ogt, %7, %98 : vector<1x8xf32>
    %cst_34 = arith.constant -1.000000e+09 : f32
    %100 = vector.shape_cast %99 : vector<1x8xi1> to vector<1x8xi1>
    %101 = vector.broadcast %100 : vector<1x8xi1> to vector<8x8xi1>
    %102 = vector.broadcast %cst_34 : f32 to vector<8x8xf32>
    %103 = arith.select %101, %102, %97 : vector<8x8xi1>, vector<8x8xf32>
    %cst_35 = arith.constant dense<0xFF800000> : vector<8xf32>
    %104 = vector.multi_reduction <maximumf>, %103, %cst_35 [1] : vector<8x8xf32> to vector<8xf32>
    %105 = vector.shape_cast %104 : vector<8xf32> to vector<8x1xf32>
    %106 = vector.broadcast %105 : vector<8x1xf32> to vector<8x8xf32>
    %107 = arith.subf %103, %106 : vector<8x8xf32>
    %108 = math.exp %107 : vector<8x8xf32>
    %cst_36 = arith.constant dense<0.000000e+00> : vector<8xf32>
    %109 = vector.multi_reduction <add>, %108, %cst_36 [1] : vector<8x8xf32> to vector<8xf32>
    %110 = vector.shape_cast %109 : vector<8xf32> to vector<8x1xf32>
    %111 = tpu.reciprocal %110 {approx = true} : vector<8x1xf32> -> vector<8x1xf32>
    %112 = vector.broadcast %111 : vector<8x1xf32> to vector<8x8xf32>
    %113 = arith.mulf %108, %112 : vector<8x8xf32>
    %cst_37 = arith.constant dense<0.000000e+00> : vector<8x4xf32>
    %114 = tpu.matmul %113, %96, %cst_37 {dimension_numbers = #tpu.dot_dimension_numbers<[1], [0], [0], [1], [0, 0, 1, 1], [], []>} : vector<8x8xf32>, vector<8x4xf32>, vector<8x4xf32> -> vector<8x4xf32>
    %115 = vector.extract_strided_slice %9 {offsets = [0, 20], sizes = [8, 4], strides = [1, 1]} : vector<8x32xf32> to vector<8x4xf32>
    %116 = vector.extract_strided_slice %4 {offsets = [0, 20], sizes = [8, 4], strides = [1, 1]} : vector<8x32xf32> to vector<8x4xf32>
    %117 = vector.extract_strided_slice %5 {offsets = [0, 20], sizes = [8, 4], strides = [1, 1]} : vector<8x32xf32> to vector<8x4xf32>
    %cst_38 = arith.constant dense<0.000000e+00> : vector<8x8xf32>
    %118 = tpu.matmul %115, %116, %cst_38 {dimension_numbers = #tpu.dot_dimension_numbers<[1], [1], [0], [0], [0, 0, 1, 0], [], []>} : vector<8x4xf32>, vector<8x4xf32>, vector<8x8xf32> -> vector<8x8xf32>
    %cst_39 = arith.constant 5.000000e-01 : f32
    %119 = vector.broadcast %cst_39 : f32 to vector<1x8xf32>
    %120 = arith.cmpf ogt, %7, %119 : vector<1x8xf32>
    %cst_40 = arith.constant -1.000000e+09 : f32
    %121 = vector.shape_cast %120 : vector<1x8xi1> to vector<1x8xi1>
    %122 = vector.broadcast %121 : vector<1x8xi1> to vector<8x8xi1>
    %123 = vector.broadcast %cst_40 : f32 to vector<8x8xf32>
    %124 = arith.select %122, %123, %118 : vector<8x8xi1>, vector<8x8xf32>
    %cst_41 = arith.constant dense<0xFF800000> : vector<8xf32>
    %125 = vector.multi_reduction <maximumf>, %124, %cst_41 [1] : vector<8x8xf32> to vector<8xf32>
    %126 = vector.shape_cast %125 : vector<8xf32> to vector<8x1xf32>
    %127 = vector.broadcast %126 : vector<8x1xf32> to vector<8x8xf32>
    %128 = arith.subf %124, %127 : vector<8x8xf32>
    %129 = math.exp %128 : vector<8x8xf32>
    %cst_42 = arith.constant dense<0.000000e+00> : vector<8xf32>
    %130 = vector.multi_reduction <add>, %129, %cst_42 [1] : vector<8x8xf32> to vector<8xf32>
    %131 = vector.shape_cast %130 : vector<8xf32> to vector<8x1xf32>
    %132 = tpu.reciprocal %131 {approx = true} : vector<8x1xf32> -> vector<8x1xf32>
    %133 = vector.broadcast %132 : vector<8x1xf32> to vector<8x8xf32>
    %134 = arith.mulf %129, %133 : vector<8x8xf32>
    %cst_43 = arith.constant dense<0.000000e+00> : vector<8x4xf32>
    %135 = tpu.matmul %134, %117, %cst_43 {dimension_numbers = #tpu.dot_dimension_numbers<[1], [0], [0], [1], [0, 0, 1, 1], [], []>} : vector<8x8xf32>, vector<8x4xf32>, vector<8x4xf32> -> vector<8x4xf32>
    %136 = vector.extract_strided_slice %9 {offsets = [0, 24], sizes = [8, 4], strides = [1, 1]} : vector<8x32xf32> to vector<8x4xf32>
    %137 = vector.extract_strided_slice %4 {offsets = [0, 24], sizes = [8, 4], strides = [1, 1]} : vector<8x32xf32> to vector<8x4xf32>
    %138 = vector.extract_strided_slice %5 {offsets = [0, 24], sizes = [8, 4], strides = [1, 1]} : vector<8x32xf32> to vector<8x4xf32>
    %cst_44 = arith.constant dense<0.000000e+00> : vector<8x8xf32>
    %139 = tpu.matmul %136, %137, %cst_44 {dimension_numbers = #tpu.dot_dimension_numbers<[1], [1], [0], [0], [0, 0, 1, 0], [], []>} : vector<8x4xf32>, vector<8x4xf32>, vector<8x8xf32> -> vector<8x8xf32>
    %cst_45 = arith.constant 5.000000e-01 : f32
    %140 = vector.broadcast %cst_45 : f32 to vector<1x8xf32>
    %141 = arith.cmpf ogt, %7, %140 : vector<1x8xf32>
    %cst_46 = arith.constant -1.000000e+09 : f32
    %142 = vector.shape_cast %141 : vector<1x8xi1> to vector<1x8xi1>
    %143 = vector.broadcast %142 : vector<1x8xi1> to vector<8x8xi1>
    %144 = vector.broadcast %cst_46 : f32 to vector<8x8xf32>
    %145 = arith.select %143, %144, %139 : vector<8x8xi1>, vector<8x8xf32>
    %cst_47 = arith.constant dense<0xFF800000> : vector<8xf32>
    %146 = vector.multi_reduction <maximumf>, %145, %cst_47 [1] : vector<8x8xf32> to vector<8xf32>
    %147 = vector.shape_cast %146 : vector<8xf32> to vector<8x1xf32>
    %148 = vector.broadcast %147 : vector<8x1xf32> to vector<8x8xf32>
    %149 = arith.subf %145, %148 : vector<8x8xf32>
    %150 = math.exp %149 : vector<8x8xf32>
    %cst_48 = arith.constant dense<0.000000e+00> : vector<8xf32>
    %151 = vector.multi_reduction <add>, %150, %cst_48 [1] : vector<8x8xf32> to vector<8xf32>
    %152 = vector.shape_cast %151 : vector<8xf32> to vector<8x1xf32>
    %153 = tpu.reciprocal %152 {approx = true} : vector<8x1xf32> -> vector<8x1xf32>
    %154 = vector.broadcast %153 : vector<8x1xf32> to vector<8x8xf32>
    %155 = arith.mulf %150, %154 : vector<8x8xf32>
    %cst_49 = arith.constant dense<0.000000e+00> : vector<8x4xf32>
    %156 = tpu.matmul %155, %138, %cst_49 {dimension_numbers = #tpu.dot_dimension_numbers<[1], [0], [0], [1], [0, 0, 1, 1], [], []>} : vector<8x8xf32>, vector<8x4xf32>, vector<8x4xf32> -> vector<8x4xf32>
    %157 = vector.extract_strided_slice %9 {offsets = [0, 28], sizes = [8, 4], strides = [1, 1]} : vector<8x32xf32> to vector<8x4xf32>
    %158 = vector.extract_strided_slice %4 {offsets = [0, 28], sizes = [8, 4], strides = [1, 1]} : vector<8x32xf32> to vector<8x4xf32>
    %159 = vector.extract_strided_slice %5 {offsets = [0, 28], sizes = [8, 4], strides = [1, 1]} : vector<8x32xf32> to vector<8x4xf32>
    %cst_50 = arith.constant dense<0.000000e+00> : vector<8x8xf32>
    %160 = tpu.matmul %157, %158, %cst_50 {dimension_numbers = #tpu.dot_dimension_numbers<[1], [1], [0], [0], [0, 0, 1, 0], [], []>} : vector<8x4xf32>, vector<8x4xf32>, vector<8x8xf32> -> vector<8x8xf32>
    %cst_51 = arith.constant 5.000000e-01 : f32
    %161 = vector.broadcast %cst_51 : f32 to vector<1x8xf32>
    %162 = arith.cmpf ogt, %7, %161 : vector<1x8xf32>
    %cst_52 = arith.constant -1.000000e+09 : f32
    %163 = vector.shape_cast %162 : vector<1x8xi1> to vector<1x8xi1>
    %164 = vector.broadcast %163 : vector<1x8xi1> to vector<8x8xi1>
    %165 = vector.broadcast %cst_52 : f32 to vector<8x8xf32>
    %166 = arith.select %164, %165, %160 : vector<8x8xi1>, vector<8x8xf32>
    %cst_53 = arith.constant dense<0xFF800000> : vector<8xf32>
    %167 = vector.multi_reduction <maximumf>, %166, %cst_53 [1] : vector<8x8xf32> to vector<8xf32>
    %168 = vector.shape_cast %167 : vector<8xf32> to vector<8x1xf32>
    %169 = vector.broadcast %168 : vector<8x1xf32> to vector<8x8xf32>
    %170 = arith.subf %166, %169 : vector<8x8xf32>
    %171 = math.exp %170 : vector<8x8xf32>
    %cst_54 = arith.constant dense<0.000000e+00> : vector<8xf32>
    %172 = vector.multi_reduction <add>, %171, %cst_54 [1] : vector<8x8xf32> to vector<8xf32>
    %173 = vector.shape_cast %172 : vector<8xf32> to vector<8x1xf32>
    %174 = tpu.reciprocal %173 {approx = true} : vector<8x1xf32> -> vector<8x1xf32>
    %175 = vector.broadcast %174 : vector<8x1xf32> to vector<8x8xf32>
    %176 = arith.mulf %171, %175 : vector<8x8xf32>
    %cst_55 = arith.constant dense<0.000000e+00> : vector<8x4xf32>
    %177 = tpu.matmul %176, %159, %cst_55 {dimension_numbers = #tpu.dot_dimension_numbers<[1], [0], [0], [1], [0, 0, 1, 1], [], []>} : vector<8x8xf32>, vector<8x4xf32>, vector<8x4xf32> -> vector<8x4xf32>
    %178 = tpu.concatenate %30, %51, %72, %93, %114, %135, %156, %177 in 1 : vector<8x4xf32>, vector<8x4xf32>, vector<8x4xf32>, vector<8x4xf32>, vector<8x4xf32>, vector<8x4xf32>, vector<8x4xf32>, vector<8x4xf32> -> vector<8x32xf32>
    %c0_56 = arith.constant 0 : index
    %c0_57 = arith.constant 0 : index
    %179 = vector.load %arg4[%c0_56, %c0_57] : memref<32x32xf32, #tpu.memory_space<vmem>>, vector<32x32xf32>
    %cst_58 = arith.constant dense<0.000000e+00> : vector<8x32xf32>
    %180 = tpu.matmul %178, %179, %cst_58 {dimension_numbers = #tpu.dot_dimension_numbers<[1], [0], [0], [1], [0, 0, 1, 1], [], []>} : vector<8x32xf32>, vector<32x32xf32>, vector<8x32xf32> -> vector<8x32xf32>
    %c0_59 = arith.constant 0 : index
    %c0_60 = arith.constant 0 : index
    %181 = vector.load %arg5[%c0_59, %c0_60] : memref<1x32xf32, #tpu.memory_space<vmem>>, vector<1x32xf32>
    %182 = vector.broadcast %181 : vector<1x32xf32> to vector<8x32xf32>
    %183 = arith.addf %180, %182 : vector<8x32xf32>
    %c0_61 = arith.constant 0 : index
    %c0_62 = arith.constant 0 : index
    %c0_63 = arith.constant 0 : index
    %184 = vector.load %arg6[%c0_61, %c0_62, %c0_63] : memref<1x8x32xf32, #tpu.memory_space<vmem>>, vector<1x8x32xf32>
    %185 = vector.shape_cast %184 : vector<1x8x32xf32> to vector<8x32xf32>
    %186 = arith.addf %183, %185 : vector<8x32xf32>
    %c0_64 = arith.constant 0 : index
    %c0_65 = arith.constant 0 : index
    %c0_66 = arith.constant 0 : index
    %187 = vector.load %arg7[%c0_64, %c0_65, %c0_66] : memref<1x8x32xf32, #tpu.memory_space<vmem>>, vector<1x8x32xf32>
    %188 = vector.shape_cast %187 : vector<1x8x32xf32> to vector<8x32xf32>
    %189 = vector.shape_cast %186 : vector<8x32xf32> to vector<1x8x32xf32>
    tpu.vector_store %arg7[%c0_64, %c0_65, %c0_66], %189 {strides = array<i32>} : memref<1x8x32xf32, #tpu.memory_space<vmem>>, vector<1x8x32xf32>,
    return
  }
  func.func @transform_0(%arg0: i32) -> (i32, i32, i32) {
    %c0_i32 = arith.constant 0 : i32
    %c0_i32_0 = arith.constant 0 : i32
    %c0_i32_1 = arith.constant 0 : i32
    return %arg0, %c0_i32, %c0_i32_0 : i32, i32, i32
  }
  func.func @transform_1(%arg0: i32) -> (i32, i32, i32) {
    %c0_i32 = arith.constant 0 : i32
    %c0_i32_0 = arith.constant 0 : i32
    %c0_i32_1 = arith.constant 0 : i32
    return %arg0, %c0_i32, %c0_i32_0 : i32, i32, i32
  }
  func.func @transform_2(%arg0: i32) -> (i32, i32, i32) {
    %c0_i32 = arith.constant 0 : i32
    %c0_i32_0 = arith.constant 0 : i32
    %c0_i32_1 = arith.constant 0 : i32
    return %arg0, %c0_i32, %c0_i32_0 : i32, i32, i32
  }
  func.func @transform_3(%arg0: i32) -> (i32, i32) {
    %c0_i32 = arith.constant 0 : i32
    %c0_i32_0 = arith.constant 0 : i32
    %c0_i32_1 = arith.constant 0 : i32
    return %c0_i32, %c0_i32_0 : i32, i32
  }
  func.func @transform_4(%arg0: i32) -> (i32, i32) {
    %c0_i32 = arith.constant 0 : i32
    %c0_i32_0 = arith.constant 0 : i32
    %c0_i32_1 = arith.constant 0 : i32
    return %c0_i32, %c0_i32_0 : i32, i32
  }
  func.func @transform_5(%arg0: i32) -> (i32, i32, i32) {
    %c0_i32 = arith.constant 0 : i32
    %c0_i32_0 = arith.constant 0 : i32
    %c0_i32_1 = arith.constant 0 : i32
    return %arg0, %c0_i32, %c0_i32_0 : i32, i32, i32
  }
  func.func @transform_6(%arg0: i32) -> (i32, i32, i32) {
    %c0_i32 = arith.constant 0 : i32
    %c0_i32_0 = arith.constant 0 : i32
    %c0_i32_1 = arith.constant 0 : i32
    return %arg0, %c0_i32, %c0_i32_0 : i32, i32, i32
  }
}

module attributes {stable_mosaic.version = 11 : i64} {
  func.func @_ln_maxpool_linear_kernel(%arg0: i32, %arg1: memref<2x8x32xf32, #tpu.memory_space<vmem>>, %arg2: memref<1x32xf32, #tpu.memory_space<vmem>>, %arg3: memref<1x32xf32, #tpu.memory_space<vmem>>, %arg4: memref<32x128xf32, #tpu.memory_space<vmem>>, %arg5: memref<1x128xf32, #tpu.memory_space<vmem>>, %arg6: memref<2x128xf32, #tpu.memory_space<vmem>>, %arg7: memref<2x32xf32, #tpu.memory_space<vmem>>) attributes {dimension_semantics = [#tpu.dimension_semantics<arbitrary>], iteration_bounds = array<i64: 1>, scalar_prefetch = 0 : i64, scratch_operands = 1 : i64, tpu.core_type = #tpu.core_type<tc>, window_params = [{transform_indices = @transform_0, window_bounds = array<i64: 2, 8, 32>}, {pipeline_mode = #tpu.pipeline_mode<synchronous>, transform_indices = @transform_1, window_bounds = array<i64: 1, 32>}, {pipeline_mode = #tpu.pipeline_mode<synchronous>, transform_indices = @transform_2, window_bounds = array<i64: 1, 32>}, {pipeline_mode = #tpu.pipeline_mode<synchronous>, transform_indices = @transform_3, window_bounds = array<i64: 32, 128>}, {pipeline_mode = #tpu.pipeline_mode<synchronous>, transform_indices = @transform_4, window_bounds = array<i64: 1, 128>}, {pipeline_mode = #tpu.pipeline_mode<synchronous>, transform_indices = @transform_5, window_bounds = array<i64: 2, 128>}]} {
    %c0_i32 = arith.constant 0 : i32
    %0 = arith.cmpi eq, %arg0, %c0_i32 : i32
    %1 = arith.extui %0 : i1 to i32
    %c0_i32_0 = arith.constant 0 : i32
    %2 = arith.cmpi ne, %1, %c0_i32_0 : i32
    scf.if %2 {
      %cst_18 = arith.constant 0xFF800000 : f32
      %38 = vector.broadcast %cst_18 : f32 to vector<2x32xf32>
      %c0_19 = arith.constant 0 : index
      %c0_20 = arith.constant 0 : index
      %39 = vector.load %arg7[%c0_19, %c0_20] : memref<2x32xf32, #tpu.memory_space<vmem>>, vector<2x32xf32>
      tpu.vector_store %arg7[%c0_19, %c0_20], %38 {strides = array<i32>} : memref<2x32xf32, #tpu.memory_space<vmem>>, vector<2x32xf32>,
    } else {
    }
    %c0 = arith.constant 0 : index
    %c0_1 = arith.constant 0 : index
    %c0_2 = arith.constant 0 : index
    %3 = vector.load %arg1[%c0, %c0_1, %c0_2] : memref<2x8x32xf32, #tpu.memory_space<vmem>>, vector<2x8x32xf32>
    %cst = arith.constant dense<0.000000e+00> : vector<2x8xf32>
    %4 = vector.multi_reduction <add>, %3, %cst [2] : vector<2x8x32xf32> to vector<2x8xf32>
    %5 = vector.shape_cast %4 : vector<2x8xf32> to vector<2x8x1xf32>
    %cst_3 = arith.constant 3.200000e+01 : f32
    %6 = vector.broadcast %cst_3 : f32 to vector<2x8x1xf32>
    %7 = arith.divf %5, %6 : vector<2x8x1xf32>
    %8 = vector.broadcast %7 : vector<2x8x1xf32> to vector<2x8x32xf32>
    %9 = arith.subf %3, %8 : vector<2x8x32xf32>
    %10 = arith.mulf %9, %9 : vector<2x8x32xf32>
    %cst_4 = arith.constant dense<0.000000e+00> : vector<2x8xf32>
    %11 = vector.multi_reduction <add>, %10, %cst_4 [2] : vector<2x8x32xf32> to vector<2x8xf32>
    %12 = vector.shape_cast %11 : vector<2x8xf32> to vector<2x8x1xf32>
    %cst_5 = arith.constant 0.0322580636 : f32
    %13 = vector.broadcast %cst_5 : f32 to vector<2x8x1xf32>
    %14 = arith.mulf %12, %13 : vector<2x8x1xf32>
    %15 = math.sqrt %14 : vector<2x8x1xf32>
    %cst_6 = arith.constant 9.99999997E-7 : f32
    %16 = vector.broadcast %cst_6 : f32 to vector<2x8x1xf32>
    %17 = arith.addf %15, %16 : vector<2x8x1xf32>
    %18 = tpu.reciprocal %17 {approx = true} : vector<2x8x1xf32> -> vector<2x8x1xf32>
    %c0_7 = arith.constant 0 : index
    %c0_8 = arith.constant 0 : index
    %19 = vector.load %arg2[%c0_7, %c0_8] : memref<1x32xf32, #tpu.memory_space<vmem>>, vector<1x32xf32>
    %20 = vector.broadcast %7 : vector<2x8x1xf32> to vector<2x8x32xf32>
    %21 = arith.subf %3, %20 : vector<2x8x32xf32>
    %22 = vector.shape_cast %19 : vector<1x32xf32> to vector<1x1x32xf32>
    %23 = vector.broadcast %22 : vector<1x1x32xf32> to vector<2x8x32xf32>
    %24 = arith.mulf %23, %21 : vector<2x8x32xf32>
    %25 = vector.broadcast %18 : vector<2x8x1xf32> to vector<2x8x32xf32>
    %26 = arith.mulf %24, %25 : vector<2x8x32xf32>
    %c0_9 = arith.constant 0 : index
    %c0_10 = arith.constant 0 : index
    %27 = vector.load %arg3[%c0_9, %c0_10] : memref<1x32xf32, #tpu.memory_space<vmem>>, vector<1x32xf32>
    %28 = vector.shape_cast %27 : vector<1x32xf32> to vector<1x1x32xf32>
    %29 = vector.broadcast %28 : vector<1x1x32xf32> to vector<2x8x32xf32>
    %30 = arith.addf %26, %29 : vector<2x8x32xf32>
    %c0_11 = arith.constant 0 : index
    %c0_12 = arith.constant 0 : index
    %31 = vector.load %arg7[%c0_11, %c0_12] : memref<2x32xf32, #tpu.memory_space<vmem>>, vector<2x32xf32>
    %cst_13 = arith.constant dense<0xFF800000> : vector<2x32xf32>
    %32 = vector.multi_reduction <maximumf>, %30, %cst_13 [1] : vector<2x8x32xf32> to vector<2x32xf32>
    %33 = arith.maximumf %31, %32 : vector<2x32xf32>
    %c0_14 = arith.constant 0 : index
    %c0_15 = arith.constant 0 : index
    %34 = vector.load %arg7[%c0_14, %c0_15] : memref<2x32xf32, #tpu.memory_space<vmem>>, vector<2x32xf32>
    tpu.vector_store %arg7[%c0_14, %c0_15], %33 {strides = array<i32>} : memref<2x32xf32, #tpu.memory_space<vmem>>, vector<2x32xf32>,
    %c0_i32_16 = arith.constant 0 : i32
    %35 = arith.cmpi eq, %arg0, %c0_i32_16 : i32
    %36 = arith.extui %35 : i1 to i32
    %c0_i32_17 = arith.constant 0 : i32
    %37 = arith.cmpi ne, %36, %c0_i32_17 : i32
    scf.if %37 {
      %c0_18 = arith.constant 0 : index
      %c0_19 = arith.constant 0 : index
      %38 = vector.load %arg7[%c0_18, %c0_19] : memref<2x32xf32, #tpu.memory_space<vmem>>, vector<2x32xf32>
      %c0_20 = arith.constant 0 : index
      %c0_21 = arith.constant 0 : index
      %39 = vector.load %arg4[%c0_20, %c0_21] : memref<32x128xf32, #tpu.memory_space<vmem>>, vector<32x128xf32>
      %cst_22 = arith.constant dense<0.000000e+00> : vector<2x128xf32>
      %40 = tpu.matmul %38, %39, %cst_22 {dimension_numbers = #tpu.dot_dimension_numbers<[1], [0], [0], [1], [0, 0, 1, 1], [], []>} : vector<2x32xf32>, vector<32x128xf32>, vector<2x128xf32> -> vector<2x128xf32>
      %c0_23 = arith.constant 0 : index
      %c0_24 = arith.constant 0 : index
      %41 = vector.load %arg5[%c0_23, %c0_24] : memref<1x128xf32, #tpu.memory_space<vmem>>, vector<1x128xf32>
      %42 = vector.broadcast %41 : vector<1x128xf32> to vector<2x128xf32>
      %43 = arith.addf %40, %42 : vector<2x128xf32>
      %c0_25 = arith.constant 0 : index
      %c0_26 = arith.constant 0 : index
      %44 = vector.load %arg6[%c0_25, %c0_26] : memref<2x128xf32, #tpu.memory_space<vmem>>, vector<2x128xf32>
      tpu.vector_store %arg6[%c0_25, %c0_26], %43 {strides = array<i32>} : memref<2x128xf32, #tpu.memory_space<vmem>>, vector<2x128xf32>,
    } else {
    }
    return
  }
  func.func @transform_0(%arg0: i32) -> (i32, i32, i32) {
    %c0_i32 = arith.constant 0 : i32
    %c0_i32_0 = arith.constant 0 : i32
    %c0_i32_1 = arith.constant 0 : i32
    return %c0_i32, %arg0, %c0_i32_0 : i32, i32, i32
  }
  func.func @transform_1(%arg0: i32) -> (i32, i32) {
    %c0_i32 = arith.constant 0 : i32
    %c0_i32_0 = arith.constant 0 : i32
    %c0_i32_1 = arith.constant 0 : i32
    return %c0_i32, %c0_i32_0 : i32, i32
  }
  func.func @transform_2(%arg0: i32) -> (i32, i32) {
    %c0_i32 = arith.constant 0 : i32
    %c0_i32_0 = arith.constant 0 : i32
    %c0_i32_1 = arith.constant 0 : i32
    return %c0_i32, %c0_i32_0 : i32, i32
  }
  func.func @transform_3(%arg0: i32) -> (i32, i32) {
    %c0_i32 = arith.constant 0 : i32
    %c0_i32_0 = arith.constant 0 : i32
    %c0_i32_1 = arith.constant 0 : i32
    return %c0_i32, %c0_i32_0 : i32, i32
  }
  func.func @transform_4(%arg0: i32) -> (i32, i32) {
    %c0_i32 = arith.constant 0 : i32
    %c0_i32_0 = arith.constant 0 : i32
    %c0_i32_1 = arith.constant 0 : i32
    return %c0_i32, %c0_i32_0 : i32, i32
  }
  func.func @transform_5(%arg0: i32) -> (i32, i32) {
    %c0_i32 = arith.constant 0 : i32
    %c0_i32_0 = arith.constant 0 : i32
    %c0_i32_1 = arith.constant 0 : i32
    return %c0_i32, %c0_i32_0 : i32, i32
  }
}

</mosaic_0001>

<bundles_post_ra>
// kernel: tenc_forward.15
= control target key start
LH: loop header
LB: loop body
LE: loop exit
PB: predicated region body
PF: predicated region fallthrough
CT: control target
= control target key end

     0   :  { %vm22_vm0 = vcmask 261120   ;;  %v156_v4 = vmov 32.0   ;;  %vm129_vm6 = vcmask 785408   ;;  %s226_s0 = inlined_call_operand.vmem [shape: f32[16,32], index: 0, kind: input, shape index: {}]   ;;  %s227_s1 = inlined_call_operand.vmem [shape: f32[1,32], index: 1, kind: input, shape index: {}]   ;;  %s228_s2 = inlined_call_operand.vmem [shape: f32[1,32], index: 2, kind: input, shape index: {}]   ;;  %s229_s4 = inlined_call_operand.vmem [shape: f32[1,96], index: 4, kind: input, shape index: {}]   ;;  %s230_s3 = inlined_call_operand.vmem [shape: f32[32,96], index: 3, kind: input, shape index: {}]   ;;  %s231_s5 = inlined_call_operand.vmem [shape: f32[16,96], index: 5, kind: output, shape index: {}]  }
   0x1   :  { %v20_v0 = vld [vmem:[%s226_s0] sm:$0xff]  ;;  %v21_v2 = vld [vmem:[%s226_s0 + $0x8] sm:$0xff]  ;;  %146 = vrcp.f32 %v156_v4  ;;  %v95_v24 = vld [vmem:[%s230_s3 + $0x18] sm:$0xff] }
   0x2   :  { %v23_v1 = vsel %vm22_vm0, %v20_v0, 0.0  ;;  %v26_v3 = vsel %vm22_vm0, %v21_v2, 0.0  ;;  %v143_v12 = vld [vmem:[%s227_s1] ss:$0 sm:$0xff]  ;;  %v94_v25 = vld [vmem:[%s230_s3 + $0x10] sm:$0xff]  ;;  %118 = vmatpush.msra.mxu0 %v95_v24  ;;  %138 = vmatpush.msra.mxu1 %v95_v24  ;;  %v93_v26 = vld [vmem:[%s230_s3 + $0x8] sm:$0xff] }
   0x3   :  { %24 = vadd.xlane.f32.xlu0 %v23_v1  ;;  %v92_v27 = vld [vmem:[%s230_s3] sm:$0xff] }
   0x4   :  { %119 = vmatpush.msra.mxu0 %v94_v25  ;;  %139 = vmatpush.msra.mxu1 %v94_v25  ;;  %v144_v52 = vld [vmem:[%s228_s2] ss:$0 sm:$0xff] }
   0x5   :  { %v145_v61 = vld [vmem:[%s229_s4] ss:$0 sm:$0xff] }
   0x6   :  { %120 = vmatpush.msra.mxu0 %v93_v26  ;;  %140 = vmatpush.msra.mxu1 %v93_v26 }
   0x7   :  { %v147_v5 = vpop.eup %146 }
   0x8   :  { %v30_v6 = vmul.f32 32.0, %v147_v5  ;;  %vm34_vm1 = vweird.f32 %v147_v5  ;;  %121 = vmatpush.msra.mxu0 %v92_v27  ;;  %141 = vmatpush.msra.mxu1 %v92_v27 }
   0xa   :  { %v31_v7 = vsub.f32 1.0, %v30_v6 }
   0xb   :  { %27 = vadd.xlane.f32.xlu0 %v26_v3 }
   0xc   :  { %v32_v8 = vmul.f32 %v147_v5, %v31_v7 }
   0xe   :  { %v33_v9 = vadd.f32 %v147_v5, %v32_v8 }
  0x10   :  { %v35_v10 = vsel %vm34_vm1, %v147_v5, %v33_v9 }
  0x76   :  { %v25_v11 = vpop.xlane.xlu0 %24 }
  0x77   :  { %v36_v13 = vmul.f32 %v35_v10, %v25_v11 }
  0x79   :  { %v38_v14 = vsub.f32 %v20_v0, %v36_v13 }
  0x7b   :  { %v82_v15 = vmul.f32 %v143_v12, %v38_v14  ;;  %v40_v16 = vmul.f32 %v38_v14, %v38_v14 }
  0x7d   :  { %v42_v17 = vsel %vm22_vm0, %v40_v16, 0.0 }
  0x7e   :  { %43 = vadd.xlane.f32.xlu1 %v42_v17  ;;  %v28_v18 = vpop.xlane.xlu0 %27 }
  0x7f   :  { %v37_v19 = vmul.f32 %v35_v10, %v28_v18 }
  0x81   :  { %v39_v20 = vsub.f32 %v21_v2, %v37_v19 }
  0x83   :  { %v83_v21 = vmul.f32 %v143_v12, %v39_v20  ;;  %v41_v22 = vmul.f32 %v39_v20, %v39_v20 }
  0x85   :  { %v45_v23 = vsel %vm22_vm0, %v41_v22, 0.0 }
  0x86   :  { %46 = vadd.xlane.f32.xlu1 %v45_v23 }
  0xf1   :  { %v44_v28 = vpop.xlane.xlu1 %43 }
  0xf2   :  { %v48_v29 = vmul.f32 0.032258064, %v44_v28 }
  0xf4   :  { %148 = vrsqrt.f32 %v48_v29  ;;  %vm57_vm2 = vcmp.eq.f32.partialorder %v48_v29, inf  ;;  %v60_v42 = vand.u32 2147483648, %v48_v29  ;;  %vm59_vm3 = vcmp.eq.f32.partialorder %v48_v29, 0.0 }
  0xf9   :  { %v47_v30 = vpop.xlane.xlu1 %46 }
  0xfa   :  { %v149_v31 = vpop.eup %148  ;;  %v49_v32 = vmul.f32 0.032258064, %v47_v30 }
  0xfb   :  { %v51_v33 = vmul.f32 %v149_v31, %v48_v29 }
  0xfc   :  { %150 = vrsqrt.f32 %v49_v32  ;;  %vm69_vm4 = vcmp.eq.f32.partialorder %v49_v32, inf  ;;  %v72_v50 = vand.u32 2147483648, %v49_v32  ;;  %vm71_vm5 = vcmp.eq.f32.partialorder %v49_v32, 0.0 }
  0xfd   :  { %v52_v34 = vmul.f32 %v149_v31, %v51_v33 }
  0xff   :  { %v53_v35 = vmul.f32 0.5, %v52_v34 }
 0x101   :  { %v54_v36 = vsub.f32 1.5, %v53_v35 }
 0x102   :  { %v151_v37 = vpop.eup %150 }
 0x103   :  { %v63_v38 = vmul.f32 %v151_v37, %v49_v32  ;;  %v55_v39 = vmul.f32 %v149_v31, %v54_v36 }
 0x105   :  { %v56_v40 = vmul.f32 %v55_v39, %v48_v29  ;;  %v64_v41 = vmul.f32 %v151_v37, %v63_v38 }
 0x107   :  { %v58_v43 = vsel %vm57_vm2, %v48_v29, %v56_v40  ;;  %v65_v44 = vmul.f32 0.5, %v64_v41 }
 0x108   :  { %v61_v45 = vsel %vm59_vm3, %v60_v42, %v58_v43 }
 0x109   :  { %v74_v46 = vadd.f32 1e-06, %v61_v45  ;;  %v66_v47 = vsub.f32 1.5, %v65_v44 }
 0x10b   :  { %152 = vrcp.f32 %v74_v46  ;;  %v67_v48 = vmul.f32 %v151_v37, %v66_v47 }
 0x10d   :  { %v68_v49 = vmul.f32 %v67_v48, %v49_v32 }
 0x10f   :  { %v70_v51 = vsel %vm69_vm4, %v49_v32, %v68_v49 }
 0x110   :  { %v73_v53 = vsel %vm71_vm5, %v72_v50, %v70_v51 }
 0x111   :  { %v153_v54 = vpop.eup %152  ;;  %v75_v55 = vadd.f32 1e-06, %v73_v53 }
 0x112   :  { %v84_v56 = vmul.f32 %v153_v54, %v82_v15 }
 0x113   :  { %154 = vrcp.f32 %v75_v55 }
 0x114   :  { %v90_v57 = vadd.f32 %v144_v52, %v84_v56 }
 0x116   :  { %136 = vmatmul.msk.f32.vlgmr.msra.gmra.mxu0 %vm22_vm0, %v90_v57 }
 0x119   :  { %v155_v58 = vpop.eup %154 }
 0x11a   :  { %v85_v59 = vmul.f32 %v155_v58, %v83_v21 }
 0x11c   :  { %v91_v60 = vadd.f32 %v144_v52, %v85_v59 }
 0x11e   :  { %137 = vmatmul.msk.f32.vlgmr.msra.gmra.mxu1 %vm22_vm0, %v91_v60 }
 0x193   :  { %v123_v62 = vpop.f32.mrf.mxu0 }
 0x194   :  { %v124_v63 = vadd.f32 %v145_v61, %v123_v62 }
 0x196   :  { %130 = vst.msk [vmem:[%s231_s5] sm:$0xff] %vm129_vm6, %v124_v63 }
 0x19b   :  { %v126_v0 = vpop.f32.mrf.mxu1 }
 0x19c   :  { %v127_v1 = vadd.f32 %v145_v61, %v126_v0 }
 0x19e   :  { %131 = vst.msk [vmem:[%s231_s5 + $0x8] sm:$0xff] %vm129_vm6, %v127_v1 }

// kernel: tenc_forward.17
= control target key start
LH: loop header
LB: loop body
LE: loop exit
PB: predicated region body
PF: predicated region fallthrough
CT: control target
= control target key end

     0   :  { %vm22_vm0 = vcmask 261120   ;;  %v157_v4 = vmov 32.0   ;;  %s227_s0 = inlined_call_operand.vmem [shape: f32[16,32], index: 0, kind: input, shape index: {}]   ;;  %s228_s1 = inlined_call_operand.vmem [shape: f32[1,32], index: 1, kind: input, shape index: {}]   ;;  %s229_s2 = inlined_call_operand.vmem [shape: f32[1,32], index: 2, kind: input, shape index: {}]   ;;  %s230_s4 = inlined_call_operand.vmem [shape: f32[1,128], index: 4, kind: input, shape index: {}]   ;;  %s231_s3 = inlined_call_operand.vmem [shape: f32[32,128], index: 3, kind: input, shape index: {}]   ;;  %s232_s5 = inlined_call_operand.vmem [shape: f32[16,128], index: 5, kind: output, shape index: {}]  }
   0x1   :  { %v20_v0 = vld [vmem:[%s227_s0] sm:$0xff]  ;;  %v21_v2 = vld [vmem:[%s227_s0 + $0x8] sm:$0xff]  ;;  %147 = vrcp.f32 %v157_v4  ;;  %v95_v24 = vld [vmem:[%s231_s3 + $0x18] sm:$0xff] }
   0x2   :  { %v23_v1 = vsel %vm22_vm0, %v20_v0, 0.0  ;;  %v26_v3 = vsel %vm22_vm0, %v21_v2, 0.0  ;;  %v144_v12 = vld [vmem:[%s228_s1] ss:$0 sm:$0xff]  ;;  %v94_v25 = vld [vmem:[%s231_s3 + $0x10] sm:$0xff]  ;;  %118 = vmatpush.msra.mxu0 %v95_v24  ;;  %139 = vmatpush.msra.mxu1 %v95_v24  ;;  %v93_v26 = vld [vmem:[%s231_s3 + $0x8] sm:$0xff] }
   0x3   :  { %24 = vadd.xlane.f32.xlu0 %v23_v1  ;;  %v92_v27 = vld [vmem:[%s231_s3] sm:$0xff] }
   0x4   :  { %119 = vmatpush.msra.mxu0 %v94_v25  ;;  %140 = vmatpush.msra.mxu1 %v94_v25  ;;  %v145_v52 = vld [vmem:[%s229_s2] ss:$0 sm:$0xff] }
   0x5   :  { %v146_v61 = vld [vmem:[%s230_s4] ss:$0 sm:$0xff] }
   0x6   :  { %120 = vmatpush.msra.mxu0 %v93_v26  ;;  %141 = vmatpush.msra.mxu1 %v93_v26 }
   0x7   :  { %v148_v5 = vpop.eup %147 }
   0x8   :  { %v30_v6 = vmul.f32 32.0, %v148_v5  ;;  %vm34_vm1 = vweird.f32 %v148_v5  ;;  %121 = vmatpush.msra.mxu0 %v92_v27  ;;  %142 = vmatpush.msra.mxu1 %v92_v27 }
   0xa   :  { %v31_v7 = vsub.f32 1.0, %v30_v6 }
   0xb   :  { %27 = vadd.xlane.f32.xlu0 %v26_v3 }
   0xc   :  { %v32_v8 = vmul.f32 %v148_v5, %v31_v7 }
   0xe   :  { %v33_v9 = vadd.f32 %v148_v5, %v32_v8 }
  0x10   :  { %v35_v10 = vsel %vm34_vm1, %v148_v5, %v33_v9 }
  0x76   :  { %v25_v11 = vpop.xlane.xlu0 %24 }
  0x77   :  { %v36_v13 = vmul.f32 %v35_v10, %v25_v11 }
  0x79   :  { %v38_v14 = vsub.f32 %v20_v0, %v36_v13 }
  0x7b   :  { %v82_v15 = vmul.f32 %v144_v12, %v38_v14  ;;  %v40_v16 = vmul.f32 %v38_v14, %v38_v14 }
  0x7d   :  { %v42_v17 = vsel %vm22_vm0, %v40_v16, 0.0 }
  0x7e   :  { %43 = vadd.xlane.f32.xlu1 %v42_v17  ;;  %v28_v18 = vpop.xlane.xlu0 %27 }
  0x7f   :  { %v37_v19 = vmul.f32 %v35_v10, %v28_v18 }
  0x81   :  { %v39_v20 = vsub.f32 %v21_v2, %v37_v19 }
  0x83   :  { %v83_v21 = vmul.f32 %v144_v12, %v39_v20  ;;  %v41_v22 = vmul.f32 %v39_v20, %v39_v20 }
  0x85   :  { %v45_v23 = vsel %vm22_vm0, %v41_v22, 0.0 }
  0x86   :  { %46 = vadd.xlane.f32.xlu1 %v45_v23 }
  0xf1   :  { %v44_v28 = vpop.xlane.xlu1 %43 }
  0xf2   :  { %v48_v29 = vmul.f32 0.032258064, %v44_v28 }
  0xf4   :  { %149 = vrsqrt.f32 %v48_v29  ;;  %vm57_vm2 = vcmp.eq.f32.partialorder %v48_v29, inf  ;;  %v60_v42 = vand.u32 2147483648, %v48_v29  ;;  %vm59_vm3 = vcmp.eq.f32.partialorder %v48_v29, 0.0 }
  0xf9   :  { %v47_v30 = vpop.xlane.xlu1 %46 }
  0xfa   :  { %v150_v31 = vpop.eup %149  ;;  %v49_v32 = vmul.f32 0.032258064, %v47_v30 }
  0xfb   :  { %v51_v33 = vmul.f32 %v150_v31, %v48_v29 }
  0xfc   :  { %151 = vrsqrt.f32 %v49_v32  ;;  %vm69_vm4 = vcmp.eq.f32.partialorder %v49_v32, inf  ;;  %v72_v50 = vand.u32 2147483648, %v49_v32  ;;  %vm71_vm5 = vcmp.eq.f32.partialorder %v49_v32, 0.0 }
  0xfd   :  { %v52_v34 = vmul.f32 %v150_v31, %v51_v33 }
  0xff   :  { %v53_v35 = vmul.f32 0.5, %v52_v34 }
 0x101   :  { %v54_v36 = vsub.f32 1.5, %v53_v35 }
 0x102   :  { %v152_v37 = vpop.eup %151 }
 0x103   :  { %v63_v38 = vmul.f32 %v152_v37, %v49_v32  ;;  %v55_v39 = vmul.f32 %v150_v31, %v54_v36 }
 0x105   :  { %v56_v40 = vmul.f32 %v55_v39, %v48_v29  ;;  %v64_v41 = vmul.f32 %v152_v37, %v63_v38 }
 0x107   :  { %v58_v43 = vsel %vm57_vm2, %v48_v29, %v56_v40  ;;  %v65_v44 = vmul.f32 0.5, %v64_v41 }
 0x108   :  { %v61_v45 = vsel %vm59_vm3, %v60_v42, %v58_v43 }
 0x109   :  { %v74_v46 = vadd.f32 1e-06, %v61_v45  ;;  %v66_v47 = vsub.f32 1.5, %v65_v44 }
 0x10b   :  { %153 = vrcp.f32 %v74_v46  ;;  %v67_v48 = vmul.f32 %v152_v37, %v66_v47 }
 0x10d   :  { %v68_v49 = vmul.f32 %v67_v48, %v49_v32 }
 0x10f   :  { %v70_v51 = vsel %vm69_vm4, %v49_v32, %v68_v49 }
 0x110   :  { %v73_v53 = vsel %vm71_vm5, %v72_v50, %v70_v51 }
 0x111   :  { %v154_v54 = vpop.eup %153  ;;  %v75_v55 = vadd.f32 1e-06, %v73_v53 }
 0x112   :  { %v84_v56 = vmul.f32 %v154_v54, %v82_v15 }
 0x113   :  { %155 = vrcp.f32 %v75_v55 }
 0x114   :  { %v90_v57 = vadd.f32 %v145_v52, %v84_v56 }
 0x116   :  { %137 = vmatmul.msk.f32.vlgmr.msra.gmra.mxu0 %vm22_vm0, %v90_v57 }
 0x119   :  { %v156_v58 = vpop.eup %155 }
 0x11a   :  { %v85_v59 = vmul.f32 %v156_v58, %v83_v21 }
 0x11c   :  { %v91_v60 = vadd.f32 %v145_v52, %v85_v59 }
 0x11e   :  { %138 = vmatmul.msk.f32.vlgmr.msra.gmra.mxu1 %vm22_vm0, %v91_v60 }
 0x193   :  { %v123_v62 = vpop.f32.mrf.mxu0 }
 0x194   :  { %v124_v63 = vadd.f32 %v146_v61, %v123_v62 }
 0x196   :  { %v129_v0 = vmax.f32 %v124_v63, 0.0 }
 0x198   :  { %131 = vst [vmem:[%s232_s5] sm:$0xff] %v129_v0 }
 0x19b   :  { %v126_v1 = vpop.f32.mrf.mxu1 }
 0x19c   :  { %v127_v2 = vadd.f32 %v146_v61, %v126_v1 }
 0x19e   :  { %v130_v3 = vmax.f32 %v127_v2, 0.0 }
 0x1a0   :  { %132 = vst [vmem:[%s232_s5 + $0x8] sm:$0xff] %v130_v3 }

// kernel: tenc_forward.14
= control target key start
LH: loop header
LB: loop body
LE: loop exit
PB: predicated region body
PF: predicated region fallthrough
CT: control target
= control target key end

     0   :  { %vm21_vm0 = vcmask 261120   ;;  %v171_v2 = vmov 0.0   ;;  %vm34_vm1 = vcmask 392192   ;;  %v172_v19 = vmov 32.0   ;;  %s244_s1 = inlined_call_operand.vmem [shape: f32[48,32], index: 1, kind: input, shape index: {}]   ;;  %s245_s0 = inlined_call_operand.vmem [shape: f32[16,48], index: 0, kind: input, shape index: {}]   ;;  %s246_s2 = inlined_call_operand.vmem [shape: f32[1,32], index: 2, kind: input, shape index: {}]   ;;  %s247_s3 = inlined_call_operand.vmem [shape: f32[1,32], index: 3, kind: input, shape index: {}]   ;;  %s248_s4 = inlined_call_operand.vmem [shape: f32[16,32], index: 4, kind: output, shape index: {}]  }
   0x1   :  { %v33_v0 = vld [vmem:[%s244_s1 + $0x28] sm:$0xff]  ;;  %v32_v1 = vld [vmem:[%s244_s1 + $0x20] sm:$0xff]  ;;  %22 = vst.msk [vmem:[#allocation2] sm:$0xff] %vm21_vm0, %v171_v2  ;;  %v31_v3 = vld [vmem:[%s244_s1 + $0x18] sm:$0xff]  ;;  %161 = vrcp.f32 %v172_v19 }
   0x2   :  { %51 = vmatpush.msra.mxu0 %v33_v0  ;;  %151 = vmatpush.msra.mxu1 %v33_v0  ;;  %23 = vst.msk [vmem:[#allocation2 + $0x8] sm:$0xff] %vm21_vm0, %v171_v2  ;;  %v30_v4 = vld [vmem:[%s244_s1 + $0x10] sm:$0xff]  ;;  %v29_v5 = vld [vmem:[%s244_s1 + $0x8] sm:$0xff]  ;;  %v28_v6 = vld [vmem:[%s244_s1] sm:$0xff] }
   0x3   :  { %v26_v7 = vld [vmem:[%s245_s0] sm:$0xff]  ;;  %v27_v8 = vld [vmem:[%s245_s0 + $0x8] sm:$0xff] }
   0x4   :  { %52 = vmatpush.msra.mxu0 %v32_v1  ;;  %152 = vmatpush.msra.mxu1 %v32_v1  ;;  %v159_v57 = vld [vmem:[%s246_s2] ss:$0 sm:$0xff] }
   0x5   :  { %v160_v62 = vld [vmem:[%s247_s3] ss:$0 sm:$0xff] }
   0x6   :  { %53 = vmatpush.msra.mxu0 %v31_v3  ;;  %153 = vmatpush.msra.mxu1 %v31_v3 }
   0x7   :  { %v162_v20 = vpop.eup %161 }
   0x8   :  { %54 = vmatpush.msra.mxu0 %v30_v4  ;;  %154 = vmatpush.msra.mxu1 %v30_v4  ;;  %v24_v9 = vld [vmem:[#allocation2] sm:$0xff]  ;;  %v81_v21 = vmul.f32 32.0, %v162_v20  ;;  %vm85_vm2 = vweird.f32 %v162_v20 }
   0x9   :  { %v25_v10 = vld [vmem:[#allocation2 + $0x8] sm:$0xff] }
   0xa   :  { %55 = vmatpush.msra.mxu0 %v29_v5  ;;  %155 = vmatpush.msra.mxu1 %v29_v5  ;;  %v82_v22 = vsub.f32 1.0, %v81_v21 }
   0xc   :  { %56 = vmatpush.msra.mxu0 %v28_v6  ;;  %156 = vmatpush.msra.mxu1 %v28_v6  ;;  %v83_v23 = vmul.f32 %v162_v20, %v82_v22 }
   0xd   :  { %149 = vmatmul.msk.f32.vlgmr.msra.gmra.mxu0 %vm34_vm1, %v26_v7  ;;  %150 = vmatmul.msk.f32.vlgmr.msra.gmra.mxu1 %vm34_vm1, %v27_v8 }
   0xe   :  { %v84_v24 = vadd.f32 %v162_v20, %v83_v23 }
  0x10   :  { %v86_v25 = vsel %vm85_vm2, %v162_v20, %v84_v24 }
  0x8a   :  { %v58_v11 = vpop.f32.mrf.mxu0  ;;  %v61_v12 = vpop.f32.mrf.mxu1 }
  0x8b   :  { %v64_v13 = vadd.f32 %v58_v11, %v24_v9  ;;  %v65_v14 = vadd.f32 %v61_v12, %v25_v10 }
  0x8d   :  { %67 = vst.msk [vmem:[#allocation2] sm:$0xff] %vm21_vm0, %v64_v13 }
  0x8e   :  { %68 = vst.msk [vmem:[#allocation2 + $0x8] sm:$0xff] %vm21_vm0, %v65_v14 }
  0x94   :  { %v72_v15 = vld [vmem:[#allocation2] sm:$0xff] }
  0x95   :  { %v74_v16 = vsel %vm21_vm0, %v72_v15, 0.0  ;;  %v73_v17 = vld [vmem:[#allocation2 + $0x8] sm:$0xff] }
  0x96   :  { %75 = vadd.xlane.f32.xlu0 %v74_v16  ;;  %v77_v18 = vsel %vm21_vm0, %v73_v17, 0.0 }
  0x9e   :  { %78 = vadd.xlane.f32.xlu0 %v77_v18 }
 0x109   :  { %v76_v26 = vpop.xlane.xlu0 %75 }
 0x10a   :  { %v87_v27 = vmul.f32 %v86_v25, %v76_v26 }
 0x10c   :  { %v89_v28 = vsub.f32 %v72_v15, %v87_v27 }
 0x10e   :  { %v91_v29 = vmul.f32 %v89_v28, %v89_v28  ;;  %v133_v61 = vmul.f32 %v159_v57, %v89_v28 }
 0x110   :  { %v93_v30 = vsel %vm21_vm0, %v91_v29, 0.0 }
 0x111   :  { %94 = vadd.xlane.f32.xlu1 %v93_v30  ;;  %v79_v31 = vpop.xlane.xlu0 %78 }
 0x112   :  { %v88_v32 = vmul.f32 %v86_v25, %v79_v31 }
 0x114   :  { %v90_v33 = vsub.f32 %v73_v17, %v88_v32 }
 0x116   :  { %v92_v34 = vmul.f32 %v90_v33, %v90_v33  ;;  %v134_v4 = vmul.f32 %v159_v57, %v90_v33 }
 0x118   :  { %v96_v35 = vsel %vm21_vm0, %v92_v34, 0.0 }
 0x119   :  { %97 = vadd.xlane.f32.xlu1 %v96_v35 }
 0x184   :  { %v95_v36 = vpop.xlane.xlu1 %94 }
 0x185   :  { %v99_v37 = vmul.f32 0.032258064, %v95_v36 }
 0x187   :  { %163 = vrsqrt.f32 %v99_v37  ;;  %vm108_vm3 = vcmp.eq.f32.partialorder %v99_v37, inf  ;;  %v111_v50 = vand.u32 2147483648, %v99_v37  ;;  %vm110_vm4 = vcmp.eq.f32.partialorder %v99_v37, 0.0 }
 0x18c   :  { %v98_v38 = vpop.xlane.xlu1 %97 }
 0x18d   :  { %v164_v39 = vpop.eup %163  ;;  %v100_v40 = vmul.f32 0.032258064, %v98_v38 }
 0x18e   :  { %v102_v41 = vmul.f32 %v164_v39, %v99_v37 }
 0x18f   :  { %165 = vrsqrt.f32 %v100_v40  ;;  %vm120_vm5 = vcmp.eq.f32.partialorder %v100_v40, inf  ;;  %v123_v59 = vand.u32 2147483648, %v100_v40  ;;  %vm122_vm6 = vcmp.eq.f32.partialorder %v100_v40, 0.0 }
 0x190   :  { %v103_v42 = vmul.f32 %v164_v39, %v102_v41 }
 0x192   :  { %v104_v43 = vmul.f32 0.5, %v103_v42 }
 0x194   :  { %v105_v44 = vsub.f32 1.5, %v104_v43 }
 0x195   :  { %v166_v45 = vpop.eup %165 }
 0x196   :  { %v106_v46 = vmul.f32 %v164_v39, %v105_v44  ;;  %v114_v47 = vmul.f32 %v166_v45, %v100_v40 }
 0x198   :  { %v107_v48 = vmul.f32 %v106_v46, %v99_v37  ;;  %v115_v49 = vmul.f32 %v166_v45, %v114_v47 }
 0x19a   :  { %v109_v51 = vsel %vm108_vm3, %v99_v37, %v107_v48  ;;  %v116_v52 = vmul.f32 0.5, %v115_v49 }
 0x19b   :  { %v112_v53 = vsel %vm110_vm4, %v111_v50, %v109_v51 }
 0x19c   :  { %v125_v54 = vadd.f32 1e-06, %v112_v53  ;;  %v117_v55 = vsub.f32 1.5, %v116_v52 }
 0x19e   :  { %167 = vrcp.f32 %v125_v54  ;;  %v118_v56 = vmul.f32 %v166_v45, %v117_v55 }
 0x1a0   :  { %v119_v58 = vmul.f32 %v118_v56, %v100_v40 }
 0x1a2   :  { %v121_v60 = vsel %vm120_vm5, %v100_v40, %v119_v58 }
 0x1a3   :  { %v124_v63 = vsel %vm122_vm6, %v123_v59, %v121_v60 }
 0x1a4   :  { %v168_v0 = vpop.eup %167  ;;  %v126_v1 = vadd.f32 1e-06, %v124_v63 }
 0x1a5   :  { %v135_v2 = vmul.f32 %v168_v0, %v133_v61 }
 0x1a6   :  { %169 = vrcp.f32 %v126_v1 }
 0x1a7   :  { %v141_v3 = vadd.f32 %v160_v62, %v135_v2 }
 0x1a9   :  { %143 = vst.msk [vmem:[%s248_s4] sm:$0xff] %vm21_vm0, %v141_v3 }
 0x1ac   :  { %v170_v5 = vpop.eup %169 }
 0x1ad   :  { %v136_v6 = vmul.f32 %v170_v5, %v134_v4 }
 0x1af   :  { %v142_v7 = vadd.f32 %v160_v62, %v136_v6 }
 0x1b1   :  { %144 = vst.msk [vmem:[%s248_s4 + $0x8] sm:$0xff] %vm21_vm0, %v142_v7 }

// kernel: tenc_forward.16
= control target key start
LH: loop header
LB: loop body
LE: loop exit
PB: predicated region body
PF: predicated region fallthrough
CT: control target
= control target key end

     0   :  { %s1113_s18 = smov 0   ;;  %s1269_s0 = inlined_call_operand.vmem [shape: f32[2,8,96], index: 0, kind: input, shape index: {}]   ;;  %s1270_s1 = inlined_call_operand.vmem [shape: f32[2,1,8], index: 1, kind: input, shape index: {}]   ;;  %s1271_s2 = inlined_call_operand.vmem [shape: f32[32,32], index: 2, kind: input, shape index: {}]   ;;  %s1272_s3 = inlined_call_operand.vmem [shape: f32[1,32], index: 3, kind: input, shape index: {}]   ;;  %s1273_s4 = inlined_call_operand.vmem [shape: f32[2,8,32], index: 4, kind: input, shape index: {}]   ;;  %s1274_s5 = inlined_call_operand.vmem [shape: f32[2,8,32], index: 5, kind: output, shape index: {}]  }
   0x1 LB: > { %s937_s19 = sadd.s32 4294967295, %s1050_s18   ;;  %p941_p0 = scmp.ge.s32.totalorder %s1050_s18, 1  ;;  %s1050_s18 = sphi %s1113_s18, %s15_s18  }
   0x2   : > { %p203_p1 = scmp.lt.s32.totalorder %s1050_s18, 3 }
   0x4   : > { %p204_p2 = pnand %p941_p0, %p203_p1 }
   0x5   : > { %p236_p3 = scmp.lt.s32.totalorder (!%p204_p2), %s937_s19, 1  ;;  %s1052_s24 = smov (!%p204_p2), 96  }
   0x6   : > { %207 = sbr.rel (%p204_p2) target bundleno = 1299 (0x513), region = 40  ;;  %s1053_s25 = smov (!%p204_p2), 92  }
   0x7   : > { %s1054_s26 = smov (!%p204_p2), 124   ;;  %s1055_s27 = smov (!%p204_p2), 116  }
   0x8   : > { %s1056_s28 = smov (!%p204_p2), 64   ;;  %s1057_s29 = smov (!%p204_p2), 76  }
   0x9   : > { %s1058_s30 = smov (!%p204_p2), 88   ;;  %s1059_s6 = smov (!%p204_p2), 108  }
   0xa   : > { %s1060_s7 = smov (!%p204_p2), 84   ;;  %s1061_s8 = smov (!%p204_p2), 120  }
   0xb   : > { %s1278_s19 = smov (!%p236_p3, %s937_s19), 1  ;;  %vm257_vm0 = vcmask 31744   ;;  %s1062_s9 = smov 80   ;;  %v1066_v12 = vmov 0   ;;  %vm288_vm3 = vcmask 64512   ;;  %vm818_vm4 = vcmask 97280  }
   0xc   : > { %s1124_s20 = sshll.u32 %s1278_s19, 3  ;;  %s1063_s10 = smov 112   ;;  %vm820_vm5 = vcmask 130048   ;;  %vm822_vm6 = vcmask 162816   ;;  %vm824_vm7 = vcmask 195584   ;;  %vm826_vm8 = vcmask 228352  }
   0xd   : > { %s239_s23 = scalar_lea.vmem %s1269_s0, %s1124_s20  ;;  %s1064_s11 = smov 68   ;;  %vm836_vm9 = vcmask 261120  }
   0xe   : > { %v1130_v0 = vld [vmem:[%s239_s23] sm:$0xff]  ;;  %s1065_s12 = smov 100   ;;  %s242_s15 = scalar_lea.vmem %s1270_s1, %s1278_s19 }
   0xf   : > { %255 = vrot.lane.b32.xlu0 %v1130_v0, %s1052_s24  ;;  %328 = vrot.lane.b32.xlu1 %v1130_v0, %s1053_s25  ;;  %v1135_v1 = vmul.f32 0.5, %v1130_v0  ;;  %v252_v11 = vld [vmem:[%s242_s15] sm:$0x1]  ;;  %s1067_s16 = smov 72   ;;  %s1068_s17 = smov 104  }
  0x10   : > { %vm283_vm1 = vcmp.gt.f32.partialorder %v252_v11, 0.5  ;;  %s1069_s19 = smov 52   ;;  %s1070_s21 = smov 56  }
  0x11   : > { %326 = vrot.lane.b32.xlu2 %v1135_v1, %s1054_s26  ;;  %v284_v13 = vsel %vm283_vm1, 1, %v1066_v12  ;;  %s1071_s22 = smov 60   ;;  %s1072_s23 = smov 48  }
  0x12   : > { %v285_v14 = vperm.slane %v284_v13, 0  ;;  %s1073_s24 = smov 44   ;;  %s1074_s25 = smov 40  }
  0x13   : > { %s1075_s26 = smov 36  }
  0x14   : > { %vm1163_vm2 = vcmp.eq.s32.totalorder %v285_v14, 1 }
  0x17   : > { %458 = vrot.lane.b32.xlu1 %v1135_v1, %s1055_s27  ;;  %s1076_s27 = smov 12  }
  0x19   : > { %300 = vrot.lane.b32.xlu2 %v1130_v0, %s1056_s28  ;;  %s1077_s28 = smov 4  }
  0x1f   : > { %592 = vrot.lane.b32.xlu1 %v1130_v0, %s1057_s29  ;;  %s1078_s29 = smov 8  }
  0x21   : > { %394 = vrot.lane.b32.xlu2 %v1130_v0, %s1058_s30  ;;  %s1079_s30 = smov 20  }
  0x27   : > { %590 = vrot.lane.b32.xlu1 %v1135_v1, %s1059_s6  ;;  %s1080_s6 = smov 16  }
  0x29   : > { %460 = vrot.lane.b32.xlu2 %v1130_v0, %s1060_s7  ;;  %s1081_s7 = smov 24  }
  0x31   : > { %392 = vrot.lane.b32.xlu2 %v1135_v1, %s1061_s8  ;;  %s1082_s8 = smov 28  }
  0x39   : > { %526 = vrot.lane.b32.xlu2 %v1130_v0, %s1062_s9 }
  0x41   : > { %524 = vrot.lane.b32.xlu2 %v1135_v1, %s1063_s10 }
  0x49   : > { %724 = vrot.lane.b32.xlu2 %v1130_v0, %s1064_s11 }
  0x51   : > { %722 = vrot.lane.b32.xlu2 %v1135_v1, %s1065_s12 }
  0x6b   : > { %v327_v2 = vpop.permute.xlu2 %326 }
  0x73   : > { %v301_v3 = vpop.permute.xlu2 %300 }
  0x74   : > { %321 = vmatpush.msra.mxu1 %v301_v3 }
  0x7b   : > { %v395_v4 = vpop.permute.xlu2 %394 }
  0x7c   : > { %951 = vmatpush.xpose.msk.msrb.mxu1 %vm257_vm0, %v395_v4 }
  0x81   : > { %v256_v5 = vpop.permute.xlu0 %255  ;;  %v329_v6 = vpop.permute.xlu1 %328 }
  0x82   : > { %945 = vmatpush.xpose.msk.msra.mxu0 %vm257_vm0, %v256_v5  ;;  %948 = vmatpush.xpose.msk.msra.mxu2 %vm257_vm0, %v329_v6 }
  0x83   : > { %v461_v7 = vpop.permute.xlu2 %460 }
  0x85   : > { %946 = vmatmul.msk.f32.vlgmr.msra.gmra.mxu0 %vm257_vm0, %v1135_v1  ;;  %949 = vmatmul.msk.f32.vlgmr.msra.gmra.mxu2 %vm257_vm0, %v327_v2 }
  0x86   : > { %954 = vmatpush.xpose.msk.msrb.mxu0 %vm257_vm0, %v461_v7 }
  0x89   : > { %v459_v8 = vpop.permute.xlu1 %458 }
  0x8b   : > { %v393_v25 = vpop.permute.xlu2 %392 }
  0x8d   : > { %955 = vmatmul.msk.f32.vlgmr.msrb.gmra.mxu0 %vm257_vm0, %v459_v8 }
  0x91   : > { %v593_v9 = vpop.permute.xlu1 %592 }
  0x92   : > { %960 = vmatpush.xpose.msk.msra.mxu0 %vm257_vm0, %v593_v9 }
  0x93   : > { %v527_v26 = vpop.permute.xlu2 %526 }
  0x99   : > { %v591_v10 = vpop.permute.xlu1 %590 }
  0x9a   : > { %961 = vmatmul.msk.f32.vlgmr.msra.gmra.mxu0 %vm257_vm0, %v591_v10 }
  0x9b   : > { %v525_v27 = vpop.permute.xlu2 %524 }
  0xa3   : > { %v725_v28 = vpop.permute.xlu2 %724 }
  0xa4   : > { %966 = vmatpush.xpose.msk.msrb.mxu0 %vm257_vm0, %v725_v28 }
  0xab   : > { %v723_v29 = vpop.permute.xlu2 %722 }
  0xac   : > { %967 = vmatmul.msk.f32.vlgmr.msrb.gmra.mxu0 %vm257_vm0, %v723_v29 }
 0x102   : > { %v280_v16 = vpop.f32.mrf.mxu0 }
 0x103   : > { %v287_v17 = vsel %vm1163_vm2, -1e+09, %v280_v16 }
 0x104   : > { %v289_v18 = vsel %vm288_vm3, %v287_v17, -inf }
 0x105   : > { %290 = vmax.xlane.f32.xlu0 %v289_v18 }
 0x108   : > { %v351_v40 = vpop.f32.mrf.mxu2 }
 0x109   : > { %v354_v42 = vsel %vm1163_vm2, -1e+09, %v351_v40 }
 0x10a   : > { %v483_v19 = vpop.f32.mrf.mxu0  ;;  %v355_v43 = vsel %vm288_vm3, %v354_v42, -inf }
 0x10b   : > { %v486_v20 = vsel %vm1163_vm2, -1e+09, %v483_v19 }
 0x10c   : > { %v487_v21 = vsel %vm288_vm3, %v486_v20, -inf }
 0x10d   : > { %488 = vmax.xlane.f32.xlu2 %v487_v21 }
 0x117   : > { %v615_v22 = vpop.f32.mrf.mxu0 }
 0x118   : > { %v618_v23 = vsel %vm1163_vm2, -1e+09, %v615_v22 }
 0x119   : > { %658 = vrot.lane.b32.xlu0 %v1130_v0, %s1067_s16  ;;  %v619_v24 = vsel %vm288_vm3, %v618_v23, -inf }
 0x129   : > { %v747_v44 = vpop.f32.mrf.mxu0 }
 0x12a   : > { %v750_v45 = vsel %vm1163_vm2, -1e+09, %v747_v44 }
 0x12b   : > { %v751_v46 = vsel %vm288_vm3, %v750_v45, -inf }
 0x143   : > { %620 = vmax.xlane.f32.xlu0 %v619_v24 }
 0x178   : > { %v291_v30 = vpop.xlane.xlu0 %290 }
 0x179   : > { %v292_v31 = vsub.f32 %v287_v17, %v291_v30 }
 0x17b   : > { %v293_v32 = vmul.f32 1.442695, %v292_v31 }
 0x17d   : > { %1012 = vpow2.f32 %v293_v32 }
 0x180   : > { %v489_v56 = vpop.xlane.xlu2 %488 }
 0x181   : > { %v490_v58 = vsub.f32 %v486_v20, %v489_v56 }
 0x183   : > { %v1013_v33 = vpop.eup %1012  ;;  %v491_v59 = vmul.f32 1.442695, %v490_v58 }
 0x184   : > { %v295_v34 = vsel %vm288_vm3, %v1013_v33, 0.0 }
 0x185   : > { %296 = vadd.xlane.f32.xlu1 %v295_v34 }
 0x18b   : > { %v659_v35 = vpop.permute.xlu0 %658 }
 0x19e   : > { %656 = vrot.lane.b32.xlu1 %v1135_v1, %s1068_s17 }
 0x1b6   : > { %v621_v36 = vpop.xlane.xlu0 %620 }
 0x1b7   : > { %v622_v37 = vsub.f32 %v618_v23, %v621_v36 }
 0x1b9   : > { %v623_v38 = vmul.f32 1.442695, %v622_v37 }
 0x1bb   : > { %1014 = vpow2.f32 %v623_v38 }
 0x1c1   : > { %v1181_v39 = vpop.eup %1014 }
 0x1c2   : > { %v625_v41 = vsel %vm288_vm3, %v1181_v39, 0.0 }
 0x1c3   : > { %626 = vadd.xlane.f32.xlu2 %v625_v41 }
 0x1c8   : > { %356 = vmax.xlane.f32.xlu1 %v355_v43 }
 0x1d0   : > { %752 = vmax.xlane.f32.xlu1 %v751_v46 }
 0x1db   : > { %498 = vrot.lane.b32.xlu2 %v1130_v0, %s1069_s19 }
 0x1f8   : > { %v297_v47 = vpop.xlane.xlu1 %296 }
 0x1f9   : > { %1016 = vrcp.f32 %v297_v47 }
 0x1ff   : > { %v1017_v48 = vpop.eup %1016 }
 0x200   : > { %v299_v49 = vmul.f32 %v1017_v48, %v1013_v33 }
 0x202   : > { %947 = vmatmul.msk.f32.vlgmr.msra.gmra.mxu1 %vm288_vm3, %v299_v49 }
 0x203   : > { %957 = vmatpush.xpose.msk.msra.mxu1 %vm257_vm0, %v527_v26 }
 0x20a   : > { %952 = vmatmul.msk.f32.vlgmr.msrb.gmra.mxu1 %vm257_vm0, %v393_v25 }
 0x20b   : > { %963 = vmatpush.xpose.msk.msrb.mxu1 %vm257_vm0, %v659_v35 }
 0x210   : > { %v657_v50 = vpop.permute.xlu1 %656 }
 0x212   : > { %958 = vmatmul.msk.f32.vlgmr.msra.gmra.mxu1 %vm257_vm0, %v525_v27 }
 0x21a   : > { %964 = vmatmul.msk.f32.vlgmr.msrb.gmra.mxu1 %vm257_vm0, %v657_v50 }
 0x236   : > { %v1211_v5 = vpop.xlane.xlu2 %626 }
 0x23b   : > { %v357_v51 = vpop.xlane.xlu1 %356 }
 0x23c   : > { %v358_v52 = vsub.f32 %v354_v42, %v357_v51 }
 0x23e   : > { %v359_v53 = vmul.f32 1.442695, %v358_v52  ;;  %v499_v9 = vpop.permute.xlu2 %498 }
 0x23f   : > { %519 = vmatpush.msrb.mxu2 %v499_v9 }
 0x240   : > { %1018 = vpow2.f32 %v359_v53 }
 0x241   : > { %1020 = vpow2.f32 %v491_v59 }
 0x243   : > { %v753_v10 = vpop.xlane.xlu1 %752 }
 0x244   : > { %v754_v11 = vsub.f32 %v750_v45, %v753_v10 }
 0x246   : > { %v1198_v54 = vpop.eup %1018  ;;  %v755_v12 = vmul.f32 1.442695, %v754_v11 }
 0x247   : > { %v361_v55 = vsel %vm288_vm3, %v1198_v54, 0.0  ;;  %v1021_v63 = vpop.eup %1020 }
 0x248   : > { %362 = vadd.xlane.f32.xlu0 %v361_v55  ;;  %v493_v4 = vsel %vm288_vm3, %v1021_v63, 0.0  ;;  %1022 = vpow2.f32 %v755_v12 }
 0x24e   : > { %v1219_v13 = vpop.eup %1022 }
 0x24f   : > { %v757_v14 = vsel %vm288_vm3, %v1219_v13, 0.0 }
 0x27f   : > { %v1202_v57 = vpop.f32.mrf.mxu1 }
 0x287   : > { %v417_v60 = vpop.f32.mrf.mxu1 }
 0x288   : > { %v420_v61 = vsel %vm1163_vm2, -1e+09, %v417_v60 }
 0x289   : > { %v421_v62 = vsel %vm288_vm3, %v420_v61, -inf }
 0x28a   : > { %422 = vmax.xlane.f32.xlu0 %v421_v62 }
 0x28f   : > { %v549_v1 = vpop.f32.mrf.mxu1 }
 0x290   : > { %v552_v2 = vsel %vm1163_vm2, -1e+09, %v549_v1  ;;  %v830_v1 = vld [vmem:[%s1271_s2 + $0x10] sm:$0xff] }
 0x291   : > { %v553_v3 = vsel %vm288_vm3, %v552_v2, -inf }
 0x292   : > { %554 = vmax.xlane.f32.xlu1 %v553_v3  ;;  %494 = vadd.xlane.f32.xlu0 %v493_v4  ;;  %v828_v3 = vld [vmem:[%s1271_s2] sm:$0xff] }
 0x297   : > { %v681_v6 = vpop.f32.mrf.mxu1 }
 0x298   : > { %v684_v7 = vsel %vm1163_vm2, -1e+09, %v681_v6 }
 0x299   : > { %v685_v8 = vsel %vm288_vm3, %v684_v7, -inf }
 0x29a   : > { %686 = vmax.xlane.f32.xlu2 %v685_v8 }
 0x2a6   : > { %432 = vrot.lane.b32.xlu0 %v1130_v0, %s1070_s21  ;;  %s246_s21 = scalar_lea.vmem %s1273_s4, %s1124_s20 }
 0x2ab   : > { %366 = vrot.lane.b32.xlu1 %v1130_v0, %s1071_s22 }
 0x2ae   : > { %564 = vrot.lane.b32.xlu0 %v1130_v0, %s1072_s23 }
 0x2bb   : > { %v363_v15 = vpop.xlane.xlu0 %362 }
 0x2d8   : > { %758 = vadd.xlane.f32.xlu0 %v757_v14 }
 0x2fd   : > { %v423_v16 = vpop.xlane.xlu0 %422 }
 0x2fe   : > { %v424_v17 = vsub.f32 %v420_v61, %v423_v16 }
 0x300   : > { %v425_v18 = vmul.f32 1.442695, %v424_v17 }
 0x302   : > { %1024 = vpow2.f32 %v425_v18 }
 0x305   : > { %v555_v19 = vpop.xlane.xlu1 %554  ;;  %v495_v20 = vpop.xlane.xlu0 %494 }
 0x306   : > { %v556_v21 = vsub.f32 %v552_v2, %v555_v19  ;;  %1026 = vrcp.f32 %v495_v20  ;;  %v829_v2 = vld [vmem:[%s1271_s2 + $0x8] sm:$0xff]  ;;  %v860_v19 = vld [vmem:[%s246_s21] sm:$0xff] }
 0x308   : > { %v1025_v22 = vpop.eup %1024  ;;  %v557_v23 = vmul.f32 1.442695, %v556_v21 }
 0x309   : > { %v427_v24 = vsel %vm288_vm3, %v1025_v22, 0.0 }
 0x30a   : > { %1028 = vpow2.f32 %v557_v23  ;;  %428 = vadd.xlane.f32.xlu2 %v427_v24 }
 0x30c   : > { %v1027_v25 = vpop.eup %1026 }
 0x30d   : > { %v687_v26 = vpop.xlane.xlu2 %686  ;;  %v497_v27 = vmul.f32 %v1027_v25, %v1021_v63  ;;  %v831_v63 = vld [vmem:[%s1271_s2 + $0x18] sm:$0xff] }
 0x30e   : > { %v688_v28 = vsub.f32 %v684_v7, %v687_v26  ;;  %852 = vmatpush.msra.mxu1 %v831_v63 }
 0x30f   : > { %956 = vmatmul.msk.f32.vlgmr.msrb.gmra.mxu2 %vm288_vm3, %v497_v27 }
 0x310   : > { %v1029_v29 = vpop.eup %1028  ;;  %v689_v30 = vmul.f32 1.442695, %v688_v28  ;;  %853 = vmatpush.msra.mxu1 %v830_v1 }
 0x311   : > { %v559_v31 = vsel %vm288_vm3, %v1029_v29, 0.0 }
 0x312   : > { %1030 = vpow2.f32 %v689_v30  ;;  %560 = vadd.xlane.f32.xlu2 %v559_v31  ;;  %854 = vmatpush.msra.mxu1 %v829_v2 }
 0x313   : > { %1032 = vrcp.f32 %v363_v15 }
 0x314   : > { %855 = vmatpush.msra.mxu1 %v828_v3 }
 0x318   : > { %v1031_v32 = vpop.eup %1030  ;;  %v433_v33 = vpop.permute.xlu0 %432 }
 0x319   : > { %v691_v34 = vsel %vm288_vm3, %v1031_v32, 0.0  ;;  %v1033_v35 = vpop.eup %1032 }
 0x31a   : > { %692 = vadd.xlane.f32.xlu1 %v691_v34  ;;  %v365_v37 = vmul.f32 %v1033_v35, %v1198_v54 }
 0x31d   : > { %v367_v36 = vpop.permute.xlu1 %366 }
 0x31e   : > { %387 = vmatpush.msra.mxu3 %v367_v36 }
 0x31f   : > { %950 = vmatmul.msk.f32.vlgmr.msra.gmra.mxu3 %vm288_vm3, %v365_v37 }
 0x320   : > { %v565_v38 = vpop.permute.xlu0 %564  ;;  %453 = vmatpush.msrb.mxu3 %v433_v33 }
 0x322   : > { %585 = vmatpush.msra.mxu3 %v565_v38 }
 0x32a   : > { %630 = vrot.lane.b32.xlu2 %v1130_v0, %s1073_s24 }
 0x332   : > { %696 = vrot.lane.b32.xlu2 %v1130_v0, %s1074_s25 }
 0x33a   : > { %762 = vrot.lane.b32.xlu2 %v1130_v0, %s1075_s26  ;;  %s250_s26 = scalar_lea.vmem %s1274_s5, %s1124_s20 }
 0x34b   : > { %v759_v0 = vpop.xlane.xlu0 %758 }
 0x37d   : > { %v429_v40 = vpop.xlane.xlu2 %428 }
 0x37e   : > { %1034 = vrcp.f32 %v429_v40 }
 0x37f   : > { %1036 = vrcp.f32 %v1211_v5 }
 0x384   : > { %v1035_v41 = vpop.eup %1034 }
 0x385   : > { %v561_v42 = vpop.xlane.xlu2 %560  ;;  %v431_v43 = vmul.f32 %v1035_v41, %v1025_v22  ;;  %v1037_v44 = vpop.eup %1036 }
 0x386   : > { %1038 = vrcp.f32 %v561_v42  ;;  %v629_v46 = vmul.f32 %v1037_v44, %v1181_v39 }
 0x387   : > { %953 = vmatmul.msk.f32.vlgmr.msrb.gmra.mxu3 %vm288_vm3, %v431_v43 }
 0x38c   : > { %v1039_v45 = vpop.eup %1038 }
 0x38d   : > { %v563_v47 = vmul.f32 %v1039_v45, %v1029_v29  ;;  %v693_v48 = vpop.xlane.xlu1 %692  ;;  %v631_v49 = vpop.permute.xlu2 %630 }
 0x38e   : > { %1040 = vrcp.f32 %v693_v48  ;;  %651 = vmatpush.msra.mxu2 %v631_v49 }
 0x38f   : > { %959 = vmatmul.msk.f32.vlgmr.msra.gmra.mxu3 %vm288_vm3, %v563_v47  ;;  %962 = vmatmul.msk.f32.vlgmr.msra.gmra.mxu2 %vm288_vm3, %v629_v46  ;;  %1042 = vrcp.f32 %v759_v0 }
 0x392   : > { %v521_v50 = vpop.f32.mrf.mxu2 }
 0x393   : > { %797 = vrot.lane.b32.xlu2 %v521_v50, %s1076_s27 }
 0x394   : > { %v1041_v51 = vpop.eup %1040 }
 0x395   : > { %v695_v52 = vmul.f32 %v1041_v51, %v1031_v32  ;;  %v697_v53 = vpop.permute.xlu2 %696  ;;  %v1043_v39 = vpop.eup %1042 }
 0x396   : > { %717 = vmatpush.msrb.mxu3 %v697_v53  ;;  %v761_v54 = vmul.f32 %v1043_v39, %v1219_v13 }
 0x397   : > { %965 = vmatmul.msk.f32.vlgmr.msrb.gmra.mxu3 %vm288_vm3, %v695_v52 }
 0x39d   : > { %v763_v55 = vpop.permute.xlu2 %762 }
 0x39e   : > { %783 = vmatpush.msrb.mxu2 %v763_v55 }
 0x39f   : > { %968 = vmatmul.msk.f32.vlgmr.msrb.gmra.mxu2 %vm288_vm3, %v761_v54 }
 0x3a2   : > { %v389_v56 = vpop.f32.mrf.mxu3 }
 0x3a3   : > { %789 = vrot.lane.b32.xlu1 %v389_v56, %s1077_s28 }
 0x3ed   : > { %v798_v4 = vpop.permute.xlu2 %797 }
 0x40a   : > { %v455_v58 = vpop.f32.mrf.mxu3 }
 0x40b   : > { %793 = vrot.lane.b32.xlu2 %v455_v58, %s1078_s29 }
 0x412   : > { %v587_v59 = vpop.f32.mrf.mxu3  ;;  %v653_v60 = vpop.f32.mrf.mxu2 }
 0x413   : > { %805 = vrot.lane.b32.xlu2 %v653_v60, %s1079_s30  ;;  %801 = vrot.lane.b32.xlu0 %v587_v59, %s1080_s6 }
 0x415   : > { %v790_v6 = vpop.permute.xlu1 %789 }
 0x416   : > { %v816_v7 = vsel %vm257_vm0, %v1202_v57, %v790_v6  ;;  %v1011_v57 = vld [vmem:[%s1272_s3] ss:$0 sm:$0xff] }
 0x41a   : > { %v719_v61 = vpop.f32.mrf.mxu3 }
 0x41b   : > { %809 = vrot.lane.b32.xlu1 %v719_v61, %s1081_s7 }
 0x422   : > { %v785_v62 = vpop.f32.mrf.mxu2 }
 0x423   : > { %813 = vrot.lane.b32.xlu2 %v785_v62, %s1082_s8 }
 0x465   : > { %v794_v5 = vpop.permute.xlu2 %793 }
 0x466   : > { %v817_v8 = vsel %vm288_vm3, %v816_v7, %v794_v5 }
 0x467   : > { %v819_v11 = vsel %vm818_vm4, %v817_v8, %v798_v4 }
 0x46d   : > { %v806_v9 = vpop.permute.xlu2 %805 }
 0x47d   : > { %v814_v15 = vpop.permute.xlu2 %813 }
 0x485   : > { %v802_v10 = vpop.permute.xlu0 %801 }
 0x486   : > { %v821_v12 = vsel %vm820_vm5, %v819_v11, %v802_v10 }
 0x487   : > { %v823_v14 = vsel %vm822_vm6, %v821_v12, %v806_v9 }
 0x48d   : > { %v810_v13 = vpop.permute.xlu1 %809 }
 0x48e   : > { %v825_v16 = vsel %vm824_vm7, %v823_v14, %v810_v13 }
 0x48f   : > { %v827_v17 = vsel %vm826_vm8, %v825_v16, %v814_v15 }
 0x490   : > { %969 = vmatmul.msk.f32.vlgmr.msra.gmra.mxu1 %vm836_vm9, %v827_v17 }
 0x50d   : > { %v857_v18 = vpop.f32.mrf.mxu1 }
 0x50e   : > { %v858_v20 = vadd.f32 %v1011_v57, %v857_v18 }
 0x510   : > { %v861_v21 = vadd.f32 %v860_v19, %v858_v20 }
 0x512   : > { %862 = vst.msk [vmem:[%s250_s26] sm:$0xff] %vm836_vm9, %v861_v21 }
 0x513 PF: > { %s15_s18 = sadd.s32 1, %s1050_s18  }
 0x514   : > { %p12_p4 = scmp.ge.s32.totalorder %s15_s18, 4  }
 0x516   :  { %14 = sbr.rel (!%p12_p4) target bundleno = 1 (0x1), region = 76 }

// kernel: tenc_forward.19
= control target key start
LH: loop header
LB: loop body
LE: loop exit
PB: predicated region body
PF: predicated region fallthrough
CT: control target
= control target key end

     0   :  { %vm16_vm0 = vcmask 261120   ;;  %v105_v4 = vmov 32.0   ;;  %s150_s0 = inlined_call_operand.vmem [shape: f32[16,32], index: 0, kind: input, shape index: {}]   ;;  %s151_s1 = inlined_call_operand.vmem [shape: f32[1,32], index: 1, kind: input, shape index: {}]   ;;  %s152_s2 = inlined_call_operand.vmem [shape: f32[1,32], index: 2, kind: input, shape index: {}]   ;;  %s153_s3 = inlined_call_operand.vmem [shape: f32[16,32], index: 3, kind: output, shape index: {}]  }
   0x1   :  { %v14_v0 = vld [vmem:[%s150_s0] sm:$0xff]  ;;  %v15_v2 = vld [vmem:[%s150_s0 + $0x8] sm:$0xff]  ;;  %95 = vrcp.f32 %v105_v4 }
   0x2   :  { %v17_v1 = vsel %vm16_vm0, %v14_v0, 0.0  ;;  %v20_v3 = vsel %vm16_vm0, %v15_v2, 0.0  ;;  %v93_v12 = vld [vmem:[%s151_s1] ss:$0 sm:$0xff] }
   0x3   :  { %18 = vadd.xlane.f32.xlu0 %v17_v1  ;;  %v94_v48 = vld [vmem:[%s152_s2] ss:$0 sm:$0xff] }
   0x7   :  { %v96_v5 = vpop.eup %95 }
   0x8   :  { %v24_v6 = vmul.f32 32.0, %v96_v5  ;;  %vm28_vm1 = vweird.f32 %v96_v5 }
   0xa   :  { %v25_v7 = vsub.f32 1.0, %v24_v6 }
   0xb   :  { %21 = vadd.xlane.f32.xlu0 %v20_v3 }
   0xc   :  { %v26_v8 = vmul.f32 %v96_v5, %v25_v7 }
   0xe   :  { %v27_v9 = vadd.f32 %v96_v5, %v26_v8 }
  0x10   :  { %v29_v10 = vsel %vm28_vm1, %v96_v5, %v27_v9 }
  0x76   :  { %v19_v11 = vpop.xlane.xlu0 %18 }
  0x77   :  { %v30_v13 = vmul.f32 %v29_v10, %v19_v11 }
  0x79   :  { %v32_v14 = vsub.f32 %v14_v0, %v30_v13 }
  0x7b   :  { %v76_v15 = vmul.f32 %v93_v12, %v32_v14  ;;  %v34_v16 = vmul.f32 %v32_v14, %v32_v14 }
  0x7d   :  { %v36_v17 = vsel %vm16_vm0, %v34_v16, 0.0 }
  0x7e   :  { %37 = vadd.xlane.f32.xlu1 %v36_v17  ;;  %v22_v18 = vpop.xlane.xlu0 %21 }
  0x7f   :  { %v31_v19 = vmul.f32 %v29_v10, %v22_v18 }
  0x81   :  { %v33_v20 = vsub.f32 %v15_v2, %v31_v19 }
  0x83   :  { %v77_v21 = vmul.f32 %v93_v12, %v33_v20  ;;  %v35_v22 = vmul.f32 %v33_v20, %v33_v20 }
  0x85   :  { %v39_v23 = vsel %vm16_vm0, %v35_v22, 0.0 }
  0x86   :  { %40 = vadd.xlane.f32.xlu1 %v39_v23 }
  0xf1   :  { %v38_v24 = vpop.xlane.xlu1 %37 }
  0xf2   :  { %v42_v25 = vmul.f32 0.032258064, %v38_v24 }
  0xf4   :  { %97 = vrsqrt.f32 %v42_v25  ;;  %vm51_vm2 = vcmp.eq.f32.partialorder %v42_v25, inf  ;;  %v54_v38 = vand.u32 2147483648, %v42_v25  ;;  %vm53_vm3 = vcmp.eq.f32.partialorder %v42_v25, 0.0 }
  0xf9   :  { %v41_v26 = vpop.xlane.xlu1 %40 }
  0xfa   :  { %v98_v27 = vpop.eup %97  ;;  %v43_v28 = vmul.f32 0.032258064, %v41_v26 }
  0xfb   :  { %v45_v29 = vmul.f32 %v98_v27, %v42_v25 }
  0xfc   :  { %99 = vrsqrt.f32 %v43_v28  ;;  %vm63_vm4 = vcmp.eq.f32.partialorder %v43_v28, inf  ;;  %v66_v46 = vand.u32 2147483648, %v43_v28  ;;  %vm65_vm5 = vcmp.eq.f32.partialorder %v43_v28, 0.0 }
  0xfd   :  { %v46_v30 = vmul.f32 %v98_v27, %v45_v29 }
  0xff   :  { %v47_v31 = vmul.f32 0.5, %v46_v30 }
 0x101   :  { %v48_v32 = vsub.f32 1.5, %v47_v31 }
 0x102   :  { %v100_v33 = vpop.eup %99 }
 0x103   :  { %v49_v34 = vmul.f32 %v98_v27, %v48_v32  ;;  %v57_v35 = vmul.f32 %v100_v33, %v43_v28 }
 0x105   :  { %v50_v36 = vmul.f32 %v49_v34, %v42_v25  ;;  %v58_v37 = vmul.f32 %v100_v33, %v57_v35 }
 0x107   :  { %v52_v39 = vsel %vm51_vm2, %v42_v25, %v50_v36  ;;  %v59_v40 = vmul.f32 0.5, %v58_v37 }
 0x108   :  { %v55_v41 = vsel %vm53_vm3, %v54_v38, %v52_v39 }
 0x109   :  { %v68_v42 = vadd.f32 1e-06, %v55_v41  ;;  %v60_v43 = vsub.f32 1.5, %v59_v40 }
 0x10b   :  { %101 = vrcp.f32 %v68_v42  ;;  %v61_v44 = vmul.f32 %v100_v33, %v60_v43 }
 0x10d   :  { %v62_v45 = vmul.f32 %v61_v44, %v43_v28 }
 0x10f   :  { %v64_v47 = vsel %vm63_vm4, %v43_v28, %v62_v45 }
 0x110   :  { %v67_v49 = vsel %vm65_vm5, %v66_v46, %v64_v47 }
 0x111   :  { %v102_v50 = vpop.eup %101  ;;  %v69_v51 = vadd.f32 1e-06, %v67_v49 }
 0x112   :  { %v78_v52 = vmul.f32 %v102_v50, %v76_v15 }
 0x113   :  { %103 = vrcp.f32 %v69_v51 }
 0x114   :  { %v84_v53 = vadd.f32 %v94_v48, %v78_v52 }
 0x116   :  { %86 = vst.msk [vmem:[%s153_s3] sm:$0xff] %vm16_vm0, %v84_v53 }
 0x119   :  { %v104_v54 = vpop.eup %103 }
 0x11a   :  { %v79_v55 = vmul.f32 %v104_v54, %v77_v21 }
 0x11c   :  { %v85_v56 = vadd.f32 %v94_v48, %v79_v55 }
 0x11e   :  { %87 = vst.msk [vmem:[%s153_s3 + $0x8] sm:$0xff] %vm16_vm0, %v85_v56 }

// kernel: tenc_forward.23
= control target key start
LH: loop header
LB: loop body
LE: loop exit
PB: predicated region body
PF: predicated region fallthrough
CT: control target
= control target key end

     0   :  { %vm18_vm0 = vcmask 523264   ;;  %v89_v2 = vmov 0.0   ;;  %vm29_vm1 = vcmask 261120   ;;  %s143_s1 = inlined_call_operand.vmem [shape: f32[32,64], index: 1, kind: input, shape index: {}]   ;;  %s144_s2 = inlined_call_operand.vmem [shape: f32[1,64], index: 2, kind: input, shape index: {}]   ;;  %s145_s0 = inlined_call_operand.vmem [shape: f32[16,32], index: 0, kind: input, shape index: {}]   ;;  %s146_s3 = inlined_call_operand.vmem [shape: f32[16,64], index: 3, kind: output, shape index: {}]  }
   0x1   :  { %v28_v0 = vld [vmem:[%s143_s1 + $0x18] sm:$0xff]  ;;  %v27_v1 = vld [vmem:[%s143_s1 + $0x10] sm:$0xff]  ;;  %19 = vst.msk [vmem:[#allocation2] sm:$0xff] %vm18_vm0, %v89_v2  ;;  %v26_v3 = vld [vmem:[%s143_s1 + $0x8] sm:$0xff] }
   0x2   :  { %48 = vmatpush.msra.mxu0 %v28_v0  ;;  %83 = vmatpush.msra.mxu1 %v28_v0  ;;  %20 = vst.msk [vmem:[#allocation2 + $0x8] sm:$0xff] %vm18_vm0, %v89_v2  ;;  %v25_v4 = vld [vmem:[%s143_s1] sm:$0xff]  ;;  %v24_v6 = vld [vmem:[%s145_s0 + $0x8] sm:$0xff] }
   0x3   :  { %v23_v5 = vld [vmem:[%s145_s0] sm:$0xff] }
   0x4   :  { %49 = vmatpush.msra.mxu0 %v27_v1  ;;  %84 = vmatpush.msra.mxu1 %v27_v1  ;;  %v88_v13 = vld [vmem:[%s144_s2] ss:$0 sm:$0xff] }
   0x6   :  { %50 = vmatpush.msra.mxu0 %v26_v3  ;;  %85 = vmatpush.msra.mxu1 %v26_v3 }
   0x8   :  { %51 = vmatpush.msra.mxu0 %v25_v4  ;;  %86 = vmatpush.msra.mxu1 %v25_v4  ;;  %v21_v7 = vld [vmem:[#allocation2] sm:$0xff] }
   0x9   :  { %81 = vmatmul.msk.f32.vlgmr.msra.gmra.mxu0 %vm29_vm1, %v23_v5  ;;  %82 = vmatmul.msk.f32.vlgmr.msra.gmra.mxu1 %vm29_vm1, %v24_v6  ;;  %v22_v8 = vld [vmem:[#allocation2 + $0x8] sm:$0xff] }
  0x86   :  { %v53_v9 = vpop.f32.mrf.mxu0  ;;  %v56_v10 = vpop.f32.mrf.mxu1 }
  0x87   :  { %v59_v11 = vadd.f32 %v53_v9, %v21_v7  ;;  %v60_v12 = vadd.f32 %v56_v10, %v22_v8 }
  0x89   :  { %62 = vst.msk [vmem:[#allocation2] sm:$0xff] %vm18_vm0, %v59_v11 }
  0x8a   :  { %63 = vst.msk [vmem:[#allocation2 + $0x8] sm:$0xff] %vm18_vm0, %v60_v12 }
  0x90   :  { %v67_v14 = vld [vmem:[#allocation2] sm:$0xff] }
  0x91   :  { %v73_v15 = vadd.f32 %v88_v13, %v67_v14  ;;  %v68_v16 = vld [vmem:[#allocation2 + $0x8] sm:$0xff] }
  0x92   :  { %v74_v17 = vadd.f32 %v88_v13, %v68_v16 }
  0x93   :  { %75 = vst.msk [vmem:[%s146_s3] sm:$0xff] %vm18_vm0, %v73_v15 }
  0x94   :  { %76 = vst.msk [vmem:[%s146_s3 + $0x8] sm:$0xff] %vm18_vm0, %v74_v17 }

// kernel: tenc_forward.18
= control target key start
LH: loop header
LB: loop body
LE: loop exit
PB: predicated region body
PF: predicated region fallthrough
CT: control target
= control target key end

     0   :  { %vm21_vm0 = vcmask 261120   ;;  %v111_v2 = vmov 0.0   ;;  %s212_s1 = inlined_call_operand.vmem [shape: f32[128,32], index: 1, kind: input, shape index: {}]   ;;  %s213_s2 = inlined_call_operand.vmem [shape: f32[1,32], index: 2, kind: input, shape index: {}]   ;;  %s214_s0 = inlined_call_operand.vmem [shape: f32[16,128], index: 0, kind: input, shape index: {}]   ;;  %s215_s3 = inlined_call_operand.vmem [shape: f32[16,32], index: 3, kind: input, shape index: {}]   ;;  %s216_s4 = inlined_call_operand.vmem [shape: f32[16,32], index: 4, kind: output, shape index: {}]  }
   0x1   :  { %v43_v0 = vld [vmem:[%s212_s1 + $0x78] sm:$0xff]  ;;  %v42_v1 = vld [vmem:[%s212_s1 + $0x70] sm:$0xff]  ;;  %22 = vst.msk [vmem:[#allocation2] sm:$0xff] %vm21_vm0, %v111_v2  ;;  %v41_v3 = vld [vmem:[%s212_s1 + $0x68] sm:$0xff] }
   0x2   :  { %44 = vmatpush.msra.mxu0 %v43_v0  ;;  %93 = vmatpush.msra.mxu1 %v43_v0  ;;  %23 = vst.msk [vmem:[#allocation2 + $0x8] sm:$0xff] %vm21_vm0, %v111_v2  ;;  %v40_v4 = vld [vmem:[%s212_s1 + $0x60] sm:$0xff]  ;;  %v39_v5 = vld [vmem:[%s212_s1 + $0x58] sm:$0xff]  ;;  %v38_v6 = vld [vmem:[%s212_s1 + $0x50] sm:$0xff] }
   0x3   :  { %v37_v7 = vld [vmem:[%s212_s1 + $0x48] sm:$0xff]  ;;  %v36_v8 = vld [vmem:[%s212_s1 + $0x40] sm:$0xff]  ;;  %v35_v9 = vld [vmem:[%s212_s1 + $0x38] sm:$0xff] }
   0x4   :  { %45 = vmatpush.msra.mxu0 %v42_v1  ;;  %94 = vmatpush.msra.mxu1 %v42_v1  ;;  %v34_v10 = vld [vmem:[%s212_s1 + $0x30] sm:$0xff]  ;;  %v33_v11 = vld [vmem:[%s212_s1 + $0x28] sm:$0xff]  ;;  %v32_v12 = vld [vmem:[%s212_s1 + $0x20] sm:$0xff] }
   0x5   :  { %v31_v13 = vld [vmem:[%s212_s1 + $0x18] sm:$0xff]  ;;  %v30_v14 = vld [vmem:[%s212_s1 + $0x10] sm:$0xff]  ;;  %v29_v15 = vld [vmem:[%s212_s1 + $0x8] sm:$0xff] }
   0x6   :  { %46 = vmatpush.msra.mxu0 %v41_v3  ;;  %95 = vmatpush.msra.mxu1 %v41_v3  ;;  %v28_v16 = vld [vmem:[%s212_s1] sm:$0xff]  ;;  %v27_v18 = vld [vmem:[%s214_s0 + $0x8] sm:$0xff] }
   0x7   :  { %v26_v17 = vld [vmem:[%s214_s0] sm:$0xff]  ;;  %v84_v29 = vld [vmem:[%s215_s3 + $0x8] sm:$0xff] }
   0x8   :  { %47 = vmatpush.msra.mxu0 %v40_v4  ;;  %96 = vmatpush.msra.mxu1 %v40_v4  ;;  %v24_v19 = vld [vmem:[#allocation2] sm:$0xff] }
   0x9   :  { %v25_v20 = vld [vmem:[#allocation2 + $0x8] sm:$0xff]  ;;  %v110_v25 = vld [vmem:[%s213_s2] ss:$0 sm:$0xff] }
   0xa   :  { %48 = vmatpush.msra.mxu0 %v39_v5  ;;  %97 = vmatpush.msra.mxu1 %v39_v5  ;;  %v83_v27 = vld [vmem:[%s215_s3] sm:$0xff] }
   0xc   :  { %49 = vmatpush.msra.mxu0 %v38_v6  ;;  %98 = vmatpush.msra.mxu1 %v38_v6 }
   0xe   :  { %50 = vmatpush.msra.mxu0 %v37_v7  ;;  %99 = vmatpush.msra.mxu1 %v37_v7 }
  0x10   :  { %51 = vmatpush.msra.mxu0 %v36_v8  ;;  %100 = vmatpush.msra.mxu1 %v36_v8 }
  0x12   :  { %52 = vmatpush.msra.mxu0 %v35_v9  ;;  %101 = vmatpush.msra.mxu1 %v35_v9 }
  0x14   :  { %53 = vmatpush.msra.mxu0 %v34_v10  ;;  %102 = vmatpush.msra.mxu1 %v34_v10 }
  0x16   :  { %54 = vmatpush.msra.mxu0 %v33_v11  ;;  %103 = vmatpush.msra.mxu1 %v33_v11 }
  0x18   :  { %55 = vmatpush.msra.mxu0 %v32_v12  ;;  %104 = vmatpush.msra.mxu1 %v32_v12 }
  0x1a   :  { %56 = vmatpush.msra.mxu0 %v31_v13  ;;  %105 = vmatpush.msra.mxu1 %v31_v13 }
  0x1c   :  { %57 = vmatpush.msra.mxu0 %v30_v14  ;;  %106 = vmatpush.msra.mxu1 %v30_v14 }
  0x1e   :  { %58 = vmatpush.msra.mxu0 %v29_v15  ;;  %107 = vmatpush.msra.mxu1 %v29_v15 }
  0x20   :  { %59 = vmatpush.msra.mxu0 %v28_v16  ;;  %108 = vmatpush.msra.mxu1 %v28_v16 }
  0x21   :  { %60 = vmatmul.f32.vlgmr.msra.gmra.mxu0 %v26_v17  ;;  %63 = vmatmul.f32.vlgmr.msra.gmra.mxu1 %v27_v18 }
  0x9e   :  { %v61_v21 = vpop.f32.mrf.mxu0  ;;  %v64_v22 = vpop.f32.mrf.mxu1 }
  0x9f   :  { %v67_v23 = vadd.f32 %v61_v21, %v24_v19  ;;  %v68_v24 = vadd.f32 %v64_v22, %v25_v20 }
  0xa1   :  { %70 = vst.msk [vmem:[#allocation2] sm:$0xff] %vm21_vm0, %v67_v23 }
  0xa2   :  { %71 = vst.msk [vmem:[#allocation2 + $0x8] sm:$0xff] %vm21_vm0, %v68_v24 }
  0xa8   :  { %v75_v26 = vld [vmem:[#allocation2] sm:$0xff] }
  0xa9   :  { %v81_v28 = vadd.f32 %v110_v25, %v75_v26  ;;  %v76_v30 = vld [vmem:[#allocation2 + $0x8] sm:$0xff] }
  0xaa   :  { %v82_v31 = vadd.f32 %v110_v25, %v76_v30 }
  0xab   :  { %v85_v32 = vadd.f32 %v83_v27, %v81_v28 }
  0xac   :  { %v86_v33 = vadd.f32 %v84_v29, %v82_v31 }
  0xad   :  { %87 = vst.msk [vmem:[%s216_s4] sm:$0xff] %vm21_vm0, %v85_v32 }
  0xae   :  { %88 = vst.msk [vmem:[%s216_s4 + $0x8] sm:$0xff] %vm21_vm0, %v86_v33 }

// kernel: tenc_forward.22
= control target key start
LH: loop header
LB: loop body
LE: loop exit
PB: predicated region body
PF: predicated region fallthrough
CT: control target
= control target key end

     0   :  { %vm22_vm0 = vcmask 261120   ;;  %v155_v4 = vmov 32.0   ;;  %s227_s0 = inlined_call_operand.vmem [shape: f32[16,32], index: 0, kind: input, shape index: {}]   ;;  %s228_s1 = inlined_call_operand.vmem [shape: f32[1,32], index: 1, kind: input, shape index: {}]   ;;  %s229_s2 = inlined_call_operand.vmem [shape: f32[1,32], index: 2, kind: input, shape index: {}]   ;;  %s230_s4 = inlined_call_operand.vmem [shape: f32[1,32], index: 4, kind: input, shape index: {}]   ;;  %s231_s3 = inlined_call_operand.vmem [shape: f32[32,32], index: 3, kind: input, shape index: {}]   ;;  %s232_s5 = inlined_call_operand.vmem [shape: f32[16,32], index: 5, kind: output, shape index: {}]  }
   0x1   :  { %v20_v0 = vld [vmem:[%s227_s0] sm:$0xff]  ;;  %v21_v2 = vld [vmem:[%s227_s0 + $0x8] sm:$0xff]  ;;  %145 = vrcp.f32 %v155_v4  ;;  %v95_v24 = vld [vmem:[%s231_s3 + $0x18] sm:$0xff] }
   0x2   :  { %v23_v1 = vsel %vm22_vm0, %v20_v0, 0.0  ;;  %v26_v3 = vsel %vm22_vm0, %v21_v2, 0.0  ;;  %v142_v12 = vld [vmem:[%s228_s1] ss:$0 sm:$0xff]  ;;  %v94_v25 = vld [vmem:[%s231_s3 + $0x10] sm:$0xff]  ;;  %118 = vmatpush.msra.mxu0 %v95_v24  ;;  %137 = vmatpush.msra.mxu1 %v95_v24  ;;  %v93_v26 = vld [vmem:[%s231_s3 + $0x8] sm:$0xff] }
   0x3   :  { %24 = vadd.xlane.f32.xlu0 %v23_v1  ;;  %v92_v27 = vld [vmem:[%s231_s3] sm:$0xff] }
   0x4   :  { %119 = vmatpush.msra.mxu0 %v94_v25  ;;  %138 = vmatpush.msra.mxu1 %v94_v25  ;;  %v143_v52 = vld [vmem:[%s229_s2] ss:$0 sm:$0xff] }
   0x5   :  { %v144_v61 = vld [vmem:[%s230_s4] ss:$0 sm:$0xff] }
   0x6   :  { %120 = vmatpush.msra.mxu0 %v93_v26  ;;  %139 = vmatpush.msra.mxu1 %v93_v26 }
   0x7   :  { %v146_v5 = vpop.eup %145 }
   0x8   :  { %v30_v6 = vmul.f32 32.0, %v146_v5  ;;  %vm34_vm1 = vweird.f32 %v146_v5  ;;  %121 = vmatpush.msra.mxu0 %v92_v27  ;;  %140 = vmatpush.msra.mxu1 %v92_v27 }
   0xa   :  { %v31_v7 = vsub.f32 1.0, %v30_v6 }
   0xb   :  { %27 = vadd.xlane.f32.xlu0 %v26_v3 }
   0xc   :  { %v32_v8 = vmul.f32 %v146_v5, %v31_v7 }
   0xe   :  { %v33_v9 = vadd.f32 %v146_v5, %v32_v8 }
  0x10   :  { %v35_v10 = vsel %vm34_vm1, %v146_v5, %v33_v9 }
  0x76   :  { %v25_v11 = vpop.xlane.xlu0 %24 }
  0x77   :  { %v36_v13 = vmul.f32 %v35_v10, %v25_v11 }
  0x79   :  { %v38_v14 = vsub.f32 %v20_v0, %v36_v13 }
  0x7b   :  { %v82_v15 = vmul.f32 %v142_v12, %v38_v14  ;;  %v40_v16 = vmul.f32 %v38_v14, %v38_v14 }
  0x7d   :  { %v42_v17 = vsel %vm22_vm0, %v40_v16, 0.0 }
  0x7e   :  { %43 = vadd.xlane.f32.xlu1 %v42_v17  ;;  %v28_v18 = vpop.xlane.xlu0 %27 }
  0x7f   :  { %v37_v19 = vmul.f32 %v35_v10, %v28_v18 }
  0x81   :  { %v39_v20 = vsub.f32 %v21_v2, %v37_v19 }
  0x83   :  { %v83_v21 = vmul.f32 %v142_v12, %v39_v20  ;;  %v41_v22 = vmul.f32 %v39_v20, %v39_v20 }
  0x85   :  { %v45_v23 = vsel %vm22_vm0, %v41_v22, 0.0 }
  0x86   :  { %46 = vadd.xlane.f32.xlu1 %v45_v23 }
  0xf1   :  { %v44_v28 = vpop.xlane.xlu1 %43 }
  0xf2   :  { %v48_v29 = vmul.f32 0.032258064, %v44_v28 }
  0xf4   :  { %147 = vrsqrt.f32 %v48_v29  ;;  %vm57_vm2 = vcmp.eq.f32.partialorder %v48_v29, inf  ;;  %v60_v42 = vand.u32 2147483648, %v48_v29  ;;  %vm59_vm3 = vcmp.eq.f32.partialorder %v48_v29, 0.0 }
  0xf9   :  { %v47_v30 = vpop.xlane.xlu1 %46 }
  0xfa   :  { %v148_v31 = vpop.eup %147  ;;  %v49_v32 = vmul.f32 0.032258064, %v47_v30 }
  0xfb   :  { %v51_v33 = vmul.f32 %v148_v31, %v48_v29 }
  0xfc   :  { %149 = vrsqrt.f32 %v49_v32  ;;  %vm69_vm4 = vcmp.eq.f32.partialorder %v49_v32, inf  ;;  %v72_v50 = vand.u32 2147483648, %v49_v32  ;;  %vm71_vm5 = vcmp.eq.f32.partialorder %v49_v32, 0.0 }
  0xfd   :  { %v52_v34 = vmul.f32 %v148_v31, %v51_v33 }
  0xff   :  { %v53_v35 = vmul.f32 0.5, %v52_v34 }
 0x101   :  { %v54_v36 = vsub.f32 1.5, %v53_v35 }
 0x102   :  { %v150_v37 = vpop.eup %149 }
 0x103   :  { %v63_v38 = vmul.f32 %v150_v37, %v49_v32  ;;  %v55_v39 = vmul.f32 %v148_v31, %v54_v36 }
 0x105   :  { %v56_v40 = vmul.f32 %v55_v39, %v48_v29  ;;  %v64_v41 = vmul.f32 %v150_v37, %v63_v38 }
 0x107   :  { %v58_v43 = vsel %vm57_vm2, %v48_v29, %v56_v40  ;;  %v65_v44 = vmul.f32 0.5, %v64_v41 }
 0x108   :  { %v61_v45 = vsel %vm59_vm3, %v60_v42, %v58_v43 }
 0x109   :  { %v74_v46 = vadd.f32 1e-06, %v61_v45  ;;  %v66_v47 = vsub.f32 1.5, %v65_v44 }
 0x10b   :  { %151 = vrcp.f32 %v74_v46  ;;  %v67_v48 = vmul.f32 %v150_v37, %v66_v47 }
 0x10d   :  { %v68_v49 = vmul.f32 %v67_v48, %v49_v32 }
 0x10f   :  { %v70_v51 = vsel %vm69_vm4, %v49_v32, %v68_v49 }
 0x110   :  { %v73_v53 = vsel %vm71_vm5, %v72_v50, %v70_v51 }
 0x111   :  { %v152_v54 = vpop.eup %151  ;;  %v75_v55 = vadd.f32 1e-06, %v73_v53 }
 0x112   :  { %v84_v56 = vmul.f32 %v152_v54, %v82_v15 }
 0x113   :  { %153 = vrcp.f32 %v75_v55 }
 0x114   :  { %v90_v57 = vadd.f32 %v143_v52, %v84_v56 }
 0x116   :  { %135 = vmatmul.msk.f32.vlgmr.msra.gmra.mxu0 %vm22_vm0, %v90_v57 }
 0x119   :  { %v154_v58 = vpop.eup %153 }
 0x11a   :  { %v85_v59 = vmul.f32 %v154_v58, %v83_v21 }
 0x11c   :  { %v91_v60 = vadd.f32 %v143_v52, %v85_v59 }
 0x11e   :  { %136 = vmatmul.msk.f32.vlgmr.msra.gmra.mxu1 %vm22_vm0, %v91_v60 }
 0x193   :  { %v123_v62 = vpop.f32.mrf.mxu0 }
 0x194   :  { %v124_v63 = vadd.f32 %v144_v61, %v123_v62 }
 0x196   :  { %129 = vst.msk [vmem:[%s232_s5] sm:$0xff] %vm22_vm0, %v124_v63 }
 0x19b   :  { %v126_v0 = vpop.f32.mrf.mxu1 }
 0x19c   :  { %v127_v1 = vadd.f32 %v144_v61, %v126_v0 }
 0x19e   :  { %130 = vst.msk [vmem:[%s232_s5 + $0x8] sm:$0xff] %vm22_vm0, %v127_v1 }

// kernel: tenc_forward.27
= control target key start
LH: loop header
LB: loop body
LE: loop exit
PB: predicated region body
PF: predicated region fallthrough
CT: control target
= control target key end

     0   :  { %vm29_vm0 = vcmask 261120   ;;  %s289_s0 = inlined_call_operand.vmem [shape: f32[2,8,32], index: 0, kind: input, shape index: {}]   ;;  %s290_s1 = inlined_call_operand.vmem [shape: f32[1,32], index: 1, kind: input, shape index: {}]   ;;  %s291_s2 = inlined_call_operand.vmem [shape: f32[1,32], index: 2, kind: input, shape index: {}]   ;;  %s292_s3 = inlined_call_operand.vmem [shape: f32[32,128], index: 3, kind: input, shape index: {}]   ;;  %s293_s4 = inlined_call_operand.vmem [shape: f32[1,128], index: 4, kind: input, shape index: {}]   ;;  %s294_s5 = inlined_call_operand.hbm [shape: f32[2,128], index: 5, kind: output, shape index: {}]  }
   0x1   :  { %v27_v0 = vld [vmem:[%s289_s0] sm:$0xff] }
   0x2   :  { %v30_v1 = vsel %vm29_vm0, %v27_v0, 0.0 }
   0x3   :  { %31 = vadd.xlane.f32.xlu0 %v30_v1 }
   0x4   :  { %10 = vsyncpa [#allocation4], 0  ;;  %v28_v2 = vld [vmem:[%s289_s0 + $0x8] sm:$0xff]  ;;  %v217_v4 = vmov 32.0   ;;  %vm25_vm2 = vcmask 254976   ;;  %v218_v33 = vmov -inf  }
   0x5   :  { %v33_v3 = vsel %vm29_vm0, %v28_v2, 0.0  ;;  %181 = vrcp.f32 %v217_v4  ;;  %26 = vst.msk [vmem:[#allocation2] sm:$0x3] %vm25_vm2, %v218_v33  ;;  %v129_v42 = vld [vmem:[%s292_s3 + $0x18] sm:$0xff]  ;;  %v128_v43 = vld [vmem:[%s292_s3 + $0x10] sm:$0xff]  ;;  %v127_v45 = vld [vmem:[%s292_s3 + $0x8] sm:$0xff] }
   0x6   :  { %149 = vmatpush.msra.mxu0 %v129_v42  ;;  %v178_v46 = vld [vmem:[%s290_s1] ss:$0 sm:$0xff]  ;;  %vm116_vm7 = vcmask 1041409   ;;  %s165_s11 = sshll.u32 %s294_s5, 4  ;;  %s166_s11 = int_to_ptr.hbm [resolvable:$true] %s165_s11 }
   0x7   :  { %v126_v48 = vld [vmem:[%s292_s3] sm:$0xff]  ;;  %s219_s3 = smov [#allocation3]  }
   0x8   :  { %150 = vmatpush.msra.mxu0 %v128_v43  ;;  %v179_v52 = vld [vmem:[%s291_s2] ss:$0 sm:$0xff]  ;;  %s163_s8 = sshll.u32 %s219_s3, 4  ;;  %s164_s8 = int_to_ptr.vmem [resolvable:$true] %s163_s8 }
   0xa   :  { %151 = vmatpush.msra.mxu0 %v127_v45 }
   0xb   :  { %34 = vadd.xlane.f32.xlu0 %v33_v3  ;;  %v182_v5 = vpop.eup %181 }
   0xc   :  { %v37_v6 = vmul.f32 32.0, %v182_v5  ;;  %vm41_vm1 = vweird.f32 %v182_v5  ;;  %152 = vmatpush.msra.mxu0 %v126_v48 }
   0xe   :  { %v38_v7 = vsub.f32 1.0, %v37_v6 }
  0x10   :  { %v39_v8 = vmul.f32 %v182_v5, %v38_v7 }
  0x12   :  { %v40_v9 = vadd.f32 %v182_v5, %v39_v8 }
  0x14   :  { %v42_v10 = vsel %vm41_vm1, %v182_v5, %v40_v9 }
  0x76   :  { %v32_v11 = vpop.xlane.xlu0 %31 }
  0x77   :  { %v43_v12 = vmul.f32 %v42_v10, %v32_v11 }
  0x79   :  { %v45_v13 = vsub.f32 %v27_v0, %v43_v12  ;;  %v99_v12 = vld [vmem:[#allocation2] sm:$0x3] }
  0x7b   :  { %v47_v14 = vmul.f32 %v45_v13, %v45_v13  ;;  %v89_v51 = vmul.f32 %v178_v46, %v45_v13 }
  0x7d   :  { %v49_v15 = vsel %vm29_vm0, %v47_v14, 0.0 }
  0x7e   :  { %50 = vadd.xlane.f32.xlu1 %v49_v15  ;;  %v35_v16 = vpop.xlane.xlu0 %34 }
  0x7f   :  { %v44_v17 = vmul.f32 %v42_v10, %v35_v16  ;;  %v180_v16 = vld [vmem:[%s293_s4] ss:$0 sm:$0xff] }
  0x81   :  { %v46_v18 = vsub.f32 %v28_v2, %v44_v17 }
  0x83   :  { %v48_v19 = vmul.f32 %v46_v18, %v46_v18  ;;  %v90_v60 = vmul.f32 %v178_v46, %v46_v18 }
  0x85   :  { %v52_v20 = vsel %vm29_vm0, %v48_v19, 0.0 }
  0x86   :  { %53 = vadd.xlane.f32.xlu1 %v52_v20 }
  0xf1   :  { %v51_v21 = vpop.xlane.xlu1 %50 }
  0xf2   :  { %v55_v22 = vmul.f32 0.032258064, %v51_v21 }
  0xf4   :  { %183 = vrsqrt.f32 %v55_v22  ;;  %vm64_vm3 = vcmp.eq.f32.partialorder %v55_v22, inf  ;;  %v67_v36 = vand.u32 2147483648, %v55_v22  ;;  %vm66_vm4 = vcmp.eq.f32.partialorder %v55_v22, 0.0 }
  0xf9   :  { %v54_v23 = vpop.xlane.xlu1 %53 }
  0xfa   :  { %v184_v24 = vpop.eup %183  ;;  %v56_v25 = vmul.f32 0.032258064, %v54_v23 }
  0xfb   :  { %v58_v26 = vmul.f32 %v184_v24, %v55_v22 }
  0xfc   :  { %185 = vrsqrt.f32 %v56_v25  ;;  %vm76_vm5 = vcmp.eq.f32.partialorder %v56_v25, inf  ;;  %v79_v49 = vand.u32 2147483648, %v56_v25  ;;  %vm78_vm6 = vcmp.eq.f32.partialorder %v56_v25, 0.0 }
  0xfd   :  { %v59_v27 = vmul.f32 %v184_v24, %v58_v26 }
  0xff   :  { %v60_v28 = vmul.f32 0.5, %v59_v27 }
 0x101   :  { %v61_v29 = vsub.f32 1.5, %v60_v28 }
 0x102   :  { %v186_v30 = vpop.eup %185 }
 0x103   :  { %v62_v31 = vmul.f32 %v184_v24, %v61_v29  ;;  %v70_v32 = vmul.f32 %v186_v30, %v56_v25 }
 0x105   :  { %v63_v34 = vmul.f32 %v62_v31, %v55_v22  ;;  %v71_v35 = vmul.f32 %v186_v30, %v70_v32 }
 0x107   :  { %v65_v37 = vsel %vm64_vm3, %v55_v22, %v63_v34  ;;  %v72_v38 = vmul.f32 0.5, %v71_v35 }
 0x108   :  { %v68_v39 = vsel %vm66_vm4, %v67_v36, %v65_v37 }
 0x109   :  { %v81_v40 = vadd.f32 1e-06, %v68_v39  ;;  %v73_v41 = vsub.f32 1.5, %v72_v38 }
 0x10b   :  { %187 = vrcp.f32 %v81_v40  ;;  %v74_v44 = vmul.f32 %v186_v30, %v73_v41 }
 0x10d   :  { %v75_v47 = vmul.f32 %v74_v44, %v56_v25 }
 0x10f   :  { %v77_v50 = vsel %vm76_vm5, %v56_v25, %v75_v47 }
 0x110   :  { %v80_v53 = vsel %vm78_vm6, %v79_v49, %v77_v50 }
 0x111   :  { %v188_v54 = vpop.eup %187  ;;  %v82_v55 = vadd.f32 1e-06, %v80_v53 }
 0x112   :  { %v91_v56 = vmul.f32 %v188_v54, %v89_v51 }
 0x113   :  { %189 = vrcp.f32 %v82_v55 }
 0x114   :  { %v97_v57 = vadd.f32 %v179_v52, %v91_v56 }
 0x116   :  { %v100_v58 = vsel %vm29_vm0, %v97_v57, -inf }
 0x117   :  { %v101_v59 = vrot.slane %v100_v58, 4 }
 0x119   :  { %v190_v61 = vpop.eup %189  ;;  %v102_v62 = vmax.f32 %v100_v58, %v101_v59 }
 0x11a   :  { %v92_v63 = vmul.f32 %v190_v61, %v90_v60 }
 0x11b   :  { %v103_v1 = vrot.slane %v102_v62, 2 }
 0x11c   :  { %v98_v0 = vadd.f32 %v179_v52, %v92_v63 }
 0x11d   :  { %v104_v4 = vmax.f32 %v102_v62, %v103_v1 }
 0x11e   :  { %v107_v2 = vsel %vm29_vm0, %v98_v0, -inf }
 0x11f   :  { %v108_v3 = vrot.slane %v107_v2, 4  ;;  %v105_v7 = vrot.slane %v104_v4, 1 }
 0x121   :  { %v109_v5 = vmax.f32 %v107_v2, %v108_v3  ;;  %v106_v10 = vmax.f32 %v104_v4, %v105_v7 }
 0x123   :  { %v110_v6 = vrot.slane %v109_v5, 2 }
 0x125   :  { %v111_v8 = vmax.f32 %v109_v5, %v110_v6 }
 0x127   :  { %v112_v9 = vrot.slane %v111_v8, 1 }
 0x129   :  { %v113_v11 = vmax.f32 %v111_v8, %v112_v9 }
 0x12b   :  { %v117_v13 = vsel %vm116_vm7, %v113_v11, %v106_v10 }
 0x12c   :  { %v119_v14 = vmax.f32 %v99_v12, %v117_v13 }
 0x12e   :  { %121 = vst.msk [vmem:[#allocation2] sm:$0x3] %vm25_vm2, %v119_v14 }
 0x135   :  { %v125_v15 = vld [vmem:[#allocation2] sm:$0x3] }
 0x136   :  { %174 = vmatmul.msk.f32.vlgmr.msra.gmra.mxu0 %vm29_vm0, %v125_v15 }
 0x1b3   :  { %v154_v17 = vpop.f32.mrf.mxu0 }
 0x1b4   :  { %v155_v18 = vadd.f32 %v180_v16, %v154_v17 }
 0x1b6   :  { %157 = vst [vmem:[#allocation3] sm:$0x3] %v155_v18 }
 0x1b7   :  { %168 = dma.vmem_to_hbm [thread:$0]  %s164_s8, 32, %s166_s11, [#allocation4]  }
 0x1b8   :  { %215 = dma.done.wait [#allocation4], 32  }
 0x1b9   :  { %216 = vsyncadd [#allocation4], 4294967264 }
 0x1ba   :  { %173 = vsyncpa [#allocation4], 1 }

// kernel: tenc_forward.24
= control target key start
LH: loop header
LB: loop body
LE: loop exit
PB: predicated region body
PF: predicated region fallthrough
CT: control target
= control target key end

     0   :  { %s1158_s21 = smov 0   ;;  %s1319_s0 = inlined_call_operand.vmem [shape: f32[2,8,32], index: 0, kind: input, shape index: {}]   ;;  %s1320_s1 = inlined_call_operand.vmem [shape: f32[2,8,64], index: 1, kind: input, shape index: {}]   ;;  %s1321_s2 = inlined_call_operand.vmem [shape: f32[2,1,8], index: 2, kind: input, shape index: {}]   ;;  %s1322_s3 = inlined_call_operand.vmem [shape: f32[32,32], index: 3, kind: input, shape index: {}]   ;;  %s1323_s4 = inlined_call_operand.vmem [shape: f32[1,32], index: 4, kind: input, shape index: {}]   ;;  %s1324_s5 = inlined_call_operand.vmem [shape: f32[2,8,32], index: 5, kind: input, shape index: {}]   ;;  %s1325_s6 = inlined_call_operand.vmem [shape: f32[2,8,32], index: 6, kind: output, shape index: {}]  }
   0x1 LB: > { %s992_s22 = sadd.s32 4294967295, %s1098_s21   ;;  %p996_p0 = scmp.ge.s32.totalorder %s1098_s21, 1  ;;  %s1098_s21 = sphi %s1158_s21, %s16_s21  }
   0x2   : > { %p237_p1 = scmp.lt.s32.totalorder %s1098_s21, 3 }
   0x4   : > { %p238_p2 = pnand %p996_p0, %p237_p1 }
   0x5   : > { %p276_p3 = scmp.lt.s32.totalorder (!%p238_p2), %s992_s22, 1  ;;  %s1100_s30 = smov (!%p238_p2), 124  }
   0x6   : > { %241 = sbr.rel (%p238_p2) target bundleno = 1247 (0x4df), region = 44  ;;  %s1101_s7 = smov (!%p238_p2), 116  }
   0x7   : > { %s1102_s8 = smov (!%p238_p2), 96   ;;  %s1103_s9 = smov (!%p238_p2), 120  }
   0x8   : > { %s1104_s10 = smov (!%p238_p2), 112   ;;  %s1105_s11 = smov (!%p238_p2), 108  }
   0x9   : > { %s1106_s12 = smov (!%p238_p2), 100   ;;  %s1107_s13 = smov (!%p238_p2), 104  }
   0xa   : > { %s1109_s17 = smov (!%p238_p2), 88   ;;  %s1110_s18 = smov (!%p238_p2), 80  }
   0xb   : > { %s1329_s22 = smov (!%p276_p3, %s992_s22), 1  ;;  %vm299_vm0 = vcmask 31744   ;;  %v1108_v10 = vmov 0   ;;  %vm331_vm3 = vcmask 64512   ;;  %s1111_s19 = smov 76   ;;  %vm861_vm4 = vcmask 97280  }
   0xc   : > { %s1169_s23 = sshll.u32 %s1329_s22, 3  ;;  %s286_s16 = scalar_lea.vmem %s1321_s2, %s1329_s22  ;;  %vm863_vm5 = vcmask 130048   ;;  %vm865_vm6 = vcmask 162816   ;;  %vm867_vm7 = vcmask 195584   ;;  %vm869_vm8 = vcmask 228352  }
   0xd   : > { %s283_s26 = scalar_lea.vmem %s1320_s1, %s1169_s23  ;;  %s279_s29 = scalar_lea.vmem %s1319_s0, %s1169_s23  ;;  %v297_v6 = vld [vmem:[%s286_s16] sm:$0x1]  ;;  %vm879_vm9 = vcmask 261120  }
   0xe   : > { %v1179_v0 = vld [vmem:[%s283_s26] sm:$0xff]  ;;  %vm326_vm1 = vcmp.gt.f32.partialorder %v297_v6, 0.5  ;;  %s1112_s20 = smov 72   ;;  %s1113_s22 = smov 92  }
   0xf   : > { %v295_v1 = vld [vmem:[%s279_s29] sm:$0xff]  ;;  %371 = vrot.lane.b32.xlu1 %v1179_v0, %s1100_s30  ;;  %1001 = vmatpush.xpose.msk.msra.mxu0 %vm299_vm0, %v1179_v0  ;;  %v327_v11 = vsel %vm326_vm1, 1, %v1108_v10  ;;  %s1114_s24 = smov 68   ;;  %s1115_s25 = smov 84  }
  0x10   : > { %v1184_v2 = vmul.f32 0.5, %v295_v1  ;;  %503 = vrot.lane.b32.xlu0 %v1179_v0, %s1101_s7  ;;  %343 = vrot.lane.b32.xlu2 %v1179_v0, %s1102_s8  ;;  %v328_v13 = vperm.slane %v327_v11, 0  ;;  %s1116_s26 = smov 4   ;;  %s1117_s27 = smov 24  }
  0x11   : > { %s1118_s28 = smov 12   ;;  %s1119_s29 = smov 8  }
  0x12   : > { %1002 = vmatmul.msk.f32.vlgmr.msra.gmra.mxu0 %vm299_vm0, %v1184_v2  ;;  %vm1211_vm2 = vcmp.eq.s32.totalorder %v328_v13, 1  ;;  %s1122_s8 = smov 28  }
  0x17   : > { %369 = vrot.lane.b32.xlu1 %v1184_v2, %s1100_s30  ;;  %s1120_s30 = smov 20  }
  0x18   : > { %437 = vrot.lane.b32.xlu2 %v1179_v0, %s1103_s9 }
  0x1f   : > { %435 = vrot.lane.b32.xlu1 %v1184_v2, %s1103_s9 }
  0x20   : > { %501 = vrot.lane.b32.xlu2 %v1184_v2, %s1101_s7  ;;  %s1121_s7 = smov 16  }
  0x27   : > { %569 = vrot.lane.b32.xlu1 %v1179_v0, %s1104_s10 }
  0x28   : > { %635 = vrot.lane.b32.xlu2 %v1179_v0, %s1105_s11 }
  0x2f   : > { %567 = vrot.lane.b32.xlu1 %v1184_v2, %s1104_s10 }
  0x30   : > { %633 = vrot.lane.b32.xlu2 %v1184_v2, %s1105_s11 }
  0x37   : > { %767 = vrot.lane.b32.xlu1 %v1179_v0, %s1106_s12 }
  0x38   : > { %699 = vrot.lane.b32.xlu2 %v1184_v2, %s1107_s13 }
  0x6a   : > { %v344_v3 = vpop.permute.xlu2 %343 }
  0x6b   : > { %364 = vmatpush.msra.mxu1 %v344_v3 }
  0x72   : > { %v438_v4 = vpop.permute.xlu2 %437 }
  0x73   : > { %1007 = vmatpush.xpose.msk.msrb.mxu1 %vm299_vm0, %v438_v4 }
  0x7a   : > { %v502_v5 = vpop.permute.xlu2 %501 }
  0x81   : > { %v372_v7 = vpop.permute.xlu1 %371 }
  0x82   : > { %1004 = vmatpush.xpose.msk.msra.mxu2 %vm299_vm0, %v372_v7  ;;  %v504_v8 = vpop.permute.xlu0 %503  ;;  %v636_v9 = vpop.permute.xlu2 %635 }
  0x83   : > { %1010 = vmatpush.xpose.msk.msrb.mxu0 %vm299_vm0, %v504_v8 }
  0x86   : > { %1011 = vmatmul.msk.f32.vlgmr.msrb.gmra.mxu0 %vm299_vm0, %v502_v5 }
  0x87   : > { %1016 = vmatpush.xpose.msk.msra.mxu0 %vm299_vm0, %v636_v9 }
  0x89   : > { %v370_v12 = vpop.permute.xlu1 %369 }
  0x8a   : > { %1005 = vmatmul.msk.f32.vlgmr.msra.gmra.mxu2 %vm299_vm0, %v370_v12  ;;  %v634_v14 = vpop.permute.xlu2 %633 }
  0x8e   : > { %1017 = vmatmul.msk.f32.vlgmr.msra.gmra.mxu0 %vm299_vm0, %v634_v14 }
  0x8f   : > { %v323_v16 = vpop.f32.mrf.mxu0 }
  0x90   : > { %v330_v17 = vsel %vm1211_vm2, -1e+09, %v323_v16 }
  0x91   : > { %v332_v18 = vsel %vm331_vm3, %v330_v17, -inf  ;;  %v436_v31 = vpop.permute.xlu1 %435 }
  0x92   : > { %333 = vmax.xlane.f32.xlu0 %v332_v18  ;;  %v700_v52 = vpop.permute.xlu2 %699 }
  0x99   : > { %v570_v32 = vpop.permute.xlu1 %569 }
  0xa1   : > { %v568_v33 = vpop.permute.xlu1 %567 }
  0xa6   : > { %701 = vrot.lane.b32.xlu0 %v1179_v0, %s1107_s13 }
  0xa9   : > { %v768_v34 = vpop.permute.xlu1 %767 }
  0xaa   : > { %1022 = vmatpush.xpose.msk.msrb.mxu0 %vm299_vm0, %v768_v34 }
 0x103   : > { %v526_v20 = vpop.f32.mrf.mxu0 }
 0x104   : > { %v529_v35 = vsel %vm1211_vm2, -1e+09, %v526_v20 }
 0x105   : > { %v334_v19 = vpop.xlane.xlu0 %333  ;;  %v530_v36 = vsel %vm331_vm3, %v529_v35, -inf }
 0x106   : > { %v335_v21 = vsub.f32 %v330_v17, %v334_v19 }
 0x108   : > { %v336_v22 = vmul.f32 1.442695, %v335_v21 }
 0x10a   : > { %1060 = vpow2.f32 %v336_v22 }
 0x10b   : > { %v658_v26 = vpop.f32.mrf.mxu0 }
 0x10c   : > { %v661_v29 = vsel %vm1211_vm2, -1e+09, %v658_v26 }
 0x10d   : > { %v394_v23 = vpop.f32.mrf.mxu2  ;;  %v662_v30 = vsel %vm331_vm3, %v661_v29, -inf }
 0x10e   : > { %v397_v24 = vsel %vm1211_vm2, -1e+09, %v394_v23 }
 0x10f   : > { %v398_v25 = vsel %vm331_vm3, %v397_v24, -inf }
 0x110   : > { %v1061_v27 = vpop.eup %1060  ;;  %399 = vmax.xlane.f32.xlu1 %v398_v25 }
 0x111   : > { %v338_v28 = vsel %vm331_vm3, %v1061_v27, 0.0 }
 0x112   : > { %339 = vadd.xlane.f32.xlu0 %v338_v28 }
 0x118   : > { %663 = vmax.xlane.f32.xlu1 %v662_v30  ;;  %v702_v37 = vpop.permute.xlu0 %701 }
 0x126   : > { %765 = vrot.lane.b32.xlu0 %v1184_v2, %s1106_s12 }
 0x150   : > { %531 = vmax.xlane.f32.xlu0 %v530_v36 }
 0x183   : > { %v400_v38 = vpop.xlane.xlu1 %399 }
 0x184   : > { %v401_v39 = vsub.f32 %v397_v24, %v400_v38 }
 0x185   : > { %v340_v40 = vpop.xlane.xlu0 %339 }
 0x186   : > { %v402_v41 = vmul.f32 1.442695, %v401_v39  ;;  %1062 = vrcp.f32 %v340_v40 }
 0x188   : > { %1064 = vpow2.f32 %v402_v41 }
 0x18b   : > { %v664_v42 = vpop.xlane.xlu1 %663 }
 0x18c   : > { %v1063_v43 = vpop.eup %1062  ;;  %v665_v44 = vsub.f32 %v661_v29, %v664_v42 }
 0x18d   : > { %v342_v45 = vmul.f32 %v1063_v43, %v1061_v27 }
 0x18e   : > { %v1233_v46 = vpop.eup %1064  ;;  %v666_v47 = vmul.f32 1.442695, %v665_v44 }
 0x18f   : > { %1003 = vmatmul.msk.f32.vlgmr.msra.gmra.mxu1 %vm331_vm3, %v342_v45  ;;  %v404_v48 = vsel %vm331_vm3, %v1233_v46, 0.0 }
 0x190   : > { %1066 = vpow2.f32 %v666_v47  ;;  %1013 = vmatpush.xpose.msk.msra.mxu1 %vm299_vm0, %v570_v32  ;;  %405 = vadd.xlane.f32.xlu1 %v404_v48 }
 0x196   : > { %v1239_v49 = vpop.eup %1066 }
 0x197   : > { %1008 = vmatmul.msk.f32.vlgmr.msrb.gmra.mxu1 %vm299_vm0, %v436_v31  ;;  %v668_v50 = vsel %vm331_vm3, %v1239_v49, 0.0 }
 0x198   : > { %1019 = vmatpush.xpose.msk.msrb.mxu1 %vm299_vm0, %v702_v37  ;;  %669 = vadd.xlane.f32.xlu0 %v668_v50  ;;  %v766_v51 = vpop.permute.xlu0 %765 }
 0x199   : > { %1023 = vmatmul.msk.f32.vlgmr.msrb.gmra.mxu0 %vm299_vm0, %v766_v51 }
 0x19f   : > { %1014 = vmatmul.msk.f32.vlgmr.msra.gmra.mxu1 %vm299_vm0, %v568_v33 }
 0x1a7   : > { %1020 = vmatmul.msk.f32.vlgmr.msrb.gmra.mxu1 %vm299_vm0, %v700_v52 }
 0x1c3   : > { %v532_v53 = vpop.xlane.xlu0 %531 }
 0x1c4   : > { %v533_v54 = vsub.f32 %v529_v35, %v532_v53 }
 0x1c6   : > { %v534_v55 = vmul.f32 1.442695, %v533_v54 }
 0x1c8   : > { %1068 = vpow2.f32 %v534_v55 }
 0x1ce   : > { %v1248_v56 = vpop.eup %1068 }
 0x1cf   : > { %v536_v57 = vsel %vm331_vm3, %v1248_v56, 0.0 }
 0x1d0   : > { %537 = vadd.xlane.f32.xlu1 %v536_v57 }
 0x1e9   : > { %475 = vrot.lane.b32.xlu1 %v1179_v0, %s1109_s17 }
 0x1f1   : > { %607 = vrot.lane.b32.xlu1 %v1179_v0, %s1110_s18 }
 0x1f9   : > { %673 = vrot.lane.b32.xlu1 %v1179_v0, %s1111_s19  ;;  %s290_s19 = scalar_lea.vmem %s1324_s5, %s1169_s23 }
 0x201   : > { %739 = vrot.lane.b32.xlu1 %v1179_v0, %s1112_s20 }
 0x203   : > { %v406_v13 = vpop.xlane.xlu1 %405 }
 0x209   : > { %805 = vrot.lane.b32.xlu1 %v1179_v0, %s1114_s24 }
 0x20b   : > { %v1272_v9 = vpop.xlane.xlu0 %669 }
 0x20c   : > { %v1252_v58 = vpop.f32.mrf.mxu1 }
 0x214   : > { %v460_v59 = vpop.f32.mrf.mxu1 }
 0x215   : > { %v463_v1 = vsel %vm1211_vm2, -1e+09, %v460_v59 }
 0x216   : > { %v790_v60 = vpop.f32.mrf.mxu0  ;;  %v464_v2 = vsel %vm331_vm3, %v463_v1, -inf }
 0x217   : > { %v793_v61 = vsel %vm1211_vm2, -1e+09, %v790_v60 }
 0x218   : > { %v794_v62 = vsel %vm331_vm3, %v793_v61, -inf }
 0x219   : > { %795 = vmax.xlane.f32.xlu2 %v794_v62 }
 0x21c   : > { %v592_v63 = vpop.f32.mrf.mxu1 }
 0x21d   : > { %v595_v4 = vsel %vm1211_vm2, -1e+09, %v592_v63  ;;  %v874_v63 = vld [vmem:[%s1322_s3 + $0x18] sm:$0xff] }
 0x21e   : > { %v596_v7 = vsel %vm331_vm3, %v595_v4, -inf  ;;  %895 = vmatpush.msra.mxu1 %v874_v63 }
 0x221   : > { %465 = vmax.xlane.f32.xlu2 %v464_v2  ;;  %v872_v2 = vld [vmem:[%s1322_s3 + $0x8] sm:$0xff] }
 0x224   : > { %v724_v3 = vpop.f32.mrf.mxu1 }
 0x225   : > { %v727_v5 = vsel %vm1211_vm2, -1e+09, %v724_v3  ;;  %v871_v3 = vld [vmem:[%s1322_s3] sm:$0xff] }
 0x226   : > { %v728_v6 = vsel %vm331_vm3, %v727_v5, -inf }
 0x227   : > { %729 = vmax.xlane.f32.xlu0 %v728_v6 }
 0x229   : > { %597 = vmax.xlane.f32.xlu2 %v596_v7 }
 0x241   : > { %409 = vrot.lane.b32.xlu2 %v1179_v0, %s1113_s22 }
 0x243   : > { %v538_v29 = vpop.xlane.xlu1 %537 }
 0x25b   : > { %v476_v30 = vpop.permute.xlu1 %475 }
 0x263   : > { %v608_v35 = vpop.permute.xlu1 %607 }
 0x26b   : > { %v674_v36 = vpop.permute.xlu1 %673 }
 0x273   : > { %v740_v41 = vpop.permute.xlu1 %739 }
 0x27b   : > { %v806_v53 = vpop.permute.xlu1 %805 }
 0x28c   : > { %v796_v8 = vpop.xlane.xlu2 %795 }
 0x28d   : > { %v797_v31 = vsub.f32 %v793_v61, %v796_v8 }
 0x28f   : > { %v798_v32 = vmul.f32 1.442695, %v797_v31 }
 0x294   : > { %v466_v10 = vpop.xlane.xlu2 %465 }
 0x295   : > { %v467_v11 = vsub.f32 %v463_v1, %v466_v10  ;;  %v873_v1 = vld [vmem:[%s1322_s3 + $0x10] sm:$0xff] }
 0x296   : > { %896 = vmatpush.msra.mxu1 %v873_v1 }
 0x297   : > { %v468_v12 = vmul.f32 1.442695, %v467_v11 }
 0x298   : > { %897 = vmatpush.msra.mxu1 %v872_v2 }
 0x299   : > { %1070 = vpow2.f32 %v468_v12 }
 0x29a   : > { %v730_v14 = vpop.xlane.xlu0 %729  ;;  %1072 = vrcp.f32 %v406_v13  ;;  %898 = vmatpush.msra.mxu1 %v871_v3 }
 0x29b   : > { %v731_v15 = vsub.f32 %v727_v5, %v730_v14 }
 0x29c   : > { %v598_v16 = vpop.xlane.xlu2 %597 }
 0x29d   : > { %v732_v17 = vmul.f32 1.442695, %v731_v15  ;;  %v599_v18 = vsub.f32 %v595_v4, %v598_v16 }
 0x29f   : > { %v1071_v19 = vpop.eup %1070  ;;  %1074 = vpow2.f32 %v732_v17  ;;  %v600_v20 = vmul.f32 1.442695, %v599_v18 }
 0x2a0   : > { %v470_v21 = vsel %vm331_vm3, %v1071_v19, 0.0  ;;  %v1073_v22 = vpop.eup %1072 }
 0x2a1   : > { %1076 = vpow2.f32 %v600_v20  ;;  %471 = vadd.xlane.f32.xlu0 %v470_v21  ;;  %v408_v24 = vmul.f32 %v1073_v22, %v1233_v46 }
 0x2a2   : > { %1078 = vpow2.f32 %v798_v32 }
 0x2a4   : > { %v410_v23 = vpop.permute.xlu2 %409 }
 0x2a5   : > { %v1075_v25 = vpop.eup %1074  ;;  %430 = vmatpush.msra.mxu3 %v410_v23 }
 0x2a6   : > { %1006 = vmatmul.msk.f32.vlgmr.msra.gmra.mxu3 %vm331_vm3, %v408_v24  ;;  %v734_v26 = vsel %vm331_vm3, %v1075_v25, 0.0 }
 0x2a7   : > { %v1077_v27 = vpop.eup %1076  ;;  %735 = vadd.xlane.f32.xlu2 %v734_v26  ;;  %496 = vmatpush.msrb.mxu3 %v476_v30 }
 0x2a8   : > { %v602_v28 = vsel %vm331_vm3, %v1077_v27, 0.0  ;;  %v1079_v33 = vpop.eup %1078 }
 0x2a9   : > { %603 = vadd.xlane.f32.xlu0 %v602_v28  ;;  %v800_v34 = vsel %vm331_vm3, %v1079_v33, 0.0  ;;  %628 = vmatpush.msra.mxu3 %v608_v35 }
 0x2bd   : > { %541 = vrot.lane.b32.xlu0 %v1179_v0, %s1115_s25 }
 0x2e7   : > { %801 = vadd.xlane.f32.xlu0 %v800_v34 }
 0x314   : > { %v472_v37 = vpop.xlane.xlu0 %471 }
 0x315   : > { %1080 = vrcp.f32 %v472_v37 }
 0x31a   : > { %v736_v0 = vpop.xlane.xlu2 %735 }
 0x31b   : > { %v1081_v38 = vpop.eup %1080 }
 0x31c   : > { %v604_v39 = vpop.xlane.xlu0 %603  ;;  %v474_v40 = vmul.f32 %v1081_v38, %v1071_v19  ;;  %v903_v19 = vld [vmem:[%s290_s19] sm:$0xff] }
 0x31d   : > { %1082 = vrcp.f32 %v604_v39 }
 0x31e   : > { %1009 = vmatmul.msk.f32.vlgmr.msrb.gmra.mxu3 %vm331_vm3, %v474_v40  ;;  %1084 = vrcp.f32 %v736_v0 }
 0x31f   : > { %760 = vmatpush.msrb.mxu3 %v740_v41  ;;  %1086 = vrcp.f32 %v538_v29 }
 0x320   : > { %1088 = vrcp.f32 %v1272_v9 }
 0x323   : > { %v1083_v42 = vpop.eup %1082 }
 0x324   : > { %v606_v43 = vmul.f32 %v1083_v42, %v1077_v27  ;;  %v1085_v44 = vpop.eup %1084 }
 0x325   : > { %v1087_v46 = vpop.eup %1086  ;;  %v738_v47 = vmul.f32 %v1085_v44, %v1075_v25 }
 0x326   : > { %1015 = vmatmul.msk.f32.vlgmr.msra.gmra.mxu3 %vm331_vm3, %v606_v43  ;;  %v540_v50 = vmul.f32 %v1087_v46, %v1248_v56  ;;  %v1089_v51 = vpop.eup %1088 }
 0x327   : > { %v672_v52 = vmul.f32 %v1089_v51, %v1239_v49 }
 0x329   : > { %v432_v45 = vpop.f32.mrf.mxu3 }
 0x32a   : > { %832 = vrot.lane.b32.xlu2 %v432_v45, %s1116_s26  ;;  %s294_s26 = scalar_lea.vmem %s1325_s6, %s1169_s23 }
 0x32e   : > { %1021 = vmatmul.msk.f32.vlgmr.msrb.gmra.mxu3 %vm331_vm3, %v738_v47 }
 0x32f   : > { %v542_v48 = vpop.permute.xlu0 %541 }
 0x330   : > { %562 = vmatpush.msrb.mxu2 %v542_v48 }
 0x331   : > { %1012 = vmatmul.msk.f32.vlgmr.msrb.gmra.mxu2 %vm331_vm3, %v540_v50 }
 0x332   : > { %694 = vmatpush.msra.mxu2 %v674_v36 }
 0x334   : > { %826 = vmatpush.msrb.mxu2 %v806_v53 }
 0x339   : > { %1018 = vmatmul.msk.f32.vlgmr.msra.gmra.mxu2 %vm331_vm3, %v672_v52 }
 0x35a   : > { %v802_v54 = vpop.xlane.xlu0 %801 }
 0x35b   : > { %1090 = vrcp.f32 %v802_v54 }
 0x361   : > { %v1091_v55 = vpop.eup %1090 }
 0x362   : > { %v804_v57 = vmul.f32 %v1091_v55, %v1079_v33 }
 0x364   : > { %1024 = vmatmul.msk.f32.vlgmr.msrb.gmra.mxu2 %vm331_vm3, %v804_v57 }
 0x384   : > { %v833_v6 = vpop.permute.xlu2 %832 }
 0x385   : > { %v859_v7 = vsel %vm299_vm0, %v1252_v58, %v833_v6  ;;  %v1059_v58 = vld [vmem:[%s1323_s4] ss:$0 sm:$0xff] }
 0x3a1   : > { %v498_v59 = vpop.f32.mrf.mxu3 }
 0x3a9   : > { %v630_v60 = vpop.f32.mrf.mxu3 }
 0x3b1   : > { %v762_v56 = vpop.f32.mrf.mxu3 }
 0x3b2   : > { %852 = vrot.lane.b32.xlu2 %v762_v56, %s1117_s27 }
 0x3b4   : > { %v564_v61 = vpop.f32.mrf.mxu2 }
 0x3b5   : > { %840 = vrot.lane.b32.xlu1 %v564_v61, %s1118_s28 }
 0x3bc   : > { %v696_v62 = vpop.f32.mrf.mxu2 }
 0x3bd   : > { %836 = vrot.lane.b32.xlu1 %v498_v59, %s1119_s29  ;;  %848 = vrot.lane.b32.xlu0 %v696_v62, %s1120_s30 }
 0x3c5   : > { %844 = vrot.lane.b32.xlu1 %v630_v60, %s1121_s7 }
 0x3e7   : > { %v828_v49 = vpop.f32.mrf.mxu2 }
 0x3e8   : > { %856 = vrot.lane.b32.xlu1 %v828_v49, %s1122_s8 }
 0x40c   : > { %v853_v14 = vpop.permute.xlu2 %852 }
 0x427   : > { %v841_v4 = vpop.permute.xlu1 %840 }
 0x42f   : > { %v837_v5 = vpop.permute.xlu1 %836  ;;  %v849_v12 = vpop.permute.xlu0 %848 }
 0x430   : > { %v860_v8 = vsel %vm331_vm3, %v859_v7, %v837_v5 }
 0x431   : > { %v862_v10 = vsel %vm861_vm4, %v860_v8, %v841_v4 }
 0x437   : > { %v845_v9 = vpop.permute.xlu1 %844 }
 0x438   : > { %v864_v11 = vsel %vm863_vm5, %v862_v10, %v845_v9 }
 0x439   : > { %v866_v13 = vsel %vm865_vm6, %v864_v11, %v849_v12 }
 0x43a   : > { %v868_v16 = vsel %vm867_vm7, %v866_v13, %v853_v14 }
 0x45a   : > { %v857_v15 = vpop.permute.xlu1 %856 }
 0x45b   : > { %v870_v17 = vsel %vm869_vm8, %v868_v16, %v857_v15 }
 0x45c   : > { %1025 = vmatmul.msk.f32.vlgmr.msra.gmra.mxu1 %vm879_vm9, %v870_v17 }
 0x4d9   : > { %v900_v18 = vpop.f32.mrf.mxu1 }
 0x4da   : > { %v901_v20 = vadd.f32 %v1059_v58, %v900_v18 }
 0x4dc   : > { %v904_v21 = vadd.f32 %v903_v19, %v901_v20 }
 0x4de   : > { %905 = vst.msk [vmem:[%s294_s26] sm:$0xff] %vm879_vm9, %v904_v21 }
 0x4df PF: > { %s16_s21 = sadd.s32 1, %s1098_s21  }
 0x4e0   : > { %p13_p4 = scmp.ge.s32.totalorder %s16_s21, 4  }
 0x4e2   :  { %15 = sbr.rel (!%p13_p4) target bundleno = 1 (0x1), region = 83 }

</bundles_post_ra>
